<compile_context>
chip_gen: v7x
topology: tpu7x:2x2x1
jax: 0.10.0
libtpu: 0.0.40
codegen_flags: <defaults>
</compile_context>

<pallas_src>
import functools

import jax
import jax.numpy as jnp
from jax.experimental import pallas as pl
from jax.experimental.pallas import tpu as pltpu

EPS = 1e-5
LANE = 128
WIDTH_ALIGN = 16        # multiple of 16: tile-aligned for f32 (8,128) and bf16 (16,128)
MID_OFF = 16            # column offset of the activation inside the conv2 scratch
VMEM_LIMIT = 48 * 1024 * 1024   # within v7x's 64 MiB physical VMEM, plenty of headroom


def _round_up(x, m):
    return ((x + m - 1) // m) * m


# --------------------------------------------------------------------------- #
# in-kernel helpers
# --------------------------------------------------------------------------- #
def _conv3x3_acc(load_patch, w_ref, H, Wv, cout_p):
    """Accumulate the 9 taps of a 3x3 conv into an f32 (H*Wv, cout_p) slab.

    load_patch(dy, dx) returns an (H, Wv, cin_p) bf16 window of the zero-padded input,
    read directly from the VMEM ref at spatial offset (dy, dx).  Each tap is one MXU
    matmul (K = cin_p, N = cout_p; cout_p % 128 == 0 -> lane dense)."""
    acc = jnp.zeros((H * Wv, cout_p), jnp.float32)
    for dy in range(3):
        for dx in range(3):
            patch = load_patch(dy, dx)                    # (H, Wv, cin_p) bf16
            cin_p = patch.shape[-1]
            patch2d = patch.reshape(H * Wv, cin_p)        # Wv % 16 == 0 -> layout free
            acc = acc + jnp.dot(patch2d, w_ref[dy * 3 + dx],
                                preferred_element_type=jnp.float32)
    return acc


def _zero_cols_ge(x3, W):
    """Zero columns >= W of an (H, Wv, C) f32 value (only emitted when Wv > W)."""
    col = jax.lax.broadcasted_iota(jnp.int32, x3.shape, 1)
    return jnp.where(col < W, x3, 0.0)


def _stats(flat):
    """One-pass BN partial sums: (2, C) = [sum, sum of squares] over rows."""
    return jnp.concatenate(
        [jnp.sum(flat, axis=0, keepdims=True),
         jnp.sum(flat * flat, axis=0, keepdims=True)], axis=0)


# --------------------------------------------------------------------------- #
# kernels
# --------------------------------------------------------------------------- #
def _conv1_stats_kernel(x_ref, w_ref, y_ref, st_ref, *, H, W, Wv):
    # x_ref : (H+2, Wv+2, Ci_p) bf16 (zero padded)    w_ref : (9, Ci_p, Cm_p) bf16
    # y_ref : (H, Wv, Cm_p) bf16 raw conv1 (no bias)  st_ref: (2, Cm_p) f32 partial sums
    def load_patch(dy, dx):
        return x_ref[dy:dy + H, dx:dx + Wv, :]

    acc = _conv3x3_acc(load_patch, w_ref, H, Wv, y_ref.shape[-1])
    acc3 = acc.reshape(H, Wv, -1)
    if Wv != W:                       # static: zero the width-alignment pad columns
        acc3 = _zero_cols_ge(acc3, W)
    st_ref[...] = _stats(acc3.reshape(H * Wv, -1))
    y_ref[...] = acc3.astype(y_ref.dtype)


def _bn_relu_conv2_stats_kernel(y1_ref, s1_ref, t1_ref, w_ref, y2_ref, st_ref,
                                mid_ref, *, H, W, Wv):
    # y1_ref: (H, Wv, Cm_p) bf16 raw conv1        s1/t1: (1, Cm_p) f32 fused BN1 scale/shift
    # w_ref : (9, Cm_p, Co_p) bf16
    # y2_ref: (H, Wv, Co_p) bf16 raw conv2        st_ref: (2, Co_p) f32 partial sums
    # mid_ref: (H+2, Wm, Cm_p) bf16 scratch; activation lives at [1:H+1, MID_OFF:MID_OFF+Wv]

    # ---- BN1 (folded scale/shift) + ReLU, elementwise math in f32 ----
    a = y1_ref[...].astype(jnp.float32) * s1_ref[...] + t1_ref[...]
    a = jnp.maximum(a, 0.0)
    if Wv != W:                       # alignment-pad columns must be exact zeros
        a = _zero_cols_ge(a, W)

    # ---- zero-bordered intermediate: cheap VMEM-local zero fill + one aligned store ----
    mid_ref[...] = jnp.zeros_like(mid_ref)
    mid_ref[1:H + 1, MID_OFF:MID_OFF + Wv, :] = a.astype(jnp.bfloat16)

    # ---- conv2 over the zero-bordered intermediate (windows start at col MID_OFF-1) ----
    def load_patch(dy, dx):
        c0 = MID_OFF - 1 + dx
        return mid_ref[dy:dy + H, c0:c0 + Wv, :]

    acc = _conv3x3_acc(load_patch, w_ref, H, Wv, y2_ref.shape[-1])
    acc3 = acc.reshape(H, Wv, -1)
    if Wv != W:
        acc3 = _zero_cols_ge(acc3, W)
    st_ref[...] = _stats(acc3.reshape(H * Wv, -1))
    y2_ref[...] = acc3.astype(y2_ref.dtype)


def _bn2_act_kernel(y2_ref, s2_ref, t2_ref, o_ref, *, use_act):
    # y2_ref: (H, Wv, Co_p) bf16,  s2/t2: (1, Co_p) f32,  o_ref: (H, Wv, Co_p) f32
    y = y2_ref[...].astype(jnp.float32) * s2_ref[...] + t2_ref[...]
    if use_act:
        y = jnp.maximum(y, 0.0)
    o_ref[...] = y.astype(o_ref.dtype)


# --------------------------------------------------------------------------- #
# wrapper
# --------------------------------------------------------------------------- #
def _fold_bn(stats, count, gamma_p, beta_p):
    """Per-image partial sums (N, 2, C) -> fused per-channel BN scale/shift (f32)."""
    total = jnp.sum(stats, axis=0)                           # (2, C)
    mean = total[0] / count
    var = jnp.maximum(total[1] / count - mean * mean, 0.0)   # biased, train-mode BN
    scale = gamma_p * jax.lax.rsqrt(var + EPS)
    shift = beta_p - mean * scale
    return scale.reshape(1, -1), shift.reshape(1, -1)


def double_conv_block(x_nchw, params, *, use_act=True, stride=1):
    assert stride == 1, "TODO(synk): conv1 stride > 1 not implemented"
    w1, b1, g1, be1, w2, b2, g2, be2 = params
    del b1, b2  # conv biases are exactly cancelled by train-mode BN mean subtraction
    N, Cin, H, W = x_nchw.shape
    Cmid, Cout = w1.shape[0], w2.shape[0]

    Ci_p = _round_up(Cin, 8)              # conv1 contraction dim: sublane aligned
    Cm_p = _round_up(Cmid, LANE)          # lane-dense intermediate / matmul N dim
    Co_p = _round_up(Cout, LANE)          # lane-dense output stores
    Wv = _round_up(W, WIDTH_ALIGN)        # output width -> layout-free reshapes, dense stores
    Win = Wv + 2                          # input width incl. conv zero padding
    Wm = Wv + 2 * MID_OFF                 # scratch width: activation at 16-aligned offset

    # --- layout prep (XLA): NCHW -> NHWC bf16, spatial + channel zero pad ---
    x = jnp.transpose(x_nchw, (0, 2, 3, 1)).astype(jnp.bfloat16)
    x = jnp.pad(x, ((0, 0), (1, 1), (1, Win - W - 1), (0, Ci_p - Cin)))
    # TODO(synk): fold this pad/transpose into pass 1's index_map to skip one HBM round trip.

    def pack_w(w, ci, ci_p, co, co_p):
        # (Cout, Cin, 3, 3) -> (9, Cin_p, Cout_p): one (K, N) matrix per 3x3 tap.
        wt = jnp.transpose(w, (2, 3, 1, 0)).reshape(9, ci, co)
        return jnp.pad(wt, ((0, 0), (0, ci_p - ci), (0, co_p - co))).astype(jnp.bfloat16)

    w1_t = pack_w(w1, Cin, Ci_p, Cmid, Cm_p)
    w2_t = pack_w(w2, Cmid, Cm_p, Cout, Co_p)
    g1_p = jnp.pad(g1.astype(jnp.float32), (0, Cm_p - Cmid))
    be1_p = jnp.pad(be1.astype(jnp.float32), (0, Cm_p - Cmid))
    g2_p = jnp.pad(g2.astype(jnp.float32), (0, Co_p - Cout))
    be2_p = jnp.pad(be2.astype(jnp.float32), (0, Co_p - Cout))

    count = N * H * W
    cparams = pltpu.CompilerParams(
        dimension_semantics=("parallel",),     # images are independent -> megacore split
        vmem_limit_bytes=VMEM_LIMIT)

    # -------- pass 1: conv1 + per-image BN1 partial sums --------
    flops1 = 2 * N * H * Wv * 9 * Ci_p * Cm_p
    bytes1 = x.size * 2 + w1_t.size * 2 + N * H * Wv * Cm_p * 2 + N * 2 * Cm_p * 4
    y1_raw, st1 = pl.pallas_call(
        functools.partial(_conv1_stats_kernel, H=H, W=W, Wv=Wv),
        grid=(N,),
        in_specs=[
            pl.BlockSpec((None, H + 2, Win, Ci_p), lambda n: (n, 0, 0, 0)),
            pl.BlockSpec((9, Ci_p, Cm_p), lambda n: (0, 0, 0)),
        ],
        out_specs=(
            pl.BlockSpec((None, H, Wv, Cm_p), lambda n: (n, 0, 0, 0)),
            pl.BlockSpec((None, 2, Cm_p), lambda n: (n, 0, 0)),
        ),
        out_shape=(
            jax.ShapeDtypeStruct((N, H, Wv, Cm_p), jnp.bfloat16),
            jax.ShapeDtypeStruct((N, 2, Cm_p), jnp.float32),
        ),
        compiler_params=cparams,
        cost_estimate=pl.CostEstimate(flops=flops1, transcendentals=0,
                                      bytes_accessed=bytes1),
    )(x, w1_t)

    scale1, shift1 = _fold_bn(st1, count, g1_p, be1_p)

    # -------- pass 2: BN1 + ReLU -> conv2 + per-image BN2 partial sums --------
    flops2 = 2 * N * H * Wv * 9 * Cm_p * Co_p + 4 * N * H * Wv * Cm_p
    bytes2 = (N * H * Wv * Cm_p * 2 + w2_t.size * 2 + 4 * Cm_p * 4 +
              N * H * Wv * Co_p * 2 + N * 2 * Co_p * 4)
    y2_raw, st2 = pl.pallas_call(
        functools.partial(_bn_relu_conv2_stats_kernel, H=H, W=W, Wv=Wv),
        grid=(N,),
        in_specs=[
            pl.BlockSpec((None, H, Wv, Cm_p), lambda n: (n, 0, 0, 0)),
            pl.BlockSpec((1, Cm_p), lambda n: (0, 0)),
            pl.BlockSpec((1, Cm_p), lambda n: (0, 0)),
            pl.BlockSpec((9, Cm_p, Co_p), lambda n: (0, 0, 0)),
        ],
        out_specs=(
            pl.BlockSpec((None, H, Wv, Co_p), lambda n: (n, 0, 0, 0)),
            pl.BlockSpec((None, 2, Co_p), lambda n: (n, 0, 0)),
        ),
        out_shape=(
            jax.ShapeDtypeStruct((N, H, Wv, Co_p), jnp.bfloat16),
            jax.ShapeDtypeStruct((N, 2, Co_p), jnp.float32),
        ),
        scratch_shapes=[pltpu.VMEM((H + 2, Wm, Cm_p), jnp.bfloat16)],
        compiler_params=cparams,
        cost_estimate=pl.CostEstimate(flops=flops2, transcendentals=0,
                                      bytes_accessed=bytes2),
    )(y1_raw, scale1, shift1, w2_t)

    scale2, shift2 = _fold_bn(st2, count, g2_p, be2_p)

    # -------- pass 3: BN2 (+ ReLU), lane-dense elementwise --------
    out_p = pl.pallas_call(
        functools.partial(_bn2_act_kernel, use_act=use_act),
        grid=(N,),
        in_specs=[
            pl.BlockSpec((None, H, Wv, Co_p), lambda n: (n, 0, 0, 0)),
            pl.BlockSpec((1, Co_p), lambda n: (0, 0)),
            pl.BlockSpec((1, Co_p), lambda n: (0, 0)),
        ],
        out_specs=pl.BlockSpec((None, H, Wv, Co_p), lambda n: (n, 0, 0, 0)),
        out_shape=jax.ShapeDtypeStruct((N, H, Wv, Co_p), jnp.float32),
        compiler_params=cparams,
        cost_estimate=pl.CostEstimate(flops=3 * N * H * Wv * Co_p, transcendentals=0,
                                      bytes_accessed=N * H * Wv * Co_p * 6),
    )(y2_raw, scale2, shift2)

    # unpad + back to NCHW (layout-only work, done in XLA as recommended)
    return jnp.transpose(out_p[:, :, :W, :Cout], (0, 3, 1, 2))


# ---------------------------- pure-JAX reference ---------------------------- #
def reference(x, params, use_act=True):
    w1, b1, g1, be1, w2, b2, g2, be2 = params

    def conv(x, w, b):
        y = jax.lax.conv_general_dilated(
            x, w, window_strides=(1, 1), padding=((1, 1), (1, 1)),
            dimension_numbers=("NCHW", "OIHW", "NCHW"))
        return y + b[None, :, None, None]

    def bn(x, g, be):
        m = jnp.mean(x, axis=(0, 2, 3), keepdims=True)
        v = jnp.mean((x - m) ** 2, axis=(0, 2, 3), keepdims=True)
        return (x - m) * jax.lax.rsqrt(v + EPS) * g[None, :, None, None] + be[None, :, None, None]

    y = jnp.maximum(bn(conv(x, w1, b1), g1, be1), 0.0)
    y = bn(conv(y, w2, b2), g2, be2)
    if use_act:
        y = jnp.maximum(y, 0.0)
    return y


def make_params(key, in_features, mid_features, out_features=None):
    if out_features is None:
        out_features = mid_features
    ks = jax.random.split(key, 8)
    w1 = jax.random.normal(ks[0], (mid_features, in_features, 3, 3), jnp.float32) * 0.2
    b1 = jax.random.normal(ks[1], (mid_features,), jnp.float32) * 0.1
    g1 = 1.0 + 0.1 * jax.random.normal(ks[2], (mid_features,), jnp.float32)
    be1 = 0.1 * jax.random.normal(ks[3], (mid_features,), jnp.float32)
    w2 = jax.random.normal(ks[4], (out_features, mid_features, 3, 3), jnp.float32) * 0.2
    b2 = jax.random.normal(ks[5], (out_features,), jnp.float32) * 0.1
    g2 = 1.0 + 0.1 * jax.random.normal(ks[6], (out_features,), jnp.float32)
    be2 = 0.1 * jax.random.normal(ks[7], (out_features,), jnp.float32)
    return (w1, b1, g1, be1, w2, b2, g2, be2)


if __name__ == "__main__":
    key = jax.random.PRNGKey(0)
    kx, kp = jax.random.split(key)

    N, Cin, H, W = 2, 4, 16, 16
    Cmid = 8  # out_features=None -> out_features == mid_features
    x = jax.random.normal(kx, (N, Cin, H, W), jnp.float32)
    params = make_params(kp, Cin, Cmid)

    fwd = jax.jit(functools.partial(double_conv_block, use_act=True))
    out = jax.block_until_ready(fwd(x, params))

    ref = reference(x, params, use_act=True)
    assert out.shape == (N, Cmid, H, W), out.shape
    max_err = float(jnp.max(jnp.abs(out - ref)))
    # bf16 MXU operands -> bf16-appropriate tolerance vs the f32 reference.
    assert jnp.allclose(out, ref, atol=7.5e-2, rtol=5e-2), max_err

    print("KERNEL_OK")
</pallas_src>

<mosaic_0001>
module attributes {stable_mosaic.version = 11 : i64} {
  func.func @_conv1_stats_kernel(%arg0: i32, %arg1: memref<1x18x18x8xbf16, #tpu.memory_space<vmem>>, %arg2: memref<9x8x128xbf16, #tpu.memory_space<vmem>>, %arg3: memref<1x16x16x128xbf16, #tpu.memory_space<vmem>>, %arg4: memref<1x2x128xf32, #tpu.memory_space<vmem>>) attributes {dimension_semantics = [#tpu.dimension_semantics<parallel>], iteration_bounds = array<i64: 2>, scalar_prefetch = 0 : i64, scratch_operands = 0 : i64, tpu.core_type = #tpu.core_type<tc>, window_params = [{transform_indices = @transform_0, window_bounds = array<i64: 1, 18, 18, 8>}, {pipeline_mode = #tpu.pipeline_mode<synchronous>, transform_indices = @transform_1, window_bounds = array<i64: 9, 8, 128>}, {transform_indices = @transform_2, window_bounds = array<i64: 1, 16, 16, 128>}, {transform_indices = @transform_3, window_bounds = array<i64: 1, 2, 128>}]} {
    %cst = arith.constant 0.000000e+00 : f32
    %0 = vector.broadcast %cst : f32 to vector<256x128xf32>
    %c0 = arith.constant 0 : index
    %c0_0 = arith.constant 0 : index
    %c0_1 = arith.constant 0 : index
    %c0_2 = arith.constant 0 : index
    %1 = vector.load %arg1[%c0, %c0_0, %c0_1, %c0_2] : memref<1x18x18x8xbf16, #tpu.memory_space<vmem>>, vector<1x16x16x8xbf16>
    %2 = vector.shape_cast %1 : vector<1x16x16x8xbf16> to vector<16x16x8xbf16>
    %3 = vector.shape_cast %2 : vector<16x16x8xbf16> to vector<256x8xbf16>
    %c0_3 = arith.constant 0 : index
    %c0_4 = arith.constant 0 : index
    %c0_5 = arith.constant 0 : index
    %4 = vector.load %arg2[%c0_3, %c0_4, %c0_5] : memref<9x8x128xbf16, #tpu.memory_space<vmem>>, vector<1x8x128xbf16>
    %5 = vector.shape_cast %4 : vector<1x8x128xbf16> to vector<8x128xbf16>
    %cst_6 = arith.constant dense<0.000000e+00> : vector<256x128xf32>
    %6 = tpu.matmul %3, %5, %cst_6 {dimension_numbers = #tpu.dot_dimension_numbers<[1], [0], [0], [1], [0, 0, 1, 1], [], []>} : vector<256x8xbf16>, vector<8x128xbf16>, vector<256x128xf32> -> vector<256x128xf32>
    %7 = arith.addf %0, %6 : vector<256x128xf32>
    %c0_7 = arith.constant 0 : index
    %c0_8 = arith.constant 0 : index
    %c1 = arith.constant 1 : index
    %c0_9 = arith.constant 0 : index
    %8 = vector.load %arg1[%c0_7, %c0_8, %c1, %c0_9] : memref<1x18x18x8xbf16, #tpu.memory_space<vmem>>, vector<1x16x16x8xbf16>
    %9 = vector.shape_cast %8 : vector<1x16x16x8xbf16> to vector<16x16x8xbf16>
    %10 = vector.shape_cast %9 : vector<16x16x8xbf16> to vector<256x8xbf16>
    %c1_10 = arith.constant 1 : index
    %c0_11 = arith.constant 0 : index
    %c0_12 = arith.constant 0 : index
    %11 = vector.load %arg2[%c1_10, %c0_11, %c0_12] : memref<9x8x128xbf16, #tpu.memory_space<vmem>>, vector<1x8x128xbf16>
    %12 = vector.shape_cast %11 : vector<1x8x128xbf16> to vector<8x128xbf16>
    %cst_13 = arith.constant dense<0.000000e+00> : vector<256x128xf32>
    %13 = tpu.matmul %10, %12, %cst_13 {dimension_numbers = #tpu.dot_dimension_numbers<[1], [0], [0], [1], [0, 0, 1, 1], [], []>} : vector<256x8xbf16>, vector<8x128xbf16>, vector<256x128xf32> -> vector<256x128xf32>
    %14 = arith.addf %7, %13 : vector<256x128xf32>
    %c0_14 = arith.constant 0 : index
    %c0_15 = arith.constant 0 : index
    %c2 = arith.constant 2 : index
    %c0_16 = arith.constant 0 : index
    %15 = vector.load %arg1[%c0_14, %c0_15, %c2, %c0_16] : memref<1x18x18x8xbf16, #tpu.memory_space<vmem>>, vector<1x16x16x8xbf16>
    %16 = vector.shape_cast %15 : vector<1x16x16x8xbf16> to vector<16x16x8xbf16>
    %17 = vector.shape_cast %16 : vector<16x16x8xbf16> to vector<256x8xbf16>
    %c2_17 = arith.constant 2 : index
    %c0_18 = arith.constant 0 : index
    %c0_19 = arith.constant 0 : index
    %18 = vector.load %arg2[%c2_17, %c0_18, %c0_19] : memref<9x8x128xbf16, #tpu.memory_space<vmem>>, vector<1x8x128xbf16>
    %19 = vector.shape_cast %18 : vector<1x8x128xbf16> to vector<8x128xbf16>
    %cst_20 = arith.constant dense<0.000000e+00> : vector<256x128xf32>
    %20 = tpu.matmul %17, %19, %cst_20 {dimension_numbers = #tpu.dot_dimension_numbers<[1], [0], [0], [1], [0, 0, 1, 1], [], []>} : vector<256x8xbf16>, vector<8x128xbf16>, vector<256x128xf32> -> vector<256x128xf32>
    %21 = arith.addf %14, %20 : vector<256x128xf32>
    %c0_21 = arith.constant 0 : index
    %c1_22 = arith.constant 1 : index
    %c0_23 = arith.constant 0 : index
    %c0_24 = arith.constant 0 : index
    %22 = vector.load %arg1[%c0_21, %c1_22, %c0_23, %c0_24] : memref<1x18x18x8xbf16, #tpu.memory_space<vmem>>, vector<1x16x16x8xbf16>
    %23 = vector.shape_cast %22 : vector<1x16x16x8xbf16> to vector<16x16x8xbf16>
    %24 = vector.shape_cast %23 : vector<16x16x8xbf16> to vector<256x8xbf16>
    %c3 = arith.constant 3 : index
    %c0_25 = arith.constant 0 : index
    %c0_26 = arith.constant 0 : index
    %25 = vector.load %arg2[%c3, %c0_25, %c0_26] : memref<9x8x128xbf16, #tpu.memory_space<vmem>>, vector<1x8x128xbf16>
    %26 = vector.shape_cast %25 : vector<1x8x128xbf16> to vector<8x128xbf16>
    %cst_27 = arith.constant dense<0.000000e+00> : vector<256x128xf32>
    %27 = tpu.matmul %24, %26, %cst_27 {dimension_numbers = #tpu.dot_dimension_numbers<[1], [0], [0], [1], [0, 0, 1, 1], [], []>} : vector<256x8xbf16>, vector<8x128xbf16>, vector<256x128xf32> -> vector<256x128xf32>
    %28 = arith.addf %21, %27 : vector<256x128xf32>
    %c0_28 = arith.constant 0 : index
    %c1_29 = arith.constant 1 : index
    %c1_30 = arith.constant 1 : index
    %c0_31 = arith.constant 0 : index
    %29 = vector.load %arg1[%c0_28, %c1_29, %c1_30, %c0_31] : memref<1x18x18x8xbf16, #tpu.memory_space<vmem>>, vector<1x16x16x8xbf16>
    %30 = vector.shape_cast %29 : vector<1x16x16x8xbf16> to vector<16x16x8xbf16>
    %31 = vector.shape_cast %30 : vector<16x16x8xbf16> to vector<256x8xbf16>
    %c4 = arith.constant 4 : index
    %c0_32 = arith.constant 0 : index
    %c0_33 = arith.constant 0 : index
    %32 = vector.load %arg2[%c4, %c0_32, %c0_33] : memref<9x8x128xbf16, #tpu.memory_space<vmem>>, vector<1x8x128xbf16>
    %33 = vector.shape_cast %32 : vector<1x8x128xbf16> to vector<8x128xbf16>
    %cst_34 = arith.constant dense<0.000000e+00> : vector<256x128xf32>
    %34 = tpu.matmul %31, %33, %cst_34 {dimension_numbers = #tpu.dot_dimension_numbers<[1], [0], [0], [1], [0, 0, 1, 1], [], []>} : vector<256x8xbf16>, vector<8x128xbf16>, vector<256x128xf32> -> vector<256x128xf32>
    %35 = arith.addf %28, %34 : vector<256x128xf32>
    %c0_35 = arith.constant 0 : index
    %c1_36 = arith.constant 1 : index
    %c2_37 = arith.constant 2 : index
    %c0_38 = arith.constant 0 : index
    %36 = vector.load %arg1[%c0_35, %c1_36, %c2_37, %c0_38] : memref<1x18x18x8xbf16, #tpu.memory_space<vmem>>, vector<1x16x16x8xbf16>
    %37 = vector.shape_cast %36 : vector<1x16x16x8xbf16> to vector<16x16x8xbf16>
    %38 = vector.shape_cast %37 : vector<16x16x8xbf16> to vector<256x8xbf16>
    %c5 = arith.constant 5 : index
    %c0_39 = arith.constant 0 : index
    %c0_40 = arith.constant 0 : index
    %39 = vector.load %arg2[%c5, %c0_39, %c0_40] : memref<9x8x128xbf16, #tpu.memory_space<vmem>>, vector<1x8x128xbf16>
    %40 = vector.shape_cast %39 : vector<1x8x128xbf16> to vector<8x128xbf16>
    %cst_41 = arith.constant dense<0.000000e+00> : vector<256x128xf32>
    %41 = tpu.matmul %38, %40, %cst_41 {dimension_numbers = #tpu.dot_dimension_numbers<[1], [0], [0], [1], [0, 0, 1, 1], [], []>} : vector<256x8xbf16>, vector<8x128xbf16>, vector<256x128xf32> -> vector<256x128xf32>
    %42 = arith.addf %35, %41 : vector<256x128xf32>
    %c0_42 = arith.constant 0 : index
    %c2_43 = arith.constant 2 : index
    %c0_44 = arith.constant 0 : index
    %c0_45 = arith.constant 0 : index
    %43 = vector.load %arg1[%c0_42, %c2_43, %c0_44, %c0_45] : memref<1x18x18x8xbf16, #tpu.memory_space<vmem>>, vector<1x16x16x8xbf16>
    %44 = vector.shape_cast %43 : vector<1x16x16x8xbf16> to vector<16x16x8xbf16>
    %45 = vector.shape_cast %44 : vector<16x16x8xbf16> to vector<256x8xbf16>
    %c6 = arith.constant 6 : index
    %c0_46 = arith.constant 0 : index
    %c0_47 = arith.constant 0 : index
    %46 = vector.load %arg2[%c6, %c0_46, %c0_47] : memref<9x8x128xbf16, #tpu.memory_space<vmem>>, vector<1x8x128xbf16>
    %47 = vector.shape_cast %46 : vector<1x8x128xbf16> to vector<8x128xbf16>
    %cst_48 = arith.constant dense<0.000000e+00> : vector<256x128xf32>
    %48 = tpu.matmul %45, %47, %cst_48 {dimension_numbers = #tpu.dot_dimension_numbers<[1], [0], [0], [1], [0, 0, 1, 1], [], []>} : vector<256x8xbf16>, vector<8x128xbf16>, vector<256x128xf32> -> vector<256x128xf32>
    %49 = arith.addf %42, %48 : vector<256x128xf32>
    %c0_49 = arith.constant 0 : index
    %c2_50 = arith.constant 2 : index
    %c1_51 = arith.constant 1 : index
    %c0_52 = arith.constant 0 : index
    %50 = vector.load %arg1[%c0_49, %c2_50, %c1_51, %c0_52] : memref<1x18x18x8xbf16, #tpu.memory_space<vmem>>, vector<1x16x16x8xbf16>
    %51 = vector.shape_cast %50 : vector<1x16x16x8xbf16> to vector<16x16x8xbf16>
    %52 = vector.shape_cast %51 : vector<16x16x8xbf16> to vector<256x8xbf16>
    %c7 = arith.constant 7 : index
    %c0_53 = arith.constant 0 : index
    %c0_54 = arith.constant 0 : index
    %53 = vector.load %arg2[%c7, %c0_53, %c0_54] : memref<9x8x128xbf16, #tpu.memory_space<vmem>>, vector<1x8x128xbf16>
    %54 = vector.shape_cast %53 : vector<1x8x128xbf16> to vector<8x128xbf16>
    %cst_55 = arith.constant dense<0.000000e+00> : vector<256x128xf32>
    %55 = tpu.matmul %52, %54, %cst_55 {dimension_numbers = #tpu.dot_dimension_numbers<[1], [0], [0], [1], [0, 0, 1, 1], [], []>} : vector<256x8xbf16>, vector<8x128xbf16>, vector<256x128xf32> -> vector<256x128xf32>
    %56 = arith.addf %49, %55 : vector<256x128xf32>
    %c0_56 = arith.constant 0 : index
    %c2_57 = arith.constant 2 : index
    %c2_58 = arith.constant 2 : index
    %c0_59 = arith.constant 0 : index
    %57 = vector.load %arg1[%c0_56, %c2_57, %c2_58, %c0_59] : memref<1x18x18x8xbf16, #tpu.memory_space<vmem>>, vector<1x16x16x8xbf16>
    %58 = vector.shape_cast %57 : vector<1x16x16x8xbf16> to vector<16x16x8xbf16>
    %59 = vector.shape_cast %58 : vector<16x16x8xbf16> to vector<256x8xbf16>
    %c8 = arith.constant 8 : index
    %c0_60 = arith.constant 0 : index
    %c0_61 = arith.constant 0 : index
    %60 = vector.load %arg2[%c8, %c0_60, %c0_61] : memref<9x8x128xbf16, #tpu.memory_space<vmem>>, vector<1x8x128xbf16>
    %61 = vector.shape_cast %60 : vector<1x8x128xbf16> to vector<8x128xbf16>
    %cst_62 = arith.constant dense<0.000000e+00> : vector<256x128xf32>
    %62 = tpu.matmul %59, %61, %cst_62 {dimension_numbers = #tpu.dot_dimension_numbers<[1], [0], [0], [1], [0, 0, 1, 1], [], []>} : vector<256x8xbf16>, vector<8x128xbf16>, vector<256x128xf32> -> vector<256x128xf32>
    %63 = arith.addf %56, %62 : vector<256x128xf32>
    %64 = vector.shape_cast %63 : vector<256x128xf32> to vector<16x16x128xf32>
    %65 = vector.shape_cast %64 : vector<16x16x128xf32> to vector<256x128xf32>
    %cst_63 = arith.constant dense<0.000000e+00> : vector<128xf32>
    %66 = vector.multi_reduction <add>, %65, %cst_63 [0] : vector<256x128xf32> to vector<128xf32>
    %67 = vector.shape_cast %66 : vector<128xf32> to vector<1x128xf32>
    %68 = arith.mulf %65, %65 : vector<256x128xf32>
    %cst_64 = arith.constant dense<0.000000e+00> : vector<128xf32>
    %69 = vector.multi_reduction <add>, %68, %cst_64 [0] : vector<256x128xf32> to vector<128xf32>
    %70 = vector.shape_cast %69 : vector<128xf32> to vector<1x128xf32>
    %71 = tpu.concatenate %67, %70 in 0 : vector<1x128xf32>, vector<1x128xf32> -> vector<2x128xf32>
    %c0_65 = arith.constant 0 : index
    %c0_66 = arith.constant 0 : index
    %c0_67 = arith.constant 0 : index
    %72 = vector.load %arg4[%c0_65, %c0_66, %c0_67] : memref<1x2x128xf32, #tpu.memory_space<vmem>>, vector<1x2x128xf32>
    %73 = vector.shape_cast %72 : vector<1x2x128xf32> to vector<2x128xf32>
    %74 = vector.shape_cast %71 : vector<2x128xf32> to vector<1x2x128xf32>
    tpu.vector_store %arg4[%c0_65, %c0_66, %c0_67], %74 {strides = array<i32>} : memref<1x2x128xf32, #tpu.memory_space<vmem>>, vector<1x2x128xf32>,
    %75 = arith.truncf %64 : vector<16x16x128xf32> to vector<16x16x128xbf16>
    %c0_68 = arith.constant 0 : index
    %c0_69 = arith.constant 0 : index
    %c0_70 = arith.constant 0 : index
    %c0_71 = arith.constant 0 : index
    %76 = vector.load %arg3[%c0_68, %c0_69, %c0_70, %c0_71] : memref<1x16x16x128xbf16, #tpu.memory_space<vmem>>, vector<1x16x16x128xbf16>
    %77 = vector.shape_cast %76 : vector<1x16x16x128xbf16> to vector<16x16x128xbf16>
    %78 = vector.shape_cast %75 : vector<16x16x128xbf16> to vector<1x16x16x128xbf16>
    tpu.vector_store %arg3[%c0_68, %c0_69, %c0_70, %c0_71], %78 {strides = array<i32>} : memref<1x16x16x128xbf16, #tpu.memory_space<vmem>>, vector<1x16x16x128xbf16>,
    return
  }
  func.func @transform_0(%arg0: i32) -> (i32, i32, i32, i32) {
    %c0_i32 = arith.constant 0 : i32
    %c0_i32_0 = arith.constant 0 : i32
    %c0_i32_1 = arith.constant 0 : i32
    %c0_i32_2 = arith.constant 0 : i32
    return %arg0, %c0_i32, %c0_i32_0, %c0_i32_1 : i32, i32, i32, i32
  }
  func.func @transform_1(%arg0: i32) -> (i32, i32, i32) {
    %c0_i32 = arith.constant 0 : i32
    %c0_i32_0 = arith.constant 0 : i32
    %c0_i32_1 = arith.constant 0 : i32
    %c0_i32_2 = arith.constant 0 : i32
    return %c0_i32, %c0_i32_0, %c0_i32_1 : i32, i32, i32
  }
  func.func @transform_2(%arg0: i32) -> (i32, i32, i32, i32) {
    %c0_i32 = arith.constant 0 : i32
    %c0_i32_0 = arith.constant 0 : i32
    %c0_i32_1 = arith.constant 0 : i32
    %c0_i32_2 = arith.constant 0 : i32
    return %arg0, %c0_i32, %c0_i32_0, %c0_i32_1 : i32, i32, i32, i32
  }
  func.func @transform_3(%arg0: i32) -> (i32, i32, i32) {
    %c0_i32 = arith.constant 0 : i32
    %c0_i32_0 = arith.constant 0 : i32
    %c0_i32_1 = arith.constant 0 : i32
    return %arg0, %c0_i32, %c0_i32_0 : i32, i32, i32
  }
}

module attributes {stable_mosaic.version = 11 : i64} {
  func.func @_bn_relu_conv2_stats_kernel(%arg0: i32, %arg1: memref<1x16x16x128xbf16, #tpu.memory_space<vmem>>, %arg2: memref<1x128xf32, #tpu.memory_space<vmem>>, %arg3: memref<1x128xf32, #tpu.memory_space<vmem>>, %arg4: memref<9x128x128xbf16, #tpu.memory_space<vmem>>, %arg5: memref<1x16x16x128xbf16, #tpu.memory_space<vmem>>, %arg6: memref<1x2x128xf32, #tpu.memory_space<vmem>>, %arg7: memref<18x48x128xbf16, #tpu.memory_space<vmem>>) attributes {dimension_semantics = [#tpu.dimension_semantics<parallel>], iteration_bounds = array<i64: 2>, scalar_prefetch = 0 : i64, scratch_operands = 1 : i64, tpu.core_type = #tpu.core_type<tc>, window_params = [{transform_indices = @transform_0, window_bounds = array<i64: 1, 16, 16, 128>}, {pipeline_mode = #tpu.pipeline_mode<synchronous>, transform_indices = @transform_1, window_bounds = array<i64: 1, 128>}, {pipeline_mode = #tpu.pipeline_mode<synchronous>, transform_indices = @transform_2, window_bounds = array<i64: 1, 128>}, {pipeline_mode = #tpu.pipeline_mode<synchronous>, transform_indices = @transform_3, window_bounds = array<i64: 9, 128, 128>}, {transform_indices = @transform_4, window_bounds = array<i64: 1, 16, 16, 128>}, {transform_indices = @transform_5, window_bounds = array<i64: 1, 2, 128>}]} {
    %c0 = arith.constant 0 : index
    %c0_0 = arith.constant 0 : index
    %c0_1 = arith.constant 0 : index
    %c0_2 = arith.constant 0 : index
    %0 = vector.load %arg1[%c0, %c0_0, %c0_1, %c0_2] : memref<1x16x16x128xbf16, #tpu.memory_space<vmem>>, vector<1x16x16x128xbf16>
    %1 = vector.shape_cast %0 : vector<1x16x16x128xbf16> to vector<16x16x128xbf16>
    %2 = arith.extf %1 : vector<16x16x128xbf16> to vector<16x16x128xf32>
    %c0_3 = arith.constant 0 : index
    %c0_4 = arith.constant 0 : index
    %3 = vector.load %arg2[%c0_3, %c0_4] : memref<1x128xf32, #tpu.memory_space<vmem>>, vector<1x128xf32>
    %4 = vector.shape_cast %3 : vector<1x128xf32> to vector<1x1x128xf32>
    %5 = vector.broadcast %4 : vector<1x1x128xf32> to vector<16x16x128xf32>
    %6 = arith.mulf %2, %5 : vector<16x16x128xf32>
    %c0_5 = arith.constant 0 : index
    %c0_6 = arith.constant 0 : index
    %7 = vector.load %arg3[%c0_5, %c0_6] : memref<1x128xf32, #tpu.memory_space<vmem>>, vector<1x128xf32>
    %8 = vector.shape_cast %7 : vector<1x128xf32> to vector<1x1x128xf32>
    %9 = vector.broadcast %8 : vector<1x1x128xf32> to vector<16x16x128xf32>
    %10 = arith.addf %6, %9 : vector<16x16x128xf32>
    %cst = arith.constant 0.000000e+00 : f32
    %11 = vector.broadcast %cst : f32 to vector<16x16x128xf32>
    %12 = arith.maximumf %10, %11 : vector<16x16x128xf32>
    %cst_7 = arith.constant 0.000000e+00 : bf16
    %13 = vector.broadcast %cst_7 : bf16 to vector<18x48x128xbf16>
    %c0_8 = arith.constant 0 : index
    %c0_9 = arith.constant 0 : index
    %c0_10 = arith.constant 0 : index
    %14 = vector.load %arg7[%c0_8, %c0_9, %c0_10] : memref<18x48x128xbf16, #tpu.memory_space<vmem>>, vector<18x48x128xbf16>
    tpu.vector_store %arg7[%c0_8, %c0_9, %c0_10], %13 {strides = array<i32>} : memref<18x48x128xbf16, #tpu.memory_space<vmem>>, vector<18x48x128xbf16>,
    %15 = arith.truncf %12 : vector<16x16x128xf32> to vector<16x16x128xbf16>
    %c1 = arith.constant 1 : index
    %c16 = arith.constant 16 : index
    %c0_11 = arith.constant 0 : index
    %16 = vector.load %arg7[%c1, %c16, %c0_11] : memref<18x48x128xbf16, #tpu.memory_space<vmem>>, vector<16x16x128xbf16>
    tpu.vector_store %arg7[%c1, %c16, %c0_11], %15 {strides = array<i32>} : memref<18x48x128xbf16, #tpu.memory_space<vmem>>, vector<16x16x128xbf16>,
    %cst_12 = arith.constant 0.000000e+00 : f32
    %17 = vector.broadcast %cst_12 : f32 to vector<256x128xf32>
    %c0_13 = arith.constant 0 : index
    %c15 = arith.constant 15 : index
    %c0_14 = arith.constant 0 : index
    %18 = vector.load %arg7[%c0_13, %c15, %c0_14] : memref<18x48x128xbf16, #tpu.memory_space<vmem>>, vector<16x16x128xbf16>
    %19 = vector.shape_cast %18 : vector<16x16x128xbf16> to vector<256x128xbf16>
    %c0_15 = arith.constant 0 : index
    %c0_16 = arith.constant 0 : index
    %c0_17 = arith.constant 0 : index
    %20 = vector.load %arg4[%c0_15, %c0_16, %c0_17] : memref<9x128x128xbf16, #tpu.memory_space<vmem>>, vector<1x128x128xbf16>
    %21 = vector.shape_cast %20 : vector<1x128x128xbf16> to vector<128x128xbf16>
    %cst_18 = arith.constant dense<0.000000e+00> : vector<256x128xf32>
    %22 = tpu.matmul %19, %21, %cst_18 {dimension_numbers = #tpu.dot_dimension_numbers<[1], [0], [0], [1], [0, 0, 1, 1], [], []>} : vector<256x128xbf16>, vector<128x128xbf16>, vector<256x128xf32> -> vector<256x128xf32>
    %23 = arith.addf %17, %22 : vector<256x128xf32>
    %c0_19 = arith.constant 0 : index
    %c16_20 = arith.constant 16 : index
    %c0_21 = arith.constant 0 : index
    %24 = vector.load %arg7[%c0_19, %c16_20, %c0_21] : memref<18x48x128xbf16, #tpu.memory_space<vmem>>, vector<16x16x128xbf16>
    %25 = vector.shape_cast %24 : vector<16x16x128xbf16> to vector<256x128xbf16>
    %c1_22 = arith.constant 1 : index
    %c0_23 = arith.constant 0 : index
    %c0_24 = arith.constant 0 : index
    %26 = vector.load %arg4[%c1_22, %c0_23, %c0_24] : memref<9x128x128xbf16, #tpu.memory_space<vmem>>, vector<1x128x128xbf16>
    %27 = vector.shape_cast %26 : vector<1x128x128xbf16> to vector<128x128xbf16>
    %cst_25 = arith.constant dense<0.000000e+00> : vector<256x128xf32>
    %28 = tpu.matmul %25, %27, %cst_25 {dimension_numbers = #tpu.dot_dimension_numbers<[1], [0], [0], [1], [0, 0, 1, 1], [], []>} : vector<256x128xbf16>, vector<128x128xbf16>, vector<256x128xf32> -> vector<256x128xf32>
    %29 = arith.addf %23, %28 : vector<256x128xf32>
    %c0_26 = arith.constant 0 : index
    %c17 = arith.constant 17 : index
    %c0_27 = arith.constant 0 : index
    %30 = vector.load %arg7[%c0_26, %c17, %c0_27] : memref<18x48x128xbf16, #tpu.memory_space<vmem>>, vector<16x16x128xbf16>
    %31 = vector.shape_cast %30 : vector<16x16x128xbf16> to vector<256x128xbf16>
    %c2 = arith.constant 2 : index
    %c0_28 = arith.constant 0 : index
    %c0_29 = arith.constant 0 : index
    %32 = vector.load %arg4[%c2, %c0_28, %c0_29] : memref<9x128x128xbf16, #tpu.memory_space<vmem>>, vector<1x128x128xbf16>
    %33 = vector.shape_cast %32 : vector<1x128x128xbf16> to vector<128x128xbf16>
    %cst_30 = arith.constant dense<0.000000e+00> : vector<256x128xf32>
    %34 = tpu.matmul %31, %33, %cst_30 {dimension_numbers = #tpu.dot_dimension_numbers<[1], [0], [0], [1], [0, 0, 1, 1], [], []>} : vector<256x128xbf16>, vector<128x128xbf16>, vector<256x128xf32> -> vector<256x128xf32>
    %35 = arith.addf %29, %34 : vector<256x128xf32>
    %c1_31 = arith.constant 1 : index
    %c15_32 = arith.constant 15 : index
    %c0_33 = arith.constant 0 : index
    %36 = vector.load %arg7[%c1_31, %c15_32, %c0_33] : memref<18x48x128xbf16, #tpu.memory_space<vmem>>, vector<16x16x128xbf16>
    %37 = vector.shape_cast %36 : vector<16x16x128xbf16> to vector<256x128xbf16>
    %c3 = arith.constant 3 : index
    %c0_34 = arith.constant 0 : index
    %c0_35 = arith.constant 0 : index
    %38 = vector.load %arg4[%c3, %c0_34, %c0_35] : memref<9x128x128xbf16, #tpu.memory_space<vmem>>, vector<1x128x128xbf16>
    %39 = vector.shape_cast %38 : vector<1x128x128xbf16> to vector<128x128xbf16>
    %cst_36 = arith.constant dense<0.000000e+00> : vector<256x128xf32>
    %40 = tpu.matmul %37, %39, %cst_36 {dimension_numbers = #tpu.dot_dimension_numbers<[1], [0], [0], [1], [0, 0, 1, 1], [], []>} : vector<256x128xbf16>, vector<128x128xbf16>, vector<256x128xf32> -> vector<256x128xf32>
    %41 = arith.addf %35, %40 : vector<256x128xf32>
    %c1_37 = arith.constant 1 : index
    %c16_38 = arith.constant 16 : index
    %c0_39 = arith.constant 0 : index
    %42 = vector.load %arg7[%c1_37, %c16_38, %c0_39] : memref<18x48x128xbf16, #tpu.memory_space<vmem>>, vector<16x16x128xbf16>
    %43 = vector.shape_cast %42 : vector<16x16x128xbf16> to vector<256x128xbf16>
    %c4 = arith.constant 4 : index
    %c0_40 = arith.constant 0 : index
    %c0_41 = arith.constant 0 : index
    %44 = vector.load %arg4[%c4, %c0_40, %c0_41] : memref<9x128x128xbf16, #tpu.memory_space<vmem>>, vector<1x128x128xbf16>
    %45 = vector.shape_cast %44 : vector<1x128x128xbf16> to vector<128x128xbf16>
    %cst_42 = arith.constant dense<0.000000e+00> : vector<256x128xf32>
    %46 = tpu.matmul %43, %45, %cst_42 {dimension_numbers = #tpu.dot_dimension_numbers<[1], [0], [0], [1], [0, 0, 1, 1], [], []>} : vector<256x128xbf16>, vector<128x128xbf16>, vector<256x128xf32> -> vector<256x128xf32>
    %47 = arith.addf %41, %46 : vector<256x128xf32>
    %c1_43 = arith.constant 1 : index
    %c17_44 = arith.constant 17 : index
    %c0_45 = arith.constant 0 : index
    %48 = vector.load %arg7[%c1_43, %c17_44, %c0_45] : memref<18x48x128xbf16, #tpu.memory_space<vmem>>, vector<16x16x128xbf16>
    %49 = vector.shape_cast %48 : vector<16x16x128xbf16> to vector<256x128xbf16>
    %c5 = arith.constant 5 : index
    %c0_46 = arith.constant 0 : index
    %c0_47 = arith.constant 0 : index
    %50 = vector.load %arg4[%c5, %c0_46, %c0_47] : memref<9x128x128xbf16, #tpu.memory_space<vmem>>, vector<1x128x128xbf16>
    %51 = vector.shape_cast %50 : vector<1x128x128xbf16> to vector<128x128xbf16>
    %cst_48 = arith.constant dense<0.000000e+00> : vector<256x128xf32>
    %52 = tpu.matmul %49, %51, %cst_48 {dimension_numbers = #tpu.dot_dimension_numbers<[1], [0], [0], [1], [0, 0, 1, 1], [], []>} : vector<256x128xbf16>, vector<128x128xbf16>, vector<256x128xf32> -> vector<256x128xf32>
    %53 = arith.addf %47, %52 : vector<256x128xf32>
    %c2_49 = arith.constant 2 : index
    %c15_50 = arith.constant 15 : index
    %c0_51 = arith.constant 0 : index
    %54 = vector.load %arg7[%c2_49, %c15_50, %c0_51] : memref<18x48x128xbf16, #tpu.memory_space<vmem>>, vector<16x16x128xbf16>
    %55 = vector.shape_cast %54 : vector<16x16x128xbf16> to vector<256x128xbf16>
    %c6 = arith.constant 6 : index
    %c0_52 = arith.constant 0 : index
    %c0_53 = arith.constant 0 : index
    %56 = vector.load %arg4[%c6, %c0_52, %c0_53] : memref<9x128x128xbf16, #tpu.memory_space<vmem>>, vector<1x128x128xbf16>
    %57 = vector.shape_cast %56 : vector<1x128x128xbf16> to vector<128x128xbf16>
    %cst_54 = arith.constant dense<0.000000e+00> : vector<256x128xf32>
    %58 = tpu.matmul %55, %57, %cst_54 {dimension_numbers = #tpu.dot_dimension_numbers<[1], [0], [0], [1], [0, 0, 1, 1], [], []>} : vector<256x128xbf16>, vector<128x128xbf16>, vector<256x128xf32> -> vector<256x128xf32>
    %59 = arith.addf %53, %58 : vector<256x128xf32>
    %c2_55 = arith.constant 2 : index
    %c16_56 = arith.constant 16 : index
    %c0_57 = arith.constant 0 : index
    %60 = vector.load %arg7[%c2_55, %c16_56, %c0_57] : memref<18x48x128xbf16, #tpu.memory_space<vmem>>, vector<16x16x128xbf16>
    %61 = vector.shape_cast %60 : vector<16x16x128xbf16> to vector<256x128xbf16>
    %c7 = arith.constant 7 : index
    %c0_58 = arith.constant 0 : index
    %c0_59 = arith.constant 0 : index
    %62 = vector.load %arg4[%c7, %c0_58, %c0_59] : memref<9x128x128xbf16, #tpu.memory_space<vmem>>, vector<1x128x128xbf16>
    %63 = vector.shape_cast %62 : vector<1x128x128xbf16> to vector<128x128xbf16>
    %cst_60 = arith.constant dense<0.000000e+00> : vector<256x128xf32>
    %64 = tpu.matmul %61, %63, %cst_60 {dimension_numbers = #tpu.dot_dimension_numbers<[1], [0], [0], [1], [0, 0, 1, 1], [], []>} : vector<256x128xbf16>, vector<128x128xbf16>, vector<256x128xf32> -> vector<256x128xf32>
    %65 = arith.addf %59, %64 : vector<256x128xf32>
    %c2_61 = arith.constant 2 : index
    %c17_62 = arith.constant 17 : index
    %c0_63 = arith.constant 0 : index
    %66 = vector.load %arg7[%c2_61, %c17_62, %c0_63] : memref<18x48x128xbf16, #tpu.memory_space<vmem>>, vector<16x16x128xbf16>
    %67 = vector.shape_cast %66 : vector<16x16x128xbf16> to vector<256x128xbf16>
    %c8 = arith.constant 8 : index
    %c0_64 = arith.constant 0 : index
    %c0_65 = arith.constant 0 : index
    %68 = vector.load %arg4[%c8, %c0_64, %c0_65] : memref<9x128x128xbf16, #tpu.memory_space<vmem>>, vector<1x128x128xbf16>
    %69 = vector.shape_cast %68 : vector<1x128x128xbf16> to vector<128x128xbf16>
    %cst_66 = arith.constant dense<0.000000e+00> : vector<256x128xf32>
    %70 = tpu.matmul %67, %69, %cst_66 {dimension_numbers = #tpu.dot_dimension_numbers<[1], [0], [0], [1], [0, 0, 1, 1], [], []>} : vector<256x128xbf16>, vector<128x128xbf16>, vector<256x128xf32> -> vector<256x128xf32>
    %71 = arith.addf %65, %70 : vector<256x128xf32>
    %72 = vector.shape_cast %71 : vector<256x128xf32> to vector<16x16x128xf32>
    %73 = vector.shape_cast %72 : vector<16x16x128xf32> to vector<256x128xf32>
    %cst_67 = arith.constant dense<0.000000e+00> : vector<128xf32>
    %74 = vector.multi_reduction <add>, %73, %cst_67 [0] : vector<256x128xf32> to vector<128xf32>
    %75 = vector.shape_cast %74 : vector<128xf32> to vector<1x128xf32>
    %76 = arith.mulf %73, %73 : vector<256x128xf32>
    %cst_68 = arith.constant dense<0.000000e+00> : vector<128xf32>
    %77 = vector.multi_reduction <add>, %76, %cst_68 [0] : vector<256x128xf32> to vector<128xf32>
    %78 = vector.shape_cast %77 : vector<128xf32> to vector<1x128xf32>
    %79 = tpu.concatenate %75, %78 in 0 : vector<1x128xf32>, vector<1x128xf32> -> vector<2x128xf32>
    %c0_69 = arith.constant 0 : index
    %c0_70 = arith.constant 0 : index
    %c0_71 = arith.constant 0 : index
    %80 = vector.load %arg6[%c0_69, %c0_70, %c0_71] : memref<1x2x128xf32, #tpu.memory_space<vmem>>, vector<1x2x128xf32>
    %81 = vector.shape_cast %80 : vector<1x2x128xf32> to vector<2x128xf32>
    %82 = vector.shape_cast %79 : vector<2x128xf32> to vector<1x2x128xf32>
    tpu.vector_store %arg6[%c0_69, %c0_70, %c0_71], %82 {strides = array<i32>} : memref<1x2x128xf32, #tpu.memory_space<vmem>>, vector<1x2x128xf32>,
    %83 = arith.truncf %72 : vector<16x16x128xf32> to vector<16x16x128xbf16>
    %c0_72 = arith.constant 0 : index
    %c0_73 = arith.constant 0 : index
    %c0_74 = arith.constant 0 : index
    %c0_75 = arith.constant 0 : index
    %84 = vector.load %arg5[%c0_72, %c0_73, %c0_74, %c0_75] : memref<1x16x16x128xbf16, #tpu.memory_space<vmem>>, vector<1x16x16x128xbf16>
    %85 = vector.shape_cast %84 : vector<1x16x16x128xbf16> to vector<16x16x128xbf16>
    %86 = vector.shape_cast %83 : vector<16x16x128xbf16> to vector<1x16x16x128xbf16>
    tpu.vector_store %arg5[%c0_72, %c0_73, %c0_74, %c0_75], %86 {strides = array<i32>} : memref<1x16x16x128xbf16, #tpu.memory_space<vmem>>, vector<1x16x16x128xbf16>,
    return
  }
  func.func @transform_0(%arg0: i32) -> (i32, i32, i32, i32) {
    %c0_i32 = arith.constant 0 : i32
    %c0_i32_0 = arith.constant 0 : i32
    %c0_i32_1 = arith.constant 0 : i32
    %c0_i32_2 = arith.constant 0 : i32
    return %arg0, %c0_i32, %c0_i32_0, %c0_i32_1 : i32, i32, i32, i32
  }
  func.func @transform_1(%arg0: i32) -> (i32, i32) {
    %c0_i32 = arith.constant 0 : i32
    %c0_i32_0 = arith.constant 0 : i32
    %c0_i32_1 = arith.constant 0 : i32
    return %c0_i32, %c0_i32_0 : i32, i32
  }
  func.func @transform_2(%arg0: i32) -> (i32, i32) {
    %c0_i32 = arith.constant 0 : i32
    %c0_i32_0 = arith.constant 0 : i32
    %c0_i32_1 = arith.constant 0 : i32
    return %c0_i32, %c0_i32_0 : i32, i32
  }
  func.func @transform_3(%arg0: i32) -> (i32, i32, i32) {
    %c0_i32 = arith.constant 0 : i32
    %c0_i32_0 = arith.constant 0 : i32
    %c0_i32_1 = arith.constant 0 : i32
    %c0_i32_2 = arith.constant 0 : i32
    return %c0_i32, %c0_i32_0, %c0_i32_1 : i32, i32, i32
  }
  func.func @transform_4(%arg0: i32) -> (i32, i32, i32, i32) {
    %c0_i32 = arith.constant 0 : i32
    %c0_i32_0 = arith.constant 0 : i32
    %c0_i32_1 = arith.constant 0 : i32
    %c0_i32_2 = arith.constant 0 : i32
    return %arg0, %c0_i32, %c0_i32_0, %c0_i32_1 : i32, i32, i32, i32
  }
  func.func @transform_5(%arg0: i32) -> (i32, i32, i32) {
    %c0_i32 = arith.constant 0 : i32
    %c0_i32_0 = arith.constant 0 : i32
    %c0_i32_1 = arith.constant 0 : i32
    return %arg0, %c0_i32, %c0_i32_0 : i32, i32, i32
  }
}

module attributes {stable_mosaic.version = 11 : i64} {
  func.func @_bn2_act_kernel(%arg0: i32, %arg1: memref<1x16x16x128xbf16, #tpu.memory_space<vmem>>, %arg2: memref<1x128xf32, #tpu.memory_space<vmem>>, %arg3: memref<1x128xf32, #tpu.memory_space<vmem>>, %arg4: memref<1x16x16x128xf32, #tpu.memory_space<vmem>>) attributes {dimension_semantics = [#tpu.dimension_semantics<parallel>], iteration_bounds = array<i64: 2>, scalar_prefetch = 0 : i64, scratch_operands = 0 : i64, tpu.core_type = #tpu.core_type<tc>, window_params = [{transform_indices = @transform_0, window_bounds = array<i64: 1, 16, 16, 128>}, {pipeline_mode = #tpu.pipeline_mode<synchronous>, transform_indices = @transform_1, window_bounds = array<i64: 1, 128>}, {pipeline_mode = #tpu.pipeline_mode<synchronous>, transform_indices = @transform_2, window_bounds = array<i64: 1, 128>}, {transform_indices = @transform_3, window_bounds = array<i64: 1, 16, 16, 128>}]} {
    %c0 = arith.constant 0 : index
    %c0_0 = arith.constant 0 : index
    %c0_1 = arith.constant 0 : index
    %c0_2 = arith.constant 0 : index
    %0 = vector.load %arg1[%c0, %c0_0, %c0_1, %c0_2] : memref<1x16x16x128xbf16, #tpu.memory_space<vmem>>, vector<1x16x16x128xbf16>
    %1 = vector.shape_cast %0 : vector<1x16x16x128xbf16> to vector<16x16x128xbf16>
    %2 = arith.extf %1 : vector<16x16x128xbf16> to vector<16x16x128xf32>
    %c0_3 = arith.constant 0 : index
    %c0_4 = arith.constant 0 : index
    %3 = vector.load %arg2[%c0_3, %c0_4] : memref<1x128xf32, #tpu.memory_space<vmem>>, vector<1x128xf32>
    %4 = vector.shape_cast %3 : vector<1x128xf32> to vector<1x1x128xf32>
    %5 = vector.broadcast %4 : vector<1x1x128xf32> to vector<16x16x128xf32>
    %6 = arith.mulf %2, %5 : vector<16x16x128xf32>
    %c0_5 = arith.constant 0 : index
    %c0_6 = arith.constant 0 : index
    %7 = vector.load %arg3[%c0_5, %c0_6] : memref<1x128xf32, #tpu.memory_space<vmem>>, vector<1x128xf32>
    %8 = vector.shape_cast %7 : vector<1x128xf32> to vector<1x1x128xf32>
    %9 = vector.broadcast %8 : vector<1x1x128xf32> to vector<16x16x128xf32>
    %10 = arith.addf %6, %9 : vector<16x16x128xf32>
    %cst = arith.constant 0.000000e+00 : f32
    %11 = vector.broadcast %cst : f32 to vector<16x16x128xf32>
    %12 = arith.maximumf %10, %11 : vector<16x16x128xf32>
    %c0_7 = arith.constant 0 : index
    %c0_8 = arith.constant 0 : index
    %c0_9 = arith.constant 0 : index
    %c0_10 = arith.constant 0 : index
    %13 = vector.load %arg4[%c0_7, %c0_8, %c0_9, %c0_10] : memref<1x16x16x128xf32, #tpu.memory_space<vmem>>, vector<1x16x16x128xf32>
    %14 = vector.shape_cast %13 : vector<1x16x16x128xf32> to vector<16x16x128xf32>
    %15 = vector.shape_cast %12 : vector<16x16x128xf32> to vector<1x16x16x128xf32>
    tpu.vector_store %arg4[%c0_7, %c0_8, %c0_9, %c0_10], %15 {strides = array<i32>} : memref<1x16x16x128xf32, #tpu.memory_space<vmem>>, vector<1x16x16x128xf32>,
    return
  }
  func.func @transform_0(%arg0: i32) -> (i32, i32, i32, i32) {
    %c0_i32 = arith.constant 0 : i32
    %c0_i32_0 = arith.constant 0 : i32
    %c0_i32_1 = arith.constant 0 : i32
    %c0_i32_2 = arith.constant 0 : i32
    return %arg0, %c0_i32, %c0_i32_0, %c0_i32_1 : i32, i32, i32, i32
  }
  func.func @transform_1(%arg0: i32) -> (i32, i32) {
    %c0_i32 = arith.constant 0 : i32
    %c0_i32_0 = arith.constant 0 : i32
    %c0_i32_1 = arith.constant 0 : i32
    return %c0_i32, %c0_i32_0 : i32, i32
  }
  func.func @transform_2(%arg0: i32) -> (i32, i32) {
    %c0_i32 = arith.constant 0 : i32
    %c0_i32_0 = arith.constant 0 : i32
    %c0_i32_1 = arith.constant 0 : i32
    return %c0_i32, %c0_i32_0 : i32, i32
  }
  func.func @transform_3(%arg0: i32) -> (i32, i32, i32, i32) {
    %c0_i32 = arith.constant 0 : i32
    %c0_i32_0 = arith.constant 0 : i32
    %c0_i32_1 = arith.constant 0 : i32
    %c0_i32_2 = arith.constant 0 : i32
    return %arg0, %c0_i32, %c0_i32_0, %c0_i32_1 : i32, i32, i32, i32
  }
}

</mosaic_0001>

<bundles_post_ra>
// kernel: double_conv_block.5
= control target key start
LH: loop header
LB: loop body
LE: loop exit
PB: predicated region body
PF: predicated region fallthrough
CT: control target
= control target key end

     0   :  { %s562_s12 = smov 0   ;;  %s709_s0 = inlined_call_operand.vmem [shape: bf16[2,16,16,128], index: 0, kind: input, shape index: {}]   ;;  %s710_s1 = inlined_call_operand.vmem [shape: f32[1,128], index: 1, kind: input, shape index: {}]   ;;  %s711_s2 = inlined_call_operand.vmem [shape: f32[1,128], index: 2, kind: input, shape index: {}]   ;;  %s712_s3 = inlined_call_operand.vmem [shape: f32[2,16,16,128], index: 3, kind: output, shape index: {}]  }
   0x1 LB: > { %s432_s13 = sadd.s32 4294967295, %s540_s12   ;;  %p436_p0 = scmp.ge.s32.totalorder %s540_s12, 1  ;;  %s540_s12 = sphi %s562_s12, %s13_s12  }
   0x2   : > { %p137_p1 = scmp.lt.s32.totalorder %s540_s12, 3 }
   0x4   : > { %p138_p2 = pnand %p436_p0, %p137_p1 }
   0x5   : > { %p161_p3 = scmp.lt.s32.totalorder (!%p138_p2), %s432_s13, 1  ;;  %v581_v0 = vld [vmem:[%s710_s1] ss:$0 sm:$0xff] (!%p138_p2) }
   0x6   : > { %141 = sbr.rel (%p138_p2) target bundleno = 53 (0x35), region = 32  ;;  %v590_v9 = vld [vmem:[%s711_s2] ss:$0 sm:$0xff] (!%p138_p2) }
   0xd   : > { %s714_s13 = smov (!%p161_p3, %s432_s13), 1 }
   0xe   : > { %s445_s14 = sshll.u32 %s714_s13, 7  ;;  %s446_s22 = sshll.u32 %s714_s13, 8 }
   0xf   : > { %s576_s17 = scalar_lea.vmem %s709_s0, %s445_s14  ;;  %s608_s25 = scalar_lea.vmem %s712_s3, %s446_s22 }
  0x10   : > { %v448_v1 = vld [vmem:[%s576_s17] sm:$0xff]   ;;  %v511_v2 = vld [vmem:[%s576_s17 + $0x8] sm:$0xff]   ;;  %v512_v3 = vld [vmem:[%s576_s17 + $0x10] sm:$0xff]  }
  0x11   : > { %v449_v4 = vunpack.c.l.bf16 %v448_v1  ;;  %v450_v5 = vunpack.c.h.bf16 %v448_v1  ;;  %v453_v6 = vunpack.c.l.bf16 %v511_v2  ;;  %v454_v7 = vunpack.c.h.bf16 %v511_v2  ;;  %v513_v8 = vld [vmem:[%s576_s17 + $0x18] sm:$0xff]   ;;  %v514_v30 = vld [vmem:[%s576_s17 + $0x20] sm:$0xff]   ;;  %v515_v31 = vld [vmem:[%s576_s17 + $0x28] sm:$0xff]  }
  0x12   : > { %v457_v10 = vunpack.c.l.bf16 %v512_v3  ;;  %v458_v11 = vunpack.c.h.bf16 %v512_v3  ;;  %v461_v12 = vunpack.c.l.bf16 %v513_v8  ;;  %v462_v13 = vunpack.c.h.bf16 %v513_v8  ;;  %v516_v36 = vld [vmem:[%s576_s17 + $0x30] sm:$0xff]   ;;  %v517_v37 = vld [vmem:[%s576_s17 + $0x38] sm:$0xff]   ;;  %v518_v3 = vld [vmem:[%s576_s17 + $0x40] sm:$0xff]  }
  0x13   : > { %v242_v14 = vmul.f32 %v449_v4, %v581_v0  ;;  %v243_v15 = vmul.f32 %v450_v5, %v581_v0  ;;  %v244_v16 = vmul.f32 %v453_v6, %v581_v0  ;;  %v245_v17 = vmul.f32 %v454_v7, %v581_v0  ;;  %v519_v4 = vld [vmem:[%s576_s17 + $0x48] sm:$0xff]  }
  0x14   : > { %v246_v18 = vmul.f32 %v457_v10, %v581_v0  ;;  %v247_v19 = vmul.f32 %v458_v11, %v581_v0  ;;  %v248_v20 = vmul.f32 %v461_v12, %v581_v0  ;;  %v249_v21 = vmul.f32 %v462_v13, %v581_v0  ;;  %v520_v10 = vld [vmem:[%s576_s17 + $0x50] sm:$0xff]   ;;  %v521_v11 = vld [vmem:[%s576_s17 + $0x58] sm:$0xff]  }
  0x15   : > { %v281_v22 = vadd.f32 %v590_v9, %v242_v14  ;;  %v282_v23 = vadd.f32 %v590_v9, %v243_v15  ;;  %v283_v24 = vadd.f32 %v590_v9, %v244_v16  ;;  %v284_v25 = vadd.f32 %v590_v9, %v245_v17 }
  0x16   : > { %v285_v26 = vadd.f32 %v590_v9, %v246_v18  ;;  %v286_v27 = vadd.f32 %v590_v9, %v247_v19  ;;  %v287_v28 = vadd.f32 %v590_v9, %v248_v20  ;;  %v288_v29 = vadd.f32 %v590_v9, %v249_v21 }
  0x17   : > { %v313_v32 = vmax.f32 %v281_v22, 0.0  ;;  %v314_v33 = vmax.f32 %v282_v23, 0.0  ;;  %v315_v34 = vmax.f32 %v283_v24, 0.0  ;;  %v316_v35 = vmax.f32 %v284_v25, 0.0 }
  0x18   : > { %v317_v38 = vmax.f32 %v285_v26, 0.0  ;;  %v318_v39 = vmax.f32 %v286_v27, 0.0  ;;  %v319_v40 = vmax.f32 %v287_v28, 0.0  ;;  %v320_v41 = vmax.f32 %v288_v29, 0.0 }
  0x19   : > { %345 = vst [vmem:[%s608_s25] sm:$0xff] %v313_v32  ;;  %346 = vst [vmem:[%s608_s25 + $0x8] sm:$0xff] %v314_v33  ;;  %v465_v42 = vunpack.c.l.bf16 %v514_v30  ;;  %v466_v43 = vunpack.c.h.bf16 %v514_v30  ;;  %v469_v44 = vunpack.c.l.bf16 %v515_v31  ;;  %v470_v45 = vunpack.c.h.bf16 %v515_v31 }
  0x1a   : > { %347 = vst [vmem:[%s608_s25 + $0x10] sm:$0xff] %v315_v34  ;;  %348 = vst [vmem:[%s608_s25 + $0x18] sm:$0xff] %v316_v35  ;;  %v473_v46 = vunpack.c.l.bf16 %v516_v36  ;;  %v474_v47 = vunpack.c.h.bf16 %v516_v36  ;;  %v477_v48 = vunpack.c.l.bf16 %v517_v37  ;;  %v478_v49 = vunpack.c.h.bf16 %v517_v37 }
  0x1b   : > { %349 = vst [vmem:[%s608_s25 + $0x20] sm:$0xff] %v317_v38  ;;  %350 = vst [vmem:[%s608_s25 + $0x28] sm:$0xff] %v318_v39  ;;  %v250_v50 = vmul.f32 %v465_v42, %v581_v0  ;;  %v251_v51 = vmul.f32 %v466_v43, %v581_v0  ;;  %v252_v52 = vmul.f32 %v469_v44, %v581_v0  ;;  %v481_v16 = vunpack.c.l.bf16 %v518_v3 }
  0x1c   : > { %351 = vst [vmem:[%s608_s25 + $0x30] sm:$0xff] %v319_v40  ;;  %352 = vst [vmem:[%s608_s25 + $0x38] sm:$0xff] %v320_v41  ;;  %v253_v53 = vmul.f32 %v470_v45, %v581_v0  ;;  %v254_v54 = vmul.f32 %v473_v46, %v581_v0  ;;  %v255_v55 = vmul.f32 %v474_v47, %v581_v0  ;;  %v482_v17 = vunpack.c.h.bf16 %v518_v3  ;;  %v522_v40 = vld [vmem:[%s576_s17 + $0x60] sm:$0xff]   ;;  %v523_v41 = vld [vmem:[%s576_s17 + $0x68] sm:$0xff]  }
  0x1d   : > { %v256_v56 = vmul.f32 %v477_v48, %v581_v0  ;;  %v257_v57 = vmul.f32 %v478_v49, %v581_v0  ;;  %v289_v58 = vadd.f32 %v590_v9, %v250_v50  ;;  %v290_v59 = vadd.f32 %v590_v9, %v251_v51  ;;  %v524_v46 = vld [vmem:[%s576_s17 + $0x70] sm:$0xff]   ;;  %v525_v47 = vld [vmem:[%s576_s17 + $0x78] sm:$0xff]  }
  0x1e   : > { %v291_v60 = vadd.f32 %v590_v9, %v252_v52  ;;  %v292_v61 = vadd.f32 %v590_v9, %v253_v53  ;;  %v293_v62 = vadd.f32 %v590_v9, %v254_v54  ;;  %v294_v63 = vadd.f32 %v590_v9, %v255_v55 }
  0x1f   : > { %v295_v1 = vadd.f32 %v590_v9, %v256_v56  ;;  %v296_v2 = vadd.f32 %v590_v9, %v257_v57  ;;  %v321_v5 = vmax.f32 %v289_v58, 0.0  ;;  %v322_v6 = vmax.f32 %v290_v59, 0.0 }
  0x20   : > { %v323_v7 = vmax.f32 %v291_v60, 0.0  ;;  %v324_v8 = vmax.f32 %v292_v61, 0.0  ;;  %v325_v12 = vmax.f32 %v293_v62, 0.0  ;;  %v326_v13 = vmax.f32 %v294_v63, 0.0 }
  0x21   : > { %v327_v14 = vmax.f32 %v295_v1, 0.0  ;;  %v328_v15 = vmax.f32 %v296_v2, 0.0  ;;  %353 = vst [vmem:[%s608_s25 + $0x40] sm:$0xff] %v321_v5  ;;  %354 = vst [vmem:[%s608_s25 + $0x48] sm:$0xff] %v322_v6  ;;  %v485_v18 = vunpack.c.l.bf16 %v519_v4  ;;  %v486_v19 = vunpack.c.h.bf16 %v519_v4 }
  0x22   : > { %355 = vst [vmem:[%s608_s25 + $0x50] sm:$0xff] %v323_v7  ;;  %356 = vst [vmem:[%s608_s25 + $0x58] sm:$0xff] %v324_v8  ;;  %v489_v20 = vunpack.c.l.bf16 %v520_v10  ;;  %v490_v21 = vunpack.c.h.bf16 %v520_v10  ;;  %v493_v22 = vunpack.c.l.bf16 %v521_v11  ;;  %v494_v23 = vunpack.c.h.bf16 %v521_v11 }
  0x23   : > { %357 = vst [vmem:[%s608_s25 + $0x60] sm:$0xff] %v325_v12  ;;  %358 = vst [vmem:[%s608_s25 + $0x68] sm:$0xff] %v326_v13  ;;  %v258_v24 = vmul.f32 %v481_v16, %v581_v0  ;;  %v259_v25 = vmul.f32 %v482_v17, %v581_v0  ;;  %v260_v26 = vmul.f32 %v485_v18, %v581_v0  ;;  %v497_v52 = vunpack.c.l.bf16 %v522_v40 }
  0x24   : > { %359 = vst [vmem:[%s608_s25 + $0x70] sm:$0xff] %v327_v14  ;;  %360 = vst [vmem:[%s608_s25 + $0x78] sm:$0xff] %v328_v15  ;;  %v261_v27 = vmul.f32 %v486_v19, %v581_v0  ;;  %v262_v28 = vmul.f32 %v489_v20, %v581_v0  ;;  %v263_v29 = vmul.f32 %v490_v21, %v581_v0  ;;  %v498_v53 = vunpack.c.h.bf16 %v522_v40 }
  0x25   : > { %v264_v30 = vmul.f32 %v493_v22, %v581_v0  ;;  %v265_v31 = vmul.f32 %v494_v23, %v581_v0  ;;  %v297_v32 = vadd.f32 %v590_v9, %v258_v24  ;;  %v298_v33 = vadd.f32 %v590_v9, %v259_v25 }
  0x26   : > { %v299_v34 = vadd.f32 %v590_v9, %v260_v26  ;;  %v300_v35 = vadd.f32 %v590_v9, %v261_v27  ;;  %v301_v36 = vadd.f32 %v590_v9, %v262_v28  ;;  %v302_v37 = vadd.f32 %v590_v9, %v263_v29 }
  0x27   : > { %v303_v38 = vadd.f32 %v590_v9, %v264_v30  ;;  %v304_v39 = vadd.f32 %v590_v9, %v265_v31  ;;  %v329_v42 = vmax.f32 %v297_v32, 0.0  ;;  %v330_v43 = vmax.f32 %v298_v33, 0.0 }
  0x28   : > { %v331_v44 = vmax.f32 %v299_v34, 0.0  ;;  %v332_v45 = vmax.f32 %v300_v35, 0.0  ;;  %v333_v48 = vmax.f32 %v301_v36, 0.0  ;;  %v334_v49 = vmax.f32 %v302_v37, 0.0 }
  0x29   : > { %v335_v50 = vmax.f32 %v303_v38, 0.0  ;;  %v336_v51 = vmax.f32 %v304_v39, 0.0  ;;  %361 = vst [vmem:[%s608_s25 + $0x80] sm:$0xff] %v329_v42  ;;  %362 = vst [vmem:[%s608_s25 + $0x88] sm:$0xff] %v330_v43  ;;  %v501_v54 = vunpack.c.l.bf16 %v523_v41  ;;  %v502_v55 = vunpack.c.h.bf16 %v523_v41 }
  0x2a   : > { %363 = vst [vmem:[%s608_s25 + $0x90] sm:$0xff] %v331_v44  ;;  %364 = vst [vmem:[%s608_s25 + $0x98] sm:$0xff] %v332_v45  ;;  %v505_v56 = vunpack.c.l.bf16 %v524_v46  ;;  %v506_v57 = vunpack.c.h.bf16 %v524_v46  ;;  %v509_v58 = vunpack.c.l.bf16 %v525_v47  ;;  %v510_v59 = vunpack.c.h.bf16 %v525_v47 }
  0x2b   : > { %365 = vst [vmem:[%s608_s25 + $0xa0] sm:$0xff] %v333_v48  ;;  %366 = vst [vmem:[%s608_s25 + $0xa8] sm:$0xff] %v334_v49  ;;  %v266_v60 = vmul.f32 %v497_v52, %v581_v0  ;;  %v267_v61 = vmul.f32 %v498_v53, %v581_v0  ;;  %v268_v62 = vmul.f32 %v501_v54, %v581_v0 }
  0x2c   : > { %367 = vst [vmem:[%s608_s25 + $0xb0] sm:$0xff] %v335_v50  ;;  %368 = vst [vmem:[%s608_s25 + $0xb8] sm:$0xff] %v336_v51  ;;  %v269_v63 = vmul.f32 %v502_v55, %v581_v0  ;;  %v270_v1 = vmul.f32 %v505_v56, %v581_v0  ;;  %v271_v2 = vmul.f32 %v506_v57, %v581_v0 }
  0x2d   : > { %v272_v3 = vmul.f32 %v509_v58, %v581_v0  ;;  %v273_v4 = vmul.f32 %v510_v59, %v581_v0  ;;  %v305_v5 = vadd.f32 %v590_v9, %v266_v60  ;;  %v306_v6 = vadd.f32 %v590_v9, %v267_v61 }
  0x2e   : > { %v307_v7 = vadd.f32 %v590_v9, %v268_v62  ;;  %v308_v8 = vadd.f32 %v590_v9, %v269_v63  ;;  %v309_v10 = vadd.f32 %v590_v9, %v270_v1  ;;  %v310_v11 = vadd.f32 %v590_v9, %v271_v2 }
  0x2f   : > { %v311_v0 = vadd.f32 %v590_v9, %v272_v3  ;;  %v312_v12 = vadd.f32 %v590_v9, %v273_v4  ;;  %v337_v13 = vmax.f32 %v305_v5, 0.0  ;;  %v338_v14 = vmax.f32 %v306_v6, 0.0 }
  0x30   : > { %v339_v15 = vmax.f32 %v307_v7, 0.0  ;;  %v340_v16 = vmax.f32 %v308_v8, 0.0  ;;  %v341_v17 = vmax.f32 %v309_v10, 0.0  ;;  %v342_v18 = vmax.f32 %v310_v11, 0.0 }
  0x31   : > { %v343_v19 = vmax.f32 %v311_v0, 0.0  ;;  %v344_v20 = vmax.f32 %v312_v12, 0.0  ;;  %369 = vst [vmem:[%s608_s25 + $0xc0] sm:$0xff] %v337_v13  ;;  %370 = vst [vmem:[%s608_s25 + $0xc8] sm:$0xff] %v338_v14 }
  0x32   : > { %371 = vst [vmem:[%s608_s25 + $0xd0] sm:$0xff] %v339_v15  ;;  %372 = vst [vmem:[%s608_s25 + $0xd8] sm:$0xff] %v340_v16 }
  0x33   : > { %373 = vst [vmem:[%s608_s25 + $0xe0] sm:$0xff] %v341_v17  ;;  %374 = vst [vmem:[%s608_s25 + $0xe8] sm:$0xff] %v342_v18 }
  0x34   : > { %375 = vst [vmem:[%s608_s25 + $0xf0] sm:$0xff] %v343_v19  ;;  %376 = vst [vmem:[%s608_s25 + $0xf8] sm:$0xff] %v344_v20 }
  0x35 PF: > { %s13_s12 = sadd.s32 1, %s540_s12  }
  0x36   : > { %p10_p4 = scmp.ge.s32.totalorder %s13_s12, 4  }
  0x38   :  { %12 = sbr.rel (!%p10_p4) target bundleno = 1 (0x1), region = 62 }

// kernel: double_conv_block.4
= control target key start
LH: loop header
LB: loop body
LE: loop exit
PB: predicated region body
PF: predicated region fallthrough
CT: control target
= control target key end

     0   :  { %s6062_s18 = smov 0   ;;  %s7125_s0 = inlined_call_operand.vmem [shape: bf16[2,16,16,128], index: 0, kind: input, shape index: {}]   ;;  %s7126_s1 = inlined_call_operand.vmem [shape: f32[1,128], index: 1, kind: input, shape index: {}]   ;;  %s7127_s2 = inlined_call_operand.vmem [shape: f32[1,128], index: 2, kind: input, shape index: {}]   ;;  %s7128_s3 = inlined_call_operand.vmem [shape: bf16[9,128,128], index: 3, kind: input, shape index: {}]   ;;  %s7129_s4 = inlined_call_operand.vmem [shape: bf16[2,16,16,128], index: 4, kind: output, shape index: {0}]   ;;  %s7130_s5 = inlined_call_operand.vmem [shape: f32[2,2,128], index: 5, kind: output, shape index: {1}]  }
   0x1 LB: > { %s4553_s19 = sadd.s32 4294967295, %s6029_s18   ;;  %p4557_p0 = scmp.ge.s32.totalorder %s6029_s18, 1  ;;  %s6029_s18 = sphi %s6062_s18, %s16_s18  }
   0x2   : > { %p190_p1 = scmp.lt.s32.totalorder %s6029_s18, 3 }
   0x4   : > { %p191_p2 = pnand %p4557_p0, %p190_p1 }
   0x5   : > { %v5936_v0 = vld [vmem:[%s7128_s3 + $0x40] sm:$0xff] (!%p191_p2)   ;;  %v6031_v2 = vmov (!%p191_p2), 0   ;;  %v5938_v3 = vld [vmem:[%s7128_s3 + $0x48] sm:$0xff] (!%p191_p2)   ;;  %v5940_v5 = vld [vmem:[%s7128_s3 + $0x50] sm:$0xff] (!%p191_p2)   ;;  %p222_p3 = scmp.lt.s32.totalorder (!%p191_p2), %s4553_s19, 1  ;;  %vm4304_vm2 = vcmask (!%p191_p2), 1040384  }
   0x6   : > { %194 = sbr.rel (%p191_p2) target bundleno = 558 (0x22e), region = 36  ;;  %v5937_v1 = vld [vmem:[%s7128_s3 + $0x100] sm:$0xff] (!%p191_p2)   ;;  %412 = vst [vmem:[#allocation2 + $0x8] sm:$0xff] (!%p191_p2), %v6031_v2  ;;  %5239 = vmatprep.mubr.bf16.mxu1 (!%p191_p2), %v6031_v2  ;;  %411 = vst [vmem:[#allocation2] sm:$0xff] (!%p191_p2), %v6031_v2  ;;  %5223 = vmatprep.subr.bf16.mxu1 (!%p191_p2), %v5936_v0  ;;  %v5939_v4 = vld [vmem:[%s7128_s3 + $0x108] sm:$0xff] (!%p191_p2)  }
   0x7   : > { %413 = vst [vmem:[#allocation2 + $0x10] sm:$0xff] (!%p191_p2), %v6031_v2  ;;  %414 = vst [vmem:[#allocation2 + $0x18] sm:$0xff] (!%p191_p2), %v6031_v2  ;;  %5415 = vmatprep.subr.bf16.mxu0 (!%p191_p2), %v5937_v1  ;;  %5224 = vmatpush3.bf16.msra.mxu1 (!%p191_p2), %v5936_v0  ;;  %v5941_v6 = vld [vmem:[%s7128_s3 + $0x110] sm:$0xff] (!%p191_p2)   ;;  %v5942_v7 = vld [vmem:[%s7128_s3 + $0x58] sm:$0xff] (!%p191_p2)   ;;  %vm1222_vm0 = vsmask.f32 (!%p191_p2), 7424 }
   0x8   : > { %416 = vst [vmem:[#allocation2 + $0x28] sm:$0xff] (!%p191_p2), %v6031_v2  ;;  %417 = vst [vmem:[#allocation2 + $0x30] sm:$0xff] (!%p191_p2), %v6031_v2  ;;  %5416 = vmatpush3.bf16.msra.mxu0 (!%p191_p2), %v5937_v1  ;;  %5225 = vmatprep.subr.bf16.mxu1 (!%p191_p2), %v5938_v3  ;;  %v5943_v8 = vld [vmem:[%s7128_s3 + $0x118] sm:$0xff] (!%p191_p2)   ;;  %v5944_v9 = vld [vmem:[%s7128_s3 + $0x60] sm:$0xff] (!%p191_p2)   ;;  %vm530_vm1 = vsmask.f32 (!%p191_p2), 256 }
   0x9   : > { %419 = vst [vmem:[#allocation2 + $0x40] sm:$0xff] (!%p191_p2), %v6031_v2  ;;  %420 = vst [vmem:[#allocation2 + $0x48] sm:$0xff] (!%p191_p2), %v6031_v2  ;;  %5417 = vmatprep.subr.bf16.mxu0 (!%p191_p2), %v5939_v4  ;;  %v5945_v10 = vld [vmem:[%s7128_s3 + $0x120] sm:$0xff] (!%p191_p2)   ;;  %v5946_v11 = vld [vmem:[%s7128_s3 + $0x68] sm:$0xff] (!%p191_p2)  }
   0xa   : > { %422 = vst [vmem:[#allocation2 + $0x58] sm:$0xff] (!%p191_p2), %v6031_v2  ;;  %423 = vst [vmem:[#allocation2 + $0x60] sm:$0xff] (!%p191_p2), %v6031_v2  ;;  %v5947_v12 = vld [vmem:[%s7128_s3 + $0x128] sm:$0xff] (!%p191_p2)   ;;  %v6162_v14 = vld [vmem:[%s7126_s1] ss:$0 sm:$0xff] (!%p191_p2) }
   0xb   : > { %425 = vst [vmem:[#allocation2 + $0x70] sm:$0xff] (!%p191_p2), %v6031_v2  ;;  %426 = vst [vmem:[#allocation2 + $0x78] sm:$0xff] (!%p191_p2), %v6031_v2  ;;  %5226 = vmatpush3.bf16.msra.mxu1 (!%p191_p2), %v5938_v3  ;;  %v6167_v17 = vld [vmem:[%s7127_s2] ss:$0 sm:$0xff] (!%p191_p2)  ;;  %v5948_v23 = vld [vmem:[%s7128_s3 + $0x70] sm:$0xff] (!%p191_p2)  }
   0xc   : > { %428 = vst [vmem:[#allocation2 + $0x88] sm:$0xff] (!%p191_p2), %v6031_v2  ;;  %429 = vst [vmem:[#allocation2 + $0x90] sm:$0xff] (!%p191_p2), %v6031_v2  ;;  %5418 = vmatpush3.bf16.msra.mxu0 (!%p191_p2), %v5939_v4  ;;  %5227 = vmatprep.subr.bf16.mxu1 (!%p191_p2), %v5940_v5  ;;  %v5949_v25 = vld [vmem:[%s7128_s3 + $0x130] sm:$0xff] (!%p191_p2)   ;;  %v5950_v39 = vld [vmem:[%s7128_s3 + $0x78] sm:$0xff] (!%p191_p2)  }
   0xd   : > { %431 = vst [vmem:[#allocation2 + $0xa0] sm:$0xff] %v6031_v2  ;;  %432 = vst [vmem:[#allocation2 + $0xa8] sm:$0xff] %v6031_v2  ;;  %s7152_s19 = smov (!%p222_p3, %s4553_s19), 1  ;;  %5419 = vmatprep.subr.bf16.mxu0 %v5941_v6  ;;  %v5951_v44 = vld [vmem:[%s7128_s3 + $0x138] sm:$0xff]   ;;  %v5952_v56 = vld [vmem:[%s7128_s3] sm:$0xff]  }
   0xe   : > { %434 = vst [vmem:[#allocation2 + $0xb8] sm:$0xff] %v6031_v2  ;;  %435 = vst [vmem:[#allocation2 + $0xc0] sm:$0xff] %v6031_v2  ;;  %s4799_s11 = sshll.u32 %s7152_s19, 7  ;;  %v5953_v61 = vld [vmem:[%s7128_s3 + $0x140] sm:$0xff]  }
   0xf   : > { %437 = vst [vmem:[#allocation2 + $0xd0] sm:$0xff] %v6031_v2  ;;  %438 = vst [vmem:[#allocation2 + $0xd8] sm:$0xff] %v6031_v2  ;;  %5228 = vmatpush3.bf16.msra.mxu1 %v5940_v5  ;;  %s6150_s20 = scalar_lea.vmem %s7125_s0, %s4799_s11  ;;  %s7096_s13 = scalar_lea.vmem %s7129_s4, %s4799_s11 }
  0x10   : > { %440 = vst [vmem:[#allocation2 + $0xe8] sm:$0xff] %v6031_v2  ;;  %441 = vst [vmem:[#allocation2 + $0xf0] sm:$0xff] %v6031_v2  ;;  %5420 = vmatpush3.bf16.msra.mxu0 %v5941_v6  ;;  %5229 = vmatprep.subr.bf16.mxu1 %v5942_v7  ;;  %v4834_v13 = vld [vmem:[%s6150_s20] sm:$0xff]   ;;  %v4977_v18 = vld [vmem:[%s6150_s20 + $0x8] sm:$0xff]   ;;  %s4562_s11 = sshll.u32 %s7152_s19, 1 }
  0x11   : > { %443 = vst [vmem:[#allocation2 + $0x100] sm:$0xff] %v6031_v2  ;;  %444 = vst [vmem:[#allocation2 + $0x108] sm:$0xff] %v6031_v2  ;;  %5421 = vmatprep.subr.bf16.mxu0 %v5943_v8  ;;  %v4835_v15 = vunpack.c.l.bf16 %v4834_v13  ;;  %v4836_v16 = vunpack.c.h.bf16 %v4834_v13  ;;  %v4839_v21 = vunpack.c.l.bf16 %v4977_v18  ;;  %v4840_v22 = vunpack.c.h.bf16 %v4977_v18  ;;  %v4978_v24 = vld [vmem:[%s6150_s20 + $0x10] sm:$0xff]   ;;  %v4979_v30 = vld [vmem:[%s6150_s20 + $0x18] sm:$0xff]   ;;  %s235_s16 = scalar_lea.vmem %s7130_s5, %s4562_s11 }
  0x12   : > { %446 = vst [vmem:[#allocation2 + $0x118] sm:$0xff] %v6031_v2  ;;  %447 = vst [vmem:[#allocation2 + $0x120] sm:$0xff] %v6031_v2  ;;  %v4843_v31 = vunpack.c.l.bf16 %v4978_v24  ;;  %v4844_v32 = vunpack.c.h.bf16 %v4978_v24  ;;  %v4847_v33 = vunpack.c.l.bf16 %v4979_v30  ;;  %v4848_v34 = vunpack.c.h.bf16 %v4979_v30  ;;  %v4980_v43 = vld [vmem:[%s6150_s20 + $0x20] sm:$0xff]   ;;  %v4981_v55 = vld [vmem:[%s6150_s20 + $0x28] sm:$0xff]  }
  0x13   : > { %449 = vst [vmem:[#allocation2 + $0x130] sm:$0xff] %v6031_v2  ;;  %450 = vst [vmem:[#allocation2 + $0x138] sm:$0xff] %v6031_v2  ;;  %5230 = vmatpush3.bf16.msra.mxu1 %v5942_v7  ;;  %v308_v19 = vmul.f32 %v4835_v15, %v6162_v14  ;;  %v309_v20 = vmul.f32 %v4836_v16, %v6162_v14  ;;  %v310_v28 = vmul.f32 %v4839_v21, %v6162_v14 }
  0x14   : > { %452 = vst [vmem:[#allocation2 + $0x148] sm:$0xff] %v6031_v2  ;;  %453 = vst [vmem:[#allocation2 + $0x150] sm:$0xff] %v6031_v2  ;;  %5422 = vmatpush3.bf16.msra.mxu0 %v5943_v8  ;;  %5231 = vmatprep.subr.bf16.mxu1 %v5944_v9  ;;  %v311_v29 = vmul.f32 %v4840_v22, %v6162_v14  ;;  %v312_v40 = vmul.f32 %v4843_v31, %v6162_v14  ;;  %v4851_v52 = vunpack.c.l.bf16 %v4980_v43  ;;  %v4982_v8 = vld [vmem:[%s6150_s20 + $0x30] sm:$0xff]  }
  0x15   : > { %455 = vst [vmem:[#allocation2 + $0x160] sm:$0xff] %v6031_v2  ;;  %456 = vst [vmem:[#allocation2 + $0x168] sm:$0xff] %v6031_v2  ;;  %5423 = vmatprep.subr.bf16.mxu0 %v5945_v10  ;;  %v347_v26 = vadd.f32 %v6167_v17, %v308_v19  ;;  %v348_v27 = vadd.f32 %v6167_v17, %v309_v20  ;;  %v349_v37 = vadd.f32 %v6167_v17, %v310_v28  ;;  %v5958_v22 = vld [vmem:[%s7128_s3 + $0x10] sm:$0xff]  }
  0x16   : > { %458 = vst [vmem:[#allocation2 + $0x178] sm:$0xff] %v6031_v2  ;;  %459 = vst [vmem:[#allocation2 + $0x180] sm:$0xff] %v6031_v2  ;;  %v350_v38 = vadd.f32 %v6167_v17, %v311_v29  ;;  %v313_v41 = vmul.f32 %v4844_v32, %v6162_v14  ;;  %v314_v42 = vmul.f32 %v4847_v33, %v6162_v14  ;;  %v4852_v60 = vunpack.c.h.bf16 %v4980_v43 }
  0x17   : > { %461 = vst [vmem:[#allocation2 + $0x190] sm:$0xff] %v6031_v2  ;;  %462 = vst [vmem:[#allocation2 + $0x198] sm:$0xff] %v6031_v2  ;;  %5232 = vmatpush3.bf16.msra.mxu1 %v5944_v9  ;;  %v379_v35 = vmax.f32 %v347_v26, 0.0  ;;  %v380_v36 = vmax.f32 %v348_v27, 0.0  ;;  %v381_v46 = vmax.f32 %v349_v37, 0.0  ;;  %v315_v48 = vmul.f32 %v4848_v34, %v6162_v14  ;;  %v5954_v9 = vld [vmem:[%s7128_s3 + $0x148] sm:$0xff]  }
  0x18   : > { %464 = vst [vmem:[#allocation2 + $0x1a8] sm:$0xff] %v6031_v2  ;;  %5424 = vmatpush3.bf16.msra.mxu0 %v5945_v10  ;;  %5233 = vmatprep.subr.bf16.mxu1 %v5946_v11  ;;  %v382_v47 = vmax.f32 %v350_v38, 0.0  ;;  %v351_v49 = vadd.f32 %v6167_v17, %v312_v40  ;;  %v352_v50 = vadd.f32 %v6167_v17, %v313_v41  ;;  %v4855_v3 = vunpack.c.l.bf16 %v4981_v55  ;;  %v5957_v34 = vld [vmem:[%s7128_s3 + $0x158] sm:$0xff]   ;;  %v4984_v37 = vld [vmem:[%s6150_s20 + $0x40] sm:$0xff]  }
  0x19   : > { %5425 = vmatprep.subr.bf16.mxu0 %v5947_v12  ;;  %v6196_v45 = vpack.c.bf16 %v380_v36, %v379_v35  ;;  %v353_v51 = vadd.f32 %v6167_v17, %v314_v42  ;;  %v354_v54 = vadd.f32 %v6167_v17, %v315_v48  ;;  %v316_v0 = vmul.f32 %v4851_v52, %v6162_v14  ;;  %v5961_v41 = vld [vmem:[%s7128_s3 + $0x18] sm:$0xff]   ;;  %v2446_v52 = vld [vmem:[#allocation2 + $0x28] sm:$0x1] }
  0x1a   : > { %v6204_v53 = vpack.c.bf16 %v382_v47, %v381_v46  ;;  %v383_v57 = vmax.f32 %v351_v49, 0.0  ;;  %v384_v58 = vmax.f32 %v352_v50, 0.0  ;;  %v317_v1 = vmul.f32 %v4852_v60, %v6162_v14  ;;  %v4985_v49 = vld [vmem:[%s6150_s20 + $0x48] sm:$0xff]  }
  0x1b   : > { %5234 = vmatpush3.bf16.msra.mxu1 %v5946_v11  ;;  %482 = vst [vmem:[#allocation2 + $0x20] sm:$0xff] %v6196_v45  ;;  %5431 = vmatprep.mubr.bf16.mxu0 %v6196_v45  ;;  %v385_v59 = vmax.f32 %v353_v51, 0.0  ;;  %v386_v62 = vmax.f32 %v354_v54, 0.0  ;;  %v4856_v5 = vunpack.c.h.bf16 %v4981_v55  ;;  %v355_v6 = vadd.f32 %v6167_v17, %v316_v0  ;;  %v4983_v11 = vld [vmem:[%s6150_s20 + $0x38] sm:$0xff]   ;;  %v5959_v51 = vld [vmem:[%s7128_s3 + $0x160] sm:$0xff]   ;;  %v4986_v0 = vld [vmem:[%s6150_s20 + $0x50] sm:$0xff]  }
  0x1c   : > { %5426 = vmatpush3.bf16.msra.mxu0 %v5947_v12  ;;  %5235 = vmatprep.subr.bf16.mxu1 %v5948_v23  ;;  %483 = vst [vmem:[#allocation2 + $0x38] sm:$0xff] %v6204_v53  ;;  %v6215_v63 = vpack.c.bf16 %v384_v58, %v383_v57  ;;  %v356_v7 = vadd.f32 %v6167_v17, %v317_v1  ;;  %v5955_v12 = vld [vmem:[%s7128_s3 + $0x8] sm:$0xff]   ;;  %v4859_v19 = vunpack.c.l.bf16 %v4982_v8  ;;  %v4860_v20 = vunpack.c.h.bf16 %v4982_v8  ;;  %v5964_v57 = vld [vmem:[%s7128_s3 + $0x20] sm:$0xff]  }
  0x1d   : > { %5427 = vmatprep.subr.bf16.mxu0 %v5949_v25  ;;  %v6219_v4 = vpack.c.bf16 %v386_v62, %v385_v59  ;;  %v318_v10 = vmul.f32 %v4855_v3, %v6162_v14  ;;  %v387_v13 = vmax.f32 %v355_v6, 0.0  ;;  %v319_v16 = vmul.f32 %v4856_v5, %v6162_v14  ;;  %v5960_v1 = vld [vmem:[%s7128_s3 + $0x168] sm:$0xff]  }
  0x1e   : > { %484 = vst [vmem:[#allocation2 + $0x50] sm:$0xff] %v6215_v63  ;;  %v388_v15 = vmax.f32 %v356_v7, 0.0  ;;  %v4863_v24 = vunpack.c.l.bf16 %v4983_v11  ;;  %v320_v27 = vmul.f32 %v4859_v19, %v6162_v14  ;;  %v321_v28 = vmul.f32 %v4860_v20, %v6162_v14  ;;  %v2450_v20 = vld [vmem:[#allocation2 + $0x58] sm:$0x1] }
  0x1f   : > { %5236 = vmatpush3.bf16.msra.mxu1 %v5948_v23  ;;  %485 = vst [vmem:[#allocation2 + $0x68] sm:$0xff] %v6219_v4  ;;  %v357_v18 = vadd.f32 %v6167_v17, %v318_v10  ;;  %v358_v23 = vadd.f32 %v6167_v17, %v319_v16  ;;  %v4864_v30 = vunpack.c.h.bf16 %v4983_v11  ;;  %v4867_v46 = vunpack.c.l.bf16 %v4984_v37  ;;  %v5966_v10 = vld [vmem:[%s7128_s3 + $0x28] sm:$0xff]  }
  0x20   : > { %5428 = vmatpush3.bf16.msra.mxu0 %v5949_v25  ;;  %5237 = vmatprep.subr.bf16.mxu1 %v5950_v39  ;;  %v6239_v21 = vpack.c.bf16 %v388_v15, %v387_v13  ;;  %v5956_v25 = vld [vmem:[%s7128_s3 + $0x150] sm:$0xff]   ;;  %v359_v31 = vadd.f32 %v6167_v17, %v320_v27  ;;  %v360_v32 = vadd.f32 %v6167_v17, %v321_v28  ;;  %v4868_v48 = vunpack.c.h.bf16 %v4984_v37  ;;  %v4987_v28 = vld [vmem:[%s6150_s20 + $0x58] sm:$0xff]  }
  0x21   : > { %5429 = vmatprep.subr.bf16.mxu0 %v5951_v44  ;;  %v389_v26 = vmax.f32 %v357_v18, 0.0  ;;  %v390_v29 = vmax.f32 %v358_v23, 0.0  ;;  %v322_v33 = vmul.f32 %v4863_v24, %v6162_v14  ;;  %v323_v36 = vmul.f32 %v4864_v30, %v6162_v14  ;;  %v2448_v18 = vld [vmem:[#allocation2 + $0x40] sm:$0x1]  ;;  %v5962_v23 = vld [vmem:[%s7128_s3 + $0x170] sm:$0xff]  }
  0x22   : > { %486 = vst [vmem:[#allocation2 + $0x80] sm:$0xff] %v6239_v21  ;;  %v391_v38 = vmax.f32 %v359_v31, 0.0  ;;  %v1729_v50 = vshll.u32 %v6196_v45, 16  ;;  %v324_v54 = vmul.f32 %v4867_v46, %v6162_v14  ;;  %v4871_v59 = vunpack.c.l.bf16 %v4985_v49  ;;  %v5963_v46 = vld [vmem:[%s7128_s3 + $0x178] sm:$0xff]  }
  0x23   : > { %5238 = vmatpush3.bf16.msra.mxu1 %v5950_v39  ;;  %v6258_v35 = vpack.c.bf16 %v390_v29, %v389_v26  ;;  %v392_v39 = vmax.f32 %v360_v32, 0.0  ;;  %v361_v40 = vadd.f32 %v6167_v17, %v322_v33  ;;  %v362_v42 = vadd.f32 %v6167_v17, %v323_v36  ;;  %v5968_v33 = vld [vmem:[%s7128_s3 + $0x30] sm:$0xff]  }
  0x24   : > { %5430 = vmatpush3.bf16.msra.mxu0 %v5951_v44  ;;  %5271 = vmatprep.subr.bf16.mxu1 %v5952_v56  ;;  %v363_v58 = vadd.f32 %v6167_v17, %v324_v54  ;;  %v1726_v60 = vshrl.u32 %v6196_v45, 16  ;;  %v4872_v62 = vunpack.c.h.bf16 %v4985_v49  ;;  %v2482_v3 = vrot.slane %v1729_v50, 1 }
  0x25   : > { %5463 = vmatprep.subr.bf16.mxu0 %v5953_v61  ;;  %487 = vst [vmem:[#allocation2 + $0x98] sm:$0xff] %v6258_v35  ;;  %v6271_v43 = vpack.c.bf16 %v392_v39, %v391_v38  ;;  %v393_v44 = vmax.f32 %v361_v40, 0.0  ;;  %v394_v47 = vmax.f32 %v362_v42, 0.0  ;;  %v2485_v5 = vshll.u32 %v2446_v52, 16 }
  0x26   : > { %5240 = vmatmul.mubr.bf16.vlgmr.msra.gmra.mrb[0].mxu1 %v6196_v45  ;;  %v395_v6 = vmax.f32 %v363_v58, 0.0  ;;  %v326_v7 = vmul.f32 %v4871_v59, %v6162_v14  ;;  %v1741_v11 = vshll.u32 %v6204_v53, 16  ;;  %v4875_v15 = vunpack.c.l.bf16 %v4986_v0  ;;  %v504_v45 = vld [vmem:[#allocation2 + $0x48] sm:$0x80] }
  0x27   : > { %5432 = vmatmul.mubr.bf16.vlgmr.msra.gmra.mrb[0].mxu0 %v6204_v53  ;;  %5272 = vmatpush3.bf16.msra.mxu1 %v5952_v56  ;;  %488 = vst [vmem:[#allocation2 + $0xb0] sm:$0xff] %v6271_v43  ;;  %v6281_v55 = vpack.c.bf16 %v394_v47, %v393_v44  ;;  %v325_v56 = vmul.f32 %v4868_v48, %v6162_v14  ;;  %v1738_v29 = vshrl.u32 %v6204_v53, 16  ;;  %v1750_v30 = vshrl.u32 %v6215_v63, 16 }
  0x28   : > { %5464 = vmatpush3.bf16.msra.mxu0 %v5953_v61  ;;  %5243 = vmatprep.mubr.bf16.mxu1 %v6204_v53  ;;  %v365_v13 = vadd.f32 %v6167_v17, %v326_v7  ;;  %v2483_v24 = vor.u32 %v2482_v3, %v1726_v60  ;;  %v328_v27 = vmul.f32 %v4875_v15, %v6162_v14  ;;  %v2497_v36 = vshll.u32 %v2448_v18, 16 }
  0x29   : > { %5465 = vmatprep.subr.bf16.mxu0 %v5954_v9  ;;  %5435 = vmatprep.mubr.bf16.mxu0 %v6215_v63  ;;  %489 = vst [vmem:[#allocation2 + $0xc8] sm:$0xff] %v6281_v55  ;;  %v364_v61 = vadd.f32 %v6167_v17, %v325_v56  ;;  %v2509_v40 = vshll.u32 %v2450_v20, 16  ;;  %v4879_v42 = vunpack.c.l.bf16 %v4987_v28  ;;  %v1762_v44 = vshrl.u32 %v6219_v4, 16  ;;  %v4989_v20 = vld [vmem:[%s6150_s20 + $0x68] sm:$0xff]  }
  0x2a   : > { %5273 = vmatprep.subr.bf16.mxu1 %v5955_v12  ;;  %v397_v26 = vmax.f32 %v365_v13, 0.0  ;;  %v367_v38 = vadd.f32 %v6167_v17, %v328_v27  ;;  %v4880_v49 = vunpack.c.h.bf16 %v4987_v28  ;;  %v1765_v52 = vshll.u32 %v6219_v4, 16  ;;  %v2454_v13 = vld [vmem:[#allocation2 + $0x88] sm:$0x1] }
  0x2b   : > { %5274 = vmatpush3.bf16.msra.mxu1 %v5955_v12  ;;  %v396_v8 = vmax.f32 %v364_v61, 0.0  ;;  %v1753_v12 = vshll.u32 %v6215_v63, 16  ;;  %v1777_v54 = vshll.u32 %v6239_v21, 16  ;;  %v2499_v59 = vrot.slane %v2497_v36, 1  ;;  %v2452_v61 = vld [vmem:[#allocation2 + $0x70] sm:$0x1] }
  0x2c   : > { %5466 = vmatpush3.bf16.msra.mxu0 %v5954_v9  ;;  %5275 = vmatprep.subr.bf16.mxu1 %v5958_v22  ;;  %v327_v9 = vmul.f32 %v4872_v62, %v6162_v14  ;;  %v399_v48 = vmax.f32 %v367_v38, 0.0  ;;  %v330_v62 = vmul.f32 %v4879_v42, %v6162_v14  ;;  %v2511_v3 = vrot.slane %v2509_v40, 1  ;;  %v4990_v42 = vld [vmem:[%s6150_s20 + $0x70] sm:$0xff]  }
  0x2d   : > { %5467 = vmatprep.subr.bf16.mxu0 %v5956_v25  ;;  %v6309_v16 = vpack.c.bf16 %v396_v8, %v395_v6  ;;  %v2506_v37 = vrot.slane %v1753_v12, 1  ;;  %v1774_v7 = vshrl.u32 %v6239_v21, 16  ;;  %v5965_v8 = vld [vmem:[%s7128_s3 + $0x180] sm:$0xff]   ;;  %v2518_v18 = vrot.slane %v1765_v52, 1 }
  0x2e   : > { %5244 = vmatmul.mubr.bf16.gmra.mrb[4].mxu1 %v6215_v63  ;;  %v366_v19 = vadd.f32 %v6167_v17, %v327_v9  ;;  %v369_v9 = vadd.f32 %v6167_v17, %v330_v62  ;;  %v4887_v38 = vunpack.c.l.bf16 %v4989_v20  ;;  %v1789_v40 = vshll.u32 %v6258_v35, 16 }
  0x2f   : > { %5436 = vmatmul.mubr.bf16.gmra.mrb[4].mxu0 %v6219_v4  ;;  %5247 = vmatprep.mubr.bf16.mxu1 %v6219_v4  ;;  %490 = vst [vmem:[#allocation2 + $0xe0] sm:$0xff] %v6309_v16  ;;  %v1764_v53 = vrot.slane %v1762_v44, 7 }
  0x30   : > { %5468 = vmatpush3.bf16.msra.mxu0 %v5956_v25  ;;  %5439 = vmatprep.mubr.bf16.mxu0 %v6239_v21  ;;  %v2487_v25 = vrot.slane %v2485_v5, 1  ;;  %v398_v31 = vmax.f32 %v366_v19, 0.0  ;;  %v2521_v19 = vshll.u32 %v2452_v61, 16 }
  0x31   : > { %5469 = vmatprep.subr.bf16.mxu0 %v5957_v34  ;;  %5276 = vmatpush3.bf16.msra.mxu1 %v5958_v22  ;;  %v4876_v22 = vunpack.c.h.bf16 %v4986_v0  ;;  %v331_v0 = vmul.f32 %v4880_v49, %v6162_v14 }
  0x32   : > { %5277 = vmatprep.subr.bf16.mxu1 %v5961_v41  ;;  %v6331_v39 = vpack.c.bf16 %v398_v31, %v397_v26  ;;  %v2488_v47 = vsel %vm1222_vm0, %v2483_v24, %v2487_v25  ;;  %v2530_v31 = vrot.slane %v1777_v54, 1 }
  0x33   : > { %v329_v32 = vmul.f32 %v4876_v22, %v6162_v14  ;;  %v6370_v22 = vld [vmem:[%s7128_s3 + $0x80] sm:$0xff]  }
  0x34   : > { %5470 = vmatpush3.bf16.msra.mxu0 %v5957_v34  ;;  %v2494_v34 = vrot.slane %v1741_v11, 1  ;;  %491 = vst [vmem:[#allocation2 + $0xf8] sm:$0xff] %v6331_v39 }
  0x35   : > { %5471 = vmatprep.subr.bf16.mxu0 %v5959_v51  ;;  %5278 = vmatpush3.bf16.msra.mxu1 %v5961_v41  ;;  %v368_v41 = vadd.f32 %v6167_v17, %v329_v32  ;;  %v2533_v32 = vshll.u32 %v2454_v13, 16 }
  0x36   : > { %5248 = vmatmul.mubr.bf16.gmra.mrb[8].mxu1 %v6239_v21  ;;  %5279 = vmatprep.subr.bf16.mxu1 %v5964_v57  ;;  %v2495_v58 = vor.u32 %v2494_v34, %v1738_v29 }
  0x37   : > { %5440 = vmatmul.mubr.bf16.gmra.mrb[8].mxu0 %v6258_v35  ;;  %5251 = vmatprep.mubr.bf16.mxu1 %v6258_v35  ;;  %v400_v56 = vmax.f32 %v368_v41, 0.0  ;;  %v4888_v41 = vunpack.c.h.bf16 %v4989_v20  ;;  %v2535_v61 = vrot.slane %v2533_v32, 1 }
  0x38   : > { %5472 = vmatpush3.bf16.msra.mxu0 %v5959_v51  ;;  %5443 = vmatprep.mubr.bf16.mxu0 %v6271_v43  ;;  %v4988_v51 = vld [vmem:[%s6150_s20 + $0x60] sm:$0xff]   ;;  %v2500_v27 = vsel %vm1222_vm0, %v2495_v58, %v2499_v59  ;;  %v2531_v59 = vor.u32 %v2530_v31, %v1774_v7  ;;  %v5971_v31 = vld [vmem:[%s7128_s3 + $0x198] sm:$0xff]  }
  0x39   : > { %5473 = vmatprep.subr.bf16.mxu0 %v5960_v1  ;;  %5280 = vmatpush3.bf16.msra.mxu1 %v5964_v57  ;;  %v5970_v57 = vld [vmem:[%s7128_s3 + $0x38] sm:$0xff]   ;;  %v6355_v5 = vpack.c.bf16 %v400_v56, %v399_v48  ;;  %v4883_v6 = vunpack.c.l.bf16 %v4988_v51  ;;  %v4884_v15 = vunpack.c.h.bf16 %v4988_v51  ;;  %v1801_v51 = vshll.u32 %v6271_v43, 16  ;;  %v2456_v56 = vld [vmem:[#allocation2 + $0xa0] sm:$0x1] }
  0x3a   : > { %5281 = vmatprep.subr.bf16.mxu1 %v5966_v10  ;;  %v335_v58 = vmul.f32 %v4888_v41, %v6162_v14 }
  0x3b   : > { %492 = vst [vmem:[#allocation2 + $0x110] sm:$0xff] %v6355_v5  ;;  %v332_v25 = vmul.f32 %v4883_v6, %v6162_v14  ;;  %v333_v26 = vmul.f32 %v4884_v15, %v6162_v14  ;;  %v2542_v15 = vrot.slane %v1789_v40, 1 }
  0x3c   : > { %5474 = vmatpush3.bf16.msra.mxu0 %v5960_v1  ;;  %v2507_v1 = vor.u32 %v2506_v37, %v1750_v30  ;;  %v374_v6 = vadd.f32 %v6167_v17, %v335_v58  ;;  %v5973_v58 = vld [vmem:[%s7128_s3 + $0x1a0] sm:$0xff]  }
  0x3d   : > { %5475 = vmatprep.subr.bf16.mxu0 %v5962_v23  ;;  %5282 = vmatpush3.bf16.msra.mxu1 %v5966_v10  ;;  %v370_v10 = vadd.f32 %v6167_v17, %v331_v0  ;;  %v371_v36 = vadd.f32 %v6167_v17, %v332_v25  ;;  %v372_v37 = vadd.f32 %v6167_v17, %v333_v26  ;;  %v5969_v0 = vld [vmem:[%s7128_s3 + $0x190] sm:$0xff]   ;;  %v1798_v25 = vshrl.u32 %v6271_v43, 16 }
  0x3e   : > { %5252 = vmatmul.mubr.bf16.gmra.mrb[12].mxu1 %v6271_v43  ;;  %5283 = vmatprep.subr.bf16.mxu1 %v5968_v33  ;;  %v2512_v28 = vsel %vm1222_vm0, %v2507_v1, %v2511_v3  ;;  %v4891_v1 = vunpack.c.l.bf16 %v4990_v42  ;;  %v406_v20 = vmax.f32 %v374_v6, 0.0  ;;  %v2536_v26 = vsel %vm1222_vm0, %v2531_v59, %v2535_v61  ;;  %v2462_v61 = vld [vmem:[#allocation2 + $0xe8] sm:$0x1]  ;;  %v5984_v43 = vld [vmem:[%s7128_s3 + $0xb0] sm:$0xff]  }
  0x3f   : > { %5444 = vmatmul.mubr.bf16.gmra.mrb[12].mxu0 %v6281_v55  ;;  %5255 = vmatprep.mubr.bf16.mxu1 %v6281_v55  ;;  %v402_v24 = vmax.f32 %v370_v10, 0.0  ;;  %v403_v48 = vmax.f32 %v371_v36, 0.0  ;;  %v404_v49 = vmax.f32 %v372_v37, 0.0  ;;  %v1786_v10 = vshrl.u32 %v6258_v35, 16 }
  0x40   : > { %5476 = vmatpush3.bf16.msra.mxu0 %v5962_v23  ;;  %5479 = vmatprep.mubr.bf16.mxu0 %v2488_v47  ;;  %v401_v23 = vmax.f32 %v369_v9, 0.0  ;;  %v2523_v47 = vrot.slane %v2521_v19, 1  ;;  %v4892_v9 = vunpack.c.h.bf16 %v4990_v42  ;;  %v1813_v37 = vshll.u32 %v6281_v55, 16 }
  0x41   : > { %5477 = vmatprep.subr.bf16.mxu0 %v5963_v46  ;;  %5284 = vmatpush3.bf16.msra.mxu1 %v5968_v33  ;;  %v5967_v33 = vld [vmem:[%s7128_s3 + $0x188] sm:$0xff]   ;;  %v6398_v62 = vpack.c.bf16 %v404_v49, %v403_v48  ;;  %v2543_v41 = vor.u32 %v2542_v15, %v1786_v10  ;;  %v498_v48 = vld [vmem:[#allocation2] sm:$0x80]  ;;  %v647_v49 = vshll.u32 %v6309_v16, 16 }
  0x42   : > { %5285 = vmatprep.subr.bf16.mxu1 %v5970_v57  ;;  %v6381_v34 = vpack.c.bf16 %v402_v24, %v401_v23  ;;  %v336_v23 = vmul.f32 %v4891_v1, %v6162_v14  ;;  %v337_v24 = vmul.f32 %v4892_v9, %v6162_v14  ;;  %v1810_v1 = vshrl.u32 %v6281_v55, 16 }
  0x43   : > { %494 = vst [vmem:[#allocation2 + $0x140] sm:$0xff] %v6398_v62  ;;  %v2566_v6 = vrot.slane %v1813_v37, 1  ;;  %v532_v9 = vshrl.u32 %v498_v48, 16  ;;  %v2466_v48 = vld [vmem:[#allocation2 + $0x118] sm:$0x1] }
  0x44   : > { %5478 = vmatpush3.bf16.msra.mxu0 %v5963_v46  ;;  %v2519_v46 = vor.u32 %v2518_v18, %v1762_v44  ;;  %493 = vst [vmem:[#allocation2 + $0x128] sm:$0xff] %v6381_v34  ;;  %v2545_v18 = vshll.u32 %v2456_v56, 16  ;;  %v376_v36 = vadd.f32 %v6167_v17, %v337_v24  ;;  %v2464_v24 = vld [vmem:[#allocation2 + $0x100] sm:$0x1] }
  0x45   : > { %5511 = vmatprep.subr.bf16.mxu0 %v5965_v8  ;;  %5286 = vmatpush3.bf16.msra.mxu1 %v5970_v57  ;;  %v334_v57 = vmul.f32 %v4887_v38, %v6162_v14  ;;  %v2460_v38 = vld [vmem:[#allocation2 + $0xd0] sm:$0x1]  ;;  %v6501_v44 = vld [vmem:[%s7128_s3 + $0x1c0] sm:$0xff]  }
  0x46   : > { %5256 = vmatmul.mubr.bf16.gmra.mrb[16].mxu1 %v6309_v16  ;;  %5319 = vmatprep.subr.bf16.mxu1 %v6370_v22  ;;  %v2524_v13 = vsel %vm1222_vm0, %v2519_v46, %v2523_v47  ;;  %v2547_v42 = vrot.slane %v2545_v18, 1  ;;  %v408_v47 = vmax.f32 %v376_v36, 0.0  ;;  %v2578_v18 = vrot.slane %v647_v49, 1 }
  0x47   : > { %5480 = vmatmul.mubr.bf16.vlgmr.msra.gmra.mrb[0].mxu0 %v2500_v27  ;;  %5259 = vmatprep.mubr.bf16.mxu1 %v6331_v39  ;;  %v373_v3 = vadd.f32 %v6167_v17, %v334_v57  ;;  %v2554_v27 = vrot.slane %v1801_v51, 1  ;;  %v671_v36 = vshll.u32 %v6355_v5, 16 }
  0x48   : > { %5512 = vmatpush3.bf16.msra.mxu0 %v5965_v8  ;;  %5483 = vmatprep.mubr.bf16.mxu0 %v2512_v28  ;;  %v2458_v8 = vld [vmem:[#allocation2 + $0xb8] sm:$0x1] }
  0x49   : > { %5513 = vmatprep.subr.bf16.mxu0 %v5967_v33  ;;  %v405_v19 = vmax.f32 %v373_v3, 0.0  ;;  %v2557_v28 = vshll.u32 %v2458_v8, 16  ;;  %v2555_v56 = vor.u32 %v2554_v27, %v1798_v25  ;;  %v2548_v3 = vsel %vm1222_vm0, %v2543_v41, %v2547_v42  ;;  %v5977_v42 = vld [vmem:[%s7128_s3 + $0x1b0] sm:$0xff]  }
  0x4a   : > { %v2569_v8 = vshll.u32 %v2460_v38, 16 }
  0x4b   : > { %v6420_v32 = vpack.c.bf16 %v406_v20, %v405_v19  ;;  %v2559_v57 = vrot.slane %v2557_v28, 1  ;;  %v5975_v19 = vld [vmem:[%s7128_s3 + $0x1a8] sm:$0xff]   ;;  %v500_v20 = vld [vmem:[#allocation2 + $0x18] sm:$0x80]  ;;  %v534_v28 = vrot.slane %v532_v9, 7 }
  0x4c   : > { %5514 = vmatpush3.bf16.msra.mxu0 %v5967_v33  ;;  %v375_v33 = vadd.f32 %v6167_v17, %v336_v23  ;;  %v659_v23 = vshll.u32 %v6331_v39, 16  ;;  %v2571_v27 = vrot.slane %v2569_v8, 1  ;;  %v668_v8 = vshrl.u32 %v6355_v5, 16 }
  0x4d   : > { %5515 = vmatprep.subr.bf16.mxu0 %v5969_v0  ;;  %495 = vst [vmem:[#allocation2 + $0x158] sm:$0xff] %v6420_v32  ;;  %v2560_v15 = vsel %vm1222_vm0, %v2555_v56, %v2559_v57  ;;  %v656_v56 = vshrl.u32 %v6331_v39, 16  ;;  %v2593_v57 = vshll.u32 %v2464_v24, 16 }
  0x4e   : > { %5260 = vmatmul.mubr.bf16.gmra.mrb[20].mxu1 %v6355_v5  ;;  %v407_v46 = vmax.f32 %v375_v33, 0.0  ;;  %v1728_v33 = vrot.slane %v1726_v60, 7  ;;  %v2590_v60 = vrot.slane %v659_v23, 1  ;;  %v526_v5 = vld [vmem:[#allocation2 + $0x150] sm:$0x80] }
  0x4f   : > { %5484 = vmatmul.mubr.bf16.gmra.mrb[4].mxu0 %v2524_v13  ;;  %5263 = vmatprep.mubr.bf16.mxu1 %v6381_v34  ;;  %v644_v13 = vshrl.u32 %v6309_v16, 16 }
  0x50   : > { %5487 = vmatprep.mubr.bf16.mxu0 %v2536_v26  ;;  %5516 = vmatpush3.bf16.msra.mxu0 %v5969_v0  ;;  %v6435_v59 = vpack.c.bf16 %v408_v47, %v407_v46  ;;  %v538_v0 = vrot.slane %v6031_v2, 7  ;;  %v2581_v2 = vshll.u32 %v2462_v61, 16  ;;  %v2567_v26 = vor.u32 %v2566_v6, %v1810_v1  ;;  %v4991_v6 = vld [vmem:[%s6150_s20 + $0x78] sm:$0xff]  }
  0x51   : > { %5517 = vmatprep.subr.bf16.mxu0 %v5971_v31  ;;  %v2579_v38 = vor.u32 %v2578_v18, %v644_v13  ;;  %v1740_v46 = vrot.slane %v1738_v29, 7  ;;  %v544_v47 = vshrl.u32 %v500_v20, 16  ;;  %v2602_v29 = vrot.slane %v671_v36, 1  ;;  %v5979_v18 = vld [vmem:[%s7128_s3 + $0x1b8] sm:$0xff]  }
  0x52   : > { %496 = vst [vmem:[#allocation2 + $0x170] sm:$0xff] %v6435_v59  ;;  %v2583_v41 = vrot.slane %v2581_v2, 1  ;;  %v2572_v61 = vsel %vm1222_vm0, %v2567_v26, %v2571_v27  ;;  %v6480_v2 = vor.u32 %v1729_v50, %v1728_v33  ;;  %v2591_v24 = vor.u32 %v2590_v60, %v656_v56  ;;  %v2470_v60 = vld [vmem:[#allocation2 + $0x148] sm:$0x1] }
  0x53   : > { %v546_v20 = vrot.slane %v544_v47, 7  ;;  %v2595_v26 = vrot.slane %v2593_v57, 1  ;;  %v4895_v50 = vunpack.c.l.bf16 %v4991_v6  ;;  %v2603_v33 = vor.u32 %v2602_v29, %v668_v8 }
  0x54   : > { %5518 = vmatpush3.bf16.msra.mxu0 %v5971_v31  ;;  %v502_v31 = vld [vmem:[#allocation2 + $0x30] sm:$0x80]  ;;  %v2584_v9 = vsel %vm1222_vm0, %v2579_v38, %v2583_v41  ;;  %v506_v41 = vld [vmem:[#allocation2 + $0x60] sm:$0x80]  ;;  %v680_v47 = vshrl.u32 %v6381_v34, 16 }
  0x55   : > { %5519 = vmatprep.subr.bf16.mxu0 %v5973_v58 }
  0x56   : > { %5264 = vmatmul.mubr.bf16.gmra.mrb[24].mxu1 %v6398_v62 }
  0x57   : > { %5488 = vmatmul.mubr.bf16.gmra.mrb[8].mxu0 %v2548_v3  ;;  %5267 = vmatprep.mubr.bf16.mxu1 %v6420_v32  ;;  %v542_v3 = vsel %vm530_vm1, %v534_v28, %v538_v0  ;;  %v6484_v0 = vor.u32 %v1741_v11, %v1740_v46  ;;  %v683_v11 = vshll.u32 %v6381_v34, 16  ;;  %v2468_v28 = vld [vmem:[#allocation2 + $0x130] sm:$0x1]  ;;  %v338_v46 = vmul.f32 %v4895_v50, %v6162_v14 }
  0x58   : > { %5491 = vmatprep.mubr.bf16.mxu0 %v2560_v15  ;;  %5520 = vmatpush3.bf16.msra.mxu0 %v5973_v58  ;;  %v556_v58 = vshrl.u32 %v502_v31, 16  ;;  %v2605_v15 = vshll.u32 %v2466_v48, 16  ;;  %v695_v31 = vshll.u32 %v6398_v62, 16  ;;  %v554_v48 = vsel %vm530_vm1, %v546_v20, %v6480_v2 }
  0x59   : > { %5521 = vmatprep.subr.bf16.mxu0 %v5975_v19  ;;  %v2617_v29 = vshll.u32 %v2468_v28, 16 }
  0x5a   : > { %v558_v27 = vrot.slane %v556_v58, 7  ;;  %v2607_v38 = vrot.slane %v2605_v15, 1  ;;  %v2596_v58 = vsel %vm1222_vm0, %v2591_v24, %v2595_v26  ;;  %v580_v15 = vshrl.u32 %v506_v41, 16 }
  0x5b   : > { %v2626_v24 = vrot.slane %v695_v31, 1  ;;  %v2629_v26 = vshll.u32 %v2470_v60, 16  ;;  %v1788_v60 = vrot.slane %v1786_v10, 7 }
  0x5c   : > { %5522 = vmatpush3.bf16.msra.mxu0 %v5975_v19  ;;  %v1752_v19 = vrot.slane %v1750_v30, 7  ;;  %v4896_v30 = vunpack.c.h.bf16 %v4991_v6  ;;  %v377_v6 = vadd.f32 %v6167_v17, %v338_v46  ;;  %v2608_v20 = vsel %vm1222_vm0, %v2603_v33, %v2607_v38  ;;  %v508_v33 = vld [vmem:[#allocation2 + $0x78] sm:$0x80]  ;;  %v5976_v38 = vld [vmem:[%s7128_s3 + $0x90] sm:$0xff]  }
  0x5d   : > { %5523 = vmatprep.subr.bf16.mxu0 %v5977_v42  ;;  %v582_v4 = vrot.slane %v580_v15, 7  ;;  %v2631_v41 = vrot.slane %v2629_v26, 1  ;;  %v510_v46 = vld [vmem:[#allocation2 + $0x90] sm:$0x80]  ;;  %v716_v15 = vshrl.u32 %v6435_v59, 16 }
  0x5e   : > { %5268 = vmatmul.mubr.bf16.gmra.mrb[28].mxu1 %v6435_v59  ;;  %v339_v57 = vmul.f32 %v4896_v30, %v6162_v14  ;;  %v5974_v14 = vld [vmem:[%s7128_s3 + $0x88] sm:$0xff]   ;;  %v6524_v28 = vor.u32 %v1753_v12, %v1752_v19  ;;  %v2619_v12 = vrot.slane %v2617_v29, 1  ;;  %v604_v29 = vshrl.u32 %v510_v46, 16 }
  0x5f   : > { %5492 = vmatmul.mubr.bf16.gmra.mrb[12].mxu0 %v2572_v61  ;;  %5287 = vmatprep.mubr.bf16.mxu1 %v542_v3  ;;  %v566_v61 = vsel %vm530_vm1, %v558_v27, %v6484_v0  ;;  %v568_v3 = vshrl.u32 %v504_v45, 16  ;;  %v409_v27 = vmax.f32 %v377_v6, 0.0  ;;  %v512_v26 = vld [vmem:[#allocation2 + $0xa8] sm:$0x80]  ;;  %v1800_v46 = vrot.slane %v1798_v25, 7 }
  0x60   : > { %5495 = vmatprep.mubr.bf16.mxu0 %v2584_v9  ;;  %5524 = vmatpush3.bf16.msra.mxu0 %v5977_v42  ;;  %v692_v42 = vshrl.u32 %v6398_v62, 16  ;;  %v2614_v9 = vrot.slane %v683_v11, 1  ;;  %v378_v50 = vadd.f32 %v6167_v17, %v339_v57  ;;  %v6528_v17 = vor.u32 %v1765_v52, %v1764_v53  ;;  %v2472_v52 = vld [vmem:[#allocation2 + $0x160] sm:$0x1]  ;;  %v2474_v57 = vld [vmem:[#allocation2 + $0x178] sm:$0x1] }
  0x61   : > { %5525 = vmatprep.subr.bf16.mxu0 %v5979_v18  ;;  %v570_v30 = vrot.slane %v568_v3, 7  ;;  %v719_v53 = vshll.u32 %v6435_v59, 16  ;;  %v592_v3 = vshrl.u32 %v508_v33, 16  ;;  %v2641_v10 = vshll.u32 %v2472_v52, 16 }
  0x62   : > { %v410_v45 = vmax.f32 %v378_v50, 0.0  ;;  %v2615_v63 = vor.u32 %v2614_v9, %v680_v47  ;;  %v6570_v33 = vor.u32 %v1789_v40, %v1788_v60  ;;  %v5980_v40 = vld [vmem:[%s7128_s3 + $0xa0] sm:$0xff]  }
  0x63   : > { %v2643_v52 = vrot.slane %v2641_v10, 1 }
  0x64   : > { %5526 = vmatpush3.bf16.msra.mxu0 %v5979_v18  ;;  %v707_v18 = vshll.u32 %v6420_v32, 16  ;;  %v6537_v19 = vpack.c.bf16 %v410_v45, %v409_v27  ;;  %v2620_v9 = vsel %vm1222_vm0, %v2615_v63, %v2619_v12  ;;  %v2476_v27 = vld [vmem:[#allocation2 + $0x190] sm:$0x1]  ;;  %v6562_v45 = vld [vmem:[#allocation2 + $0x38] sm:$0xff]  ;;  %v594_v63 = vrot.slane %v592_v3, 7 }
  0x65   : > { %5559 = vmatprep.subr.bf16.mxu0 %v6501_v44  ;;  %v514_v12 = vld [vmem:[#allocation2 + $0xc0] sm:$0x80]  ;;  %v2981_v35 = vshrl.u32 %v6562_v45, 16 }
  0x66   : > { %5288 = vmatmul.mubr.bf16.vlgmr.msra.gmra.mrb[0].mxu1 %v554_v48  ;;  %v1776_v48 = vrot.slane %v1774_v7, 7  ;;  %497 = vst [vmem:[#allocation2 + $0x188] sm:$0xff] %v6537_v19  ;;  %v2638_v6 = vrot.slane %v707_v18, 1  ;;  %v590_v7 = vsel %vm530_vm1, %v582_v4, %v6528_v17  ;;  %v628_v3 = vshrl.u32 %v514_v12, 16 }
  0x67   : > { %5496 = vmatmul.mubr.bf16.gmra.mrb[16].mxu0 %v2596_v58  ;;  %5320 = vmatpush3.bf16.msra.mxu1 %v6370_v22  ;;  %v2627_v22 = vor.u32 %v2626_v24, %v692_v42  ;;  %v704_v58 = vshrl.u32 %v6420_v32, 16  ;;  %v5978_v24 = vld [vmem:[%s7128_s3 + $0x98] sm:$0xff]   ;;  %v2658_v10 = vshrl.u32 %v6537_v19, 16 }
  0x68   : > { %5291 = vmatprep.mubr.bf16.mxu1 %v566_v61  ;;  %5499 = vmatprep.mubr.bf16.mxu0 %v2608_v20  ;;  %v578_v61 = vsel %vm530_vm1, %v570_v30, %v6524_v28  ;;  %v2650_v20 = vrot.slane %v719_v53, 1  ;;  %v6566_v30 = vor.u32 %v1777_v54, %v1776_v48  ;;  %v2944_v48 = vld [vmem:[#allocation2 + $0x30] sm:$0x80] }
  0x69   : > { %5321 = vmatprep.subr.bf16.mxu1 %v5974_v14  ;;  %v2632_v50 = vsel %vm1222_vm0, %v2627_v22, %v2631_v41  ;;  %v2639_v4 = vor.u32 %v2638_v6, %v704_v58  ;;  %v606_v22 = vrot.slane %v604_v29, 7  ;;  %v7131_v41 = vshll.u32 %v6537_v19, 16  ;;  %v6587_v6 = vld [vmem:[#allocation2 + $0x50] sm:$0xff] }
  0x6a   : > { %v2651_v21 = vor.u32 %v2650_v20, %v716_v15  ;;  %v602_v60 = vsel %vm530_vm1, %v594_v63, %v6566_v30  ;;  %v2977_v29 = vshrl.u32 %v2944_v48, 16  ;;  %v2984_v20 = vshll.u32 %v6562_v45, 16  ;;  %v6602_v63 = vld [vmem:[#allocation2 + $0x68] sm:$0xff] }
  0x6b   : > { %5322 = vmatpush3.bf16.msra.mxu1 %v5974_v14  ;;  %v2653_v14 = vshll.u32 %v2474_v57, 16  ;;  %v616_v57 = vshrl.u32 %v512_v26, 16  ;;  %v2662_v25 = vrot.slane %v7131_v41, 1  ;;  %v516_v26 = vld [vmem:[#allocation2 + $0xd8] sm:$0x80]  ;;  %v2993_v48 = vshrl.u32 %v6587_v6, 16 }
  0x6c   : > { %5323 = vmatprep.subr.bf16.mxu1 %v5976_v38  ;;  %v2979_v55 = vrot.slane %v2977_v29, 7  ;;  %v6676_v41 = vld [vmem:[#allocation2 + $0xb0] sm:$0xff] }
  0x6d   : > { %v2655_v54 = vrot.slane %v2653_v14, 1  ;;  %v5982_v14 = vld [vmem:[%s7128_s3 + $0xa8] sm:$0xff]  }
  0x6e   : > { %5292 = vmatmul.mubr.bf16.gmra.mrb[4].mxu1 %v578_v61  ;;  %v2665_v61 = vshll.u32 %v2476_v27, 16  ;;  %v2946_v27 = vld [vmem:[#allocation2 + $0x48] sm:$0x80] }
  0x6f   : > { %5500 = vmatmul.mubr.bf16.gmra.mrb[20].mxu0 %v2620_v9  ;;  %5295 = vmatprep.mubr.bf16.mxu1 %v590_v7  ;;  %v2644_v9 = vsel %vm1222_vm0, %v2639_v4, %v2643_v52  ;;  %v614_v7 = vsel %vm530_vm1, %v606_v22, %v6570_v33  ;;  %v618_v4 = vrot.slane %v616_v57, 7  ;;  %v518_v52 = vld [vmem:[#allocation2 + $0xf0] sm:$0x80]  ;;  %v2663_v22 = vor.u32 %v2662_v25, %v2658_v10 }
  0x70   : > { %5503 = vmatprep.mubr.bf16.mxu0 %v2632_v50  ;;  %5324 = vmatpush3.bf16.msra.mxu1 %v5976_v38  ;;  %v1812_v38 = vrot.slane %v1810_v1, 7  ;;  %v2656_v1 = vsel %vm1222_vm0, %v2651_v21, %v2655_v54  ;;  %v2983_v50 = vrot.slane %v2981_v35, 7  ;;  %v2667_v21 = vrot.slane %v2665_v61, 1 }
  0x71   : > { %5325 = vmatprep.subr.bf16.mxu1 %v5978_v24  ;;  %v630_v54 = vrot.slane %v628_v3, 7  ;;  %v658_v57 = vrot.slane %v656_v56, 7  ;;  %v2989_v61 = vshrl.u32 %v2946_v27, 16  ;;  %v2996_v3 = vshll.u32 %v6587_v6, 16  ;;  %v5986_v27 = vld [vmem:[%s7128_s3 + $0xb8] sm:$0xff]  }
  0x72   : > { %v6610_v12 = vor.u32 %v1813_v37, %v1812_v38  ;;  %v3005_v37 = vshrl.u32 %v6602_v63, 16  ;;  %v640_v38 = vshrl.u32 %v516_v26, 16  ;;  %v3008_v26 = vshll.u32 %v6602_v63, 16 }
  0x74   : > { %5326 = vmatpush3.bf16.msra.mxu1 %v5978_v24  ;;  %v6606_v24 = vor.u32 %v1801_v51, %v1800_v46  ;;  %v2986_v51 = vor.u32 %v2984_v20, %v2983_v50  ;;  %v646_v46 = vrot.slane %v644_v13, 7  ;;  %v638_v25 = vsel %vm530_vm1, %v630_v54, %v6610_v12 }
  0x75   : > { %5327 = vmatprep.subr.bf16.mxu1 %v5980_v40  ;;  %v2995_v13 = vrot.slane %v2993_v48, 7  ;;  %v3007_v50 = vrot.slane %v3005_v37, 7 }
  0x76   : > { %5296 = vmatmul.mubr.bf16.gmra.mrb[8].mxu1 %v602_v60  ;;  %v2948_v60 = vld [vmem:[#allocation2 + $0x60] sm:$0x80]  ;;  %v2987_v56 = vsel %vm530_vm1, %v2979_v55, %v2986_v51  ;;  %v661_v55 = vor.u32 %v659_v23, %v658_v57  ;;  %v2991_v51 = vrot.slane %v2989_v61, 7  ;;  %v670_v23 = vrot.slane %v668_v8, 7  ;;  %v2952_v61 = vld [vmem:[#allocation2 + $0x90] sm:$0x80] }
  0x77   : > { %5504 = vmatmul.mubr.bf16.gmra.mrb[24].mxu0 %v2644_v9  ;;  %5299 = vmatprep.mubr.bf16.mxu1 %v614_v7  ;;  %v6628_v9 = vld [vmem:[#allocation2 + $0x80] sm:$0xff]  ;;  %v2668_v7 = vsel %vm1222_vm0, %v2663_v22, %v2667_v21  ;;  %v3001_v29 = vshrl.u32 %v2948_v60, 16  ;;  %v642_v22 = vrot.slane %v640_v38, 7  ;;  %v2950_v21 = vld [vmem:[#allocation2 + $0x78] sm:$0x80]  ;;  %v2998_v60 = vor.u32 %v2996_v3, %v2995_v13  ;;  %v5983_v8 = vld [vmem:[%s7128_s3 + $0x1c8] sm:$0xff]  }
  0x78   : > { %5507 = vmatprep.mubr.bf16.mxu0 %v2656_v1  ;;  %5328 = vmatpush3.bf16.msra.mxu1 %v5980_v40  ;;  %v626_v40 = vsel %vm530_vm1, %v618_v4, %v6606_v24  ;;  %v652_v1 = vshrl.u32 %v518_v52, 16  ;;  %v649_v4 = vor.u32 %v647_v49, %v646_v46  ;;  %v6644_v52 = vld [vmem:[#allocation2 + $0x98] sm:$0xff]  ;;  %v3017_v54 = vshrl.u32 %v6628_v9, 16  ;;  %v522_v49 = vld [vmem:[#allocation2 + $0x120] sm:$0x80] }
  0x79   : > { %5329 = vmatprep.subr.bf16.mxu1 %v5982_v14  ;;  %v6654_v46 = vld [vmem:[%s7128_s3 + $0xc0] sm:$0xff]   ;;  %v3003_v38 = vrot.slane %v3001_v29, 7  ;;  %v3029_v39 = vshrl.u32 %v6644_v52, 16  ;;  %v3020_v13 = vshll.u32 %v6628_v9, 16 }
  0x7a   : > { %v654_v16 = vrot.slane %v652_v1, 7  ;;  %v650_v57 = vsel %vm530_vm1, %v642_v22, %v649_v4  ;;  %v682_v1 = vrot.slane %v680_v47, 7  ;;  %v3025_v22 = vshrl.u32 %v2952_v61, 16  ;;  %v524_v47 = vld [vmem:[#allocation2 + $0x138] sm:$0x80]  ;;  %v5985_v61 = vld [vmem:[%s7128_s3 + $0x1d0] sm:$0xff]  }
  0x7c   : > { %5330 = vmatpush3.bf16.msra.mxu1 %v5982_v14  ;;  %v520_v14 = vld [vmem:[#allocation2 + $0x108] sm:$0x80]  ;;  %v662_v29 = vsel %vm530_vm1, %v654_v16, %v661_v55 }
  0x7d   : > { %5331 = vmatprep.subr.bf16.mxu1 %v5984_v43  ;;  %v6679_v55 = vld [vmem:[#allocation2 + $0xc8] sm:$0xff] }
  0x7e   : > { %5300 = vmatmul.mubr.bf16.gmra.mrb[12].mxu1 %v626_v40  ;;  %v3010_v40 = vor.u32 %v3008_v26, %v3007_v50  ;;  %v676_v50 = vshrl.u32 %v522_v49, 16  ;;  %v2954_v49 = vld [vmem:[#allocation2 + $0xa8] sm:$0x80]  ;;  %v7132_v34 = vshrl.u32 %v6679_v55, 16 }
  0x7f   : > { %5508 = vmatmul.mubr.bf16.gmra.mrb[28].mxu0 %v2668_v7  ;;  %5303 = vmatprep.mubr.bf16.mxu1 %v638_v25  ;;  %v664_v7 = vshrl.u32 %v520_v14, 16  ;;  %v3019_v25 = vrot.slane %v3017_v54, 7  ;;  %v3031_v14 = vrot.slane %v3029_v39, 7 }
  0x80   : > { %5527 = vmatprep.mubr.bf16.mxu0 %v2987_v56  ;;  %5332 = vmatpush3.bf16.msra.mxu1 %v5984_v43  ;;  %v3013_v43 = vshrl.u32 %v2950_v21, 16  ;;  %v2999_v56 = vsel %vm530_vm1, %v2991_v51, %v2998_v60  ;;  %v3011_v4 = vsel %vm530_vm1, %v3003_v38, %v3010_v40  ;;  %v3032_v21 = vshll.u32 %v6644_v52, 16 }
  0x81   : > { %5333 = vmatprep.subr.bf16.mxu1 %v5986_v27  ;;  %v673_v51 = vor.u32 %v671_v36, %v670_v23  ;;  %v3022_v16 = vor.u32 %v3020_v13, %v3019_v25  ;;  %v6687_v38 = vor.u32 %v683_v11, %v682_v1  ;;  %v678_v40 = vrot.slane %v676_v50, 7 }
  0x82   : > { %v3015_v60 = vrot.slane %v3013_v43, 7  ;;  %v3027_v36 = vrot.slane %v3025_v22, 7  ;;  %v3034_v23 = vor.u32 %v3032_v21, %v3031_v14  ;;  %v694_v11 = vrot.slane %v692_v42, 7  ;;  %v6708_v42 = vld [vmem:[#allocation2 + $0xe0] sm:$0xff] }
  0x83   : > { %v706_v43 = vrot.slane %v704_v58, 7  ;;  %v3037_v50 = vshrl.u32 %v2954_v49, 16  ;;  %v3044_v22 = vshll.u32 %v6676_v41, 16 }
  0x84   : > { %5334 = vmatpush3.bf16.msra.mxu1 %v5986_v27  ;;  %v666_v27 = vrot.slane %v664_v7, 7  ;;  %v2956_v7 = vld [vmem:[#allocation2 + $0xc0] sm:$0x80]  ;;  %v3023_v1 = vsel %vm530_vm1, %v3015_v60, %v3022_v16  ;;  %v3035_v14 = vsel %vm530_vm1, %v3027_v36, %v3034_v23  ;;  %v6721_v16 = vld [vmem:[#allocation2 + $0xf8] sm:$0xff]  ;;  %v7135_v36 = vshrl.u32 %v6708_v42, 16 }
  0x85   : > { %5367 = vmatprep.subr.bf16.mxu1 %v6654_v46  ;;  %v3049_v58 = vshrl.u32 %v2956_v7, 16  ;;  %v6725_v49 = vor.u32 %v707_v18, %v706_v43  ;;  %v3039_v23 = vrot.slane %v3037_v50, 7  ;;  %v6730_v7 = vld [vmem:[#allocation2 + $0x8] sm:$0xff]  ;;  %v7136_v43 = vshrl.u32 %v6721_v16, 16 }
  0x86   : > { %5304 = vmatmul.mubr.bf16.gmra.mrb[16].mxu1 %v650_v57  ;;  %v7133_v57 = vshrl.u32 %v6676_v41, 16  ;;  %v674_v25 = vsel %vm530_vm1, %v666_v27, %v673_v51  ;;  %v5987_v51 = vld [vmem:[%s7128_s3 + $0x1d8] sm:$0xff]   ;;  %v6719_v27 = vor.u32 %v695_v31, %v694_v11  ;;  %v7137_v11 = vshll.u32 %v6730_v7, 16 }
  0x87   : > { %5528 = vmatmul.mubr.bf16.vlgmr.msra.gmra.mrb[0].mxu0 %v2999_v56  ;;  %5307 = vmatprep.mubr.bf16.mxu1 %v662_v29  ;;  %v700_v56 = vshrl.u32 %v526_v5, 16  ;;  %v686_v29 = vsel %vm530_vm1, %v678_v40, %v6687_v38  ;;  %v528_v5 = vld [vmem:[#allocation2 + $0x168] sm:$0x80]  ;;  %v2958_v31 = vld [vmem:[#allocation2 + $0xd8] sm:$0x80]  ;;  %v3051_v32 = vrot.slane %v3049_v58, 7 }
  0x88   : > { %5560 = vmatpush3.bf16.msra.mxu0 %v6501_v44  ;;  %5531 = vmatprep.mubr.bf16.mxu0 %v3011_v4  ;;  %v688_v44 = vshrl.u32 %v524_v47, 16  ;;  %v3043_v4 = vrot.slane %v7133_v57, 7  ;;  %v3055_v47 = vrot.slane %v7132_v34, 7  ;;  %v7139_v58 = vshll.u32 %v6708_v42, 16 }
  0x89   : > { %5561 = vmatprep.subr.bf16.mxu0 %v5983_v8  ;;  %v702_v40 = vrot.slane %v700_v56, 7  ;;  %v712_v56 = vshrl.u32 %v528_v5, 16  ;;  %v7140_v34 = vshrl.u32 %v6730_v7, 16  ;;  %v1192_v5 = vld [vmem:[#allocation2 + $0x20] sm:$0xff] }
  0x8a   : > { %v690_v60 = vrot.slane %v688_v44, 7  ;;  %v3046_v62 = vor.u32 %v3044_v22, %v3043_v4  ;;  %v1191_v44 = vld [vmem:[#allocation2 + $0x10] sm:$0x1]  ;;  %v3061_v4 = vshrl.u32 %v2958_v31, 16  ;;  %v7138_v31 = vshll.u32 %v6721_v16, 16 }
  0x8b   : > { %v710_v50 = vsel %vm530_vm1, %v702_v40, %v6725_v49  ;;  %v3079_v40 = vrot.slane %v7136_v43, 7 }
  0x8c   : > { %5562 = vmatpush3.bf16.msra.mxu0 %v5983_v8  ;;  %v7134_v8 = vshll.u32 %v6679_v55, 16 }
  0x8d   : > { %5563 = vmatprep.subr.bf16.mxu0 %v5985_v61 }
  0x8e   : > { %5308 = vmatmul.mubr.bf16.gmra.mrb[20].mxu1 %v674_v25  ;;  %v3058_v18 = vor.u32 %v7134_v8, %v3055_v47  ;;  %v5989_v25 = vld [vmem:[%s7128_s3 + $0x1e0] sm:$0xff]   ;;  %v3047_v47 = vsel %vm530_vm1, %v3039_v23, %v3046_v62  ;;  %v714_v62 = vrot.slane %v712_v56, 7  ;;  %v5993_v56 = vld [vmem:[%s7128_s3 + $0x1f0] sm:$0xff]  }
  0x8f   : > { %5532 = vmatmul.mubr.bf16.gmra.mrb[4].mxu0 %v3023_v1  ;;  %5311 = vmatprep.mubr.bf16.mxu1 %v686_v29  ;;  %v698_v1 = vsel %vm530_vm1, %v690_v60, %v6719_v27  ;;  %v2960_v29 = vld [vmem:[#allocation2 + $0xf0] sm:$0x80]  ;;  %v1231_v60 = vshll.u32 %v1191_v44, 16  ;;  %v1238_v44 = vshll.u32 %v1192_v5, 16 }
  0x90   : > { %5535 = vmatprep.mubr.bf16.mxu0 %v3035_v14  ;;  %5564 = vmatpush3.bf16.msra.mxu0 %v5985_v61  ;;  %v718_v61 = vrot.slane %v716_v15, 7  ;;  %v3067_v14 = vrot.slane %v7135_v36, 7  ;;  %v1228_v15 = vrot.slane %v7137_v11, 1  ;;  %v3059_v57 = vsel %vm530_vm1, %v3051_v32, %v3058_v18  ;;  %v6756_v36 = vld [vmem:[#allocation2 + $0x110] sm:$0xff]  ;;  %v1193_v11 = vld [vmem:[#allocation2 + $0x28] sm:$0x1] }
  0x91   : > { %5565 = vmatprep.subr.bf16.mxu0 %v5987_v51  ;;  %v3073_v8 = vshrl.u32 %v2960_v29, 16  ;;  %v3063_v32 = vrot.slane %v3061_v4, 7  ;;  %v1233_v43 = vrot.slane %v1231_v60, 1  ;;  %v3089_v59 = vshrl.u32 %v6756_v36, 16  ;;  %v2964_v4 = vld [vmem:[#allocation2 + $0x120] sm:$0x80] }
  0x92   : > { %v6763_v23 = vor.u32 %v719_v53, %v718_v61  ;;  %v6767_v18 = vor.u32 %v7139_v58, %v3067_v14  ;;  %v1229_v29 = vor.u32 %v1228_v15, %v7140_v34  ;;  %v6774_v61 = vor.u32 %v7138_v31, %v3079_v40 }
  0x93   : > { %v3075_v53 = vrot.slane %v3073_v8, 7  ;;  %v1240_v8 = vrot.slane %v1238_v44, 1  ;;  %v3091_v40 = vrot.slane %v3089_v59, 7  ;;  %v3092_v31 = vshll.u32 %v6756_v36, 16 }
  0x94   : > { %5566 = vmatpush3.bf16.msra.mxu0 %v5987_v51  ;;  %v5991_v51 = vld [vmem:[%s7128_s3 + $0x1e8] sm:$0xff]   ;;  %v3071_v14 = vsel %vm530_vm1, %v3063_v32, %v6767_v18  ;;  %v1234_v15 = vsel %vm1222_vm0, %v1229_v29, %v1233_v43  ;;  %v1252_v58 = vrot.slane %v2984_v20, 1  ;;  %v3097_v32 = vshrl.u32 %v2964_v4, 16  ;;  %v1197_v29 = vld [vmem:[#allocation2 + $0x58] sm:$0x1] }
  0x95   : > { %5567 = vmatprep.subr.bf16.mxu0 %v5989_v25  ;;  %v6796_v44 = vor.u32 %v3092_v31, %v3091_v40  ;;  %v2966_v20 = vld [vmem:[#allocation2 + $0x138] sm:$0x80]  ;;  %v1199_v4 = vld [vmem:[#allocation2 + $0x70] sm:$0x1]  ;;  %v5990_v40 = vld [vmem:[%s7128_s3 + $0xc8] sm:$0xff]  }
  0x96   : > { %5312 = vmatmul.mubr.bf16.gmra.mrb[24].mxu1 %v698_v1  ;;  %v2962_v1 = vld [vmem:[#allocation2 + $0x108] sm:$0x80] }
  0x97   : > { %5536 = vmatmul.mubr.bf16.gmra.mrb[8].mxu0 %v3047_v47  ;;  %5315 = vmatprep.mubr.bf16.mxu1 %v710_v50  ;;  %v1195_v50 = vld [vmem:[#allocation2 + $0x40] sm:$0x1]  ;;  %v1243_v47 = vshll.u32 %v1193_v11, 16  ;;  %v3085_v60 = vshrl.u32 %v2962_v1, 16  ;;  %v5995_v11 = vld [vmem:[%s7128_s3 + $0x1f8] sm:$0xff]  }
  0x98   : > { %5539 = vmatprep.mubr.bf16.mxu0 %v3059_v57  ;;  %5568 = vmatpush3.bf16.msra.mxu0 %v5989_v25  ;;  %v722_v57 = vsel %vm530_vm1, %v714_v62, %v6763_v23  ;;  %v1236_v25 = vshrl.u32 %v1192_v5, 16  ;;  %v3083_v62 = vsel %vm530_vm1, %v3075_v53, %v6774_v61  ;;  %v1255_v34 = vshll.u32 %v1195_v50, 16 }
  0x99   : > { %5569 = vmatprep.subr.bf16.mxu0 %v5991_v51  ;;  %v1245_v5 = vrot.slane %v1243_v47, 1  ;;  %v1253_v53 = vor.u32 %v2981_v35, %v1252_v58  ;;  %v3099_v50 = vrot.slane %v3097_v32, 7  ;;  %v1267_v47 = vshll.u32 %v1197_v29, 16  ;;  %v1201_v32 = vld [vmem:[#allocation2 + $0x88] sm:$0x1] }
  0x9a   : > { %v1241_v43 = vor.u32 %v1240_v8, %v1236_v25  ;;  %v1257_v1 = vrot.slane %v1255_v34, 1  ;;  %v1264_v8 = vrot.slane %v2996_v3, 1  ;;  %v3109_v35 = vshrl.u32 %v2966_v20, 16  ;;  %v1203_v29 = vld [vmem:[#allocation2 + $0xa0] sm:$0x1] }
  0x9b   : > { %v1276_v34 = vrot.slane %v3008_v26, 1  ;;  %v1279_v58 = vshll.u32 %v1199_v4, 16  ;;  %v1291_v20 = vshll.u32 %v1201_v32, 16  ;;  %v1300_v4 = vrot.slane %v3032_v21, 1 }
  0x9c   : > { %5570 = vmatpush3.bf16.msra.mxu0 %v5991_v51  ;;  %v3087_v51 = vrot.slane %v3085_v60, 7  ;;  %v1246_v25 = vsel %vm1222_vm0, %v1241_v43, %v1245_v5  ;;  %v3107_v60 = vsel %vm530_vm1, %v3099_v50, %v6687_v38  ;;  %v1265_v26 = vor.u32 %v2993_v48, %v1264_v8  ;;  %v5992_v38 = vld [vmem:[%s7128_s3 + $0xd0] sm:$0xff]  }
  0x9d   : > { %5571 = vmatprep.subr.bf16.mxu0 %v5993_v56  ;;  %v1277_v43 = vor.u32 %v3005_v37, %v1276_v34  ;;  %v1281_v5 = vrot.slane %v1279_v58, 1  ;;  %v1288_v48 = vrot.slane %v3020_v13, 1  ;;  %v1301_v34 = vor.u32 %v3029_v39, %v1300_v4  ;;  %v1205_v58 = vld [vmem:[#allocation2 + $0xb8] sm:$0x1] }
  0x9e   : > { %5316 = vmatmul.mubr.bf16.gmra.mrb[28].mxu1 %v722_v57  ;;  %v6803_v57 = vld [vmem:[%s7128_s3 + $0x200] sm:$0xff]   ;;  %v1312_v32 = vrot.slane %v3044_v22, 1  ;;  %v7144_v22 = vshrl.u32 %v6676_v41, 16  ;;  %v7146_v4 = vshrl.u32 %v6679_v55, 16 }
  0x9f   : > { %5540 = vmatmul.mubr.bf16.gmra.mrb[12].mxu0 %v3071_v14  ;;  %5335 = vmatprep.mubr.bf16.mxu1 %v1234_v15  ;;  %v2968_v14 = vld [vmem:[#allocation2 + $0x150] sm:$0x80]  ;;  %v1258_v15 = vsel %vm1222_vm0, %v1253_v53, %v1257_v1  ;;  %v2972_v53 = vld [vmem:[#allocation2 + $0x180] sm:$0x80]  ;;  %v1289_v21 = vor.u32 %v3017_v54, %v1288_v48 }
  0xa0   : > { %5543 = vmatprep.mubr.bf16.mxu0 %v3083_v62  ;;  %5572 = vmatpush3.bf16.msra.mxu0 %v5993_v56  ;;  %v3095_v56 = vsel %vm530_vm1, %v3087_v51, %v6796_v44  ;;  %v3121_v3 = vshrl.u32 %v2968_v14, 16  ;;  %v1269_v62 = vrot.slane %v1267_v47, 1  ;;  %v2970_v51 = vld [vmem:[#allocation2 + $0x168] sm:$0x80]  ;;  %v1303_v14 = vshll.u32 %v1203_v29, 16  ;;  %v5996_v54 = vld [vmem:[%s7128_s3 + $0xe0] sm:$0xff]  }
  0xa1   : > { %5573 = vmatprep.subr.bf16.mxu0 %v5995_v11  ;;  %v3133_v50 = vshrl.u32 %v2970_v51, 16  ;;  %v3145_v13 = vshrl.u32 %v2972_v53, 16  ;;  %v3151_v47 = vrot.slane %v2658_v10, 7  ;;  %v1313_v48 = vor.u32 %v7144_v22, %v1312_v32  ;;  %v1213_v32 = vld [vmem:[#allocation2 + $0x118] sm:$0x1]  ;;  %v5999_v22 = vld [vmem:[%s7128_s3 + $0x208] sm:$0xff]  }
  0xa2   : > { %v1270_v1 = vsel %vm1222_vm0, %v1265_v26, %v1269_v62 }
  0xa3   : > { %v3147_v10 = vrot.slane %v3145_v13, 7  ;;  %v6000_v13 = vld [vmem:[%s7128_s3 + $0xf0] sm:$0xff]  }
  0xa4   : > { %5574 = vmatpush3.bf16.msra.mxu0 %v5995_v11  ;;  %v3111_v11 = vrot.slane %v3109_v35, 7  ;;  %v1293_v35 = vrot.slane %v1291_v20, 1 }
  0xa5   : > { %5607 = vmatprep.subr.bf16.mxu0 %v6803_v57 }
  0xa6   : > { %5336 = vmatmul.mubr.bf16.vlgmr.msra.gmra.mrb[0].mxu1 %v1246_v25  ;;  %v3119_v37 = vsel %vm530_vm1, %v3111_v11, %v6719_v27  ;;  %v1282_v25 = vsel %vm1222_vm0, %v1277_v43, %v1281_v5  ;;  %v3135_v27 = vrot.slane %v3133_v50, 7  ;;  %v1294_v26 = vsel %vm1222_vm0, %v1289_v21, %v1293_v35 }
  0xa7   : > { %5544 = vmatmul.mubr.bf16.gmra.mrb[16].mxu0 %v3095_v56  ;;  %5368 = vmatpush3.bf16.msra.mxu1 %v6654_v46  ;;  %v3123_v46 = vrot.slane %v3121_v3, 7  ;;  %v5994_v56 = vld [vmem:[%s7128_s3 + $0xd8] sm:$0xff]   ;;  %v1207_v3 = vld [vmem:[#allocation2 + $0xd0] sm:$0x1]  ;;  %v7142_v11 = vshrl.u32 %v6730_v7, 16  ;;  %v7143_v5 = vshll.u32 %v6679_v55, 16 }
  0xa8   : > { %5339 = vmatprep.mubr.bf16.mxu1 %v1258_v15  ;;  %5547 = vmatprep.mubr.bf16.mxu0 %v3107_v60  ;;  %v7141_v15 = vshll.u32 %v6537_v19, 16  ;;  %v3143_v39 = vsel %vm530_vm1, %v3135_v27, %v6763_v23  ;;  %v1327_v29 = vshll.u32 %v1207_v3, 16  ;;  %v5998_v23 = vld [vmem:[%s7128_s3 + $0xe8] sm:$0xff]  }
  0xa9   : > { %5369 = vmatprep.subr.bf16.mxu1 %v5990_v40  ;;  %v3131_v8 = vsel %vm530_vm1, %v3123_v46, %v6725_v49  ;;  %v1305_v49 = vrot.slane %v1303_v14, 1  ;;  %v3163_v43 = vrot.slane %v7142_v11, 7  ;;  %v1324_v51 = vrot.slane %v7143_v5, 1 }
  0xaa   : > { %v3154_v60 = vor.u32 %v3151_v47, %v7141_v15  ;;  %v6881_v15 = vld [vmem:[#allocation2 + $0x128] sm:$0xff]  ;;  %v1363_v5 = vshll.u32 %v1213_v32, 16 }
  0xab   : > { %5370 = vmatpush3.bf16.msra.mxu1 %v5990_v40  ;;  %v2974_v40 = vld [vmem:[#allocation2 + $0x198] sm:$0x80]  ;;  %v1306_v62 = vsel %vm1222_vm0, %v1301_v34, %v1305_v49  ;;  %v1325_v14 = vor.u32 %v7146_v4, %v1324_v51  ;;  %v7148_v49 = vshll.u32 %v6721_v16, 16 }
  0xac   : > { %5371 = vmatprep.subr.bf16.mxu1 %v5992_v38  ;;  %v3157_v19 = vshrl.u32 %v2974_v40, 16  ;;  %v3155_v46 = vsel %vm530_vm1, %v3147_v10, %v3154_v60  ;;  %v6002_v60 = vld [vmem:[%s7128_s3 + $0xf8] sm:$0xff]   ;;  %v7149_v40 = vshrl.u32 %v6708_v42, 16 }
  0xae   : > { %5340 = vmatmul.mubr.bf16.gmra.mrb[4].mxu1 %v1270_v1  ;;  %v3159_v53 = vrot.slane %v3157_v19, 7  ;;  %v7145_v1 = vshll.u32 %v6730_v7, 16  ;;  %v1215_v19 = vld [vmem:[#allocation2 + $0x130] sm:$0x1] }
  0xaf   : > { %5548 = vmatmul.mubr.bf16.gmra.mrb[20].mxu0 %v3119_v37  ;;  %5343 = vmatprep.mubr.bf16.mxu1 %v1282_v25  ;;  %v1329_v37 = vrot.slane %v1327_v29, 1  ;;  %v1209_v25 = vld [vmem:[#allocation2 + $0xe8] sm:$0x1] }
  0xb0   : > { %5551 = vmatprep.mubr.bf16.mxu0 %v3131_v8  ;;  %5372 = vmatpush3.bf16.msra.mxu1 %v5992_v38  ;;  %v1315_v38 = vshll.u32 %v1205_v58, 16  ;;  %v3166_v50 = vor.u32 %v3163_v43, %v7145_v1  ;;  %v1211_v8 = vld [vmem:[#allocation2 + $0x100] sm:$0x1]  ;;  %v1339_v35 = vshll.u32 %v1209_v25, 16  ;;  %v1348_v58 = vrot.slane %v7148_v49, 1 }
  0xb1   : > { %5373 = vmatprep.subr.bf16.mxu1 %v5994_v56  ;;  %v1330_v34 = vsel %vm1222_vm0, %v1325_v14, %v1329_v37  ;;  %v1351_v10 = vshll.u32 %v1211_v8, 16  ;;  %v1360_v43 = vrot.slane %v3092_v31, 1  ;;  %v6909_v31 = vld [vmem:[%s7128_s3 + $0x100] sm:$0xff]   ;;  %v1217_v14 = vld [vmem:[#allocation2 + $0x148] sm:$0x1] }
  0xb2   : > { %v1317_v20 = vrot.slane %v1315_v38, 1  ;;  %v3167_v27 = vsel %vm530_vm1, %v3159_v53, %v3166_v50  ;;  %v1370_v38 = vshll.u32 %v6881_v15, 16  ;;  %v1365_v53 = vrot.slane %v1363_v5, 1 }
  0xb3   : > { %v1387_v8 = vshll.u32 %v1217_v14, 16  ;;  %v1695_v14 = vld [vmem:[#allocation2 + $0x60] sm:$0x80] }
  0xb4   : > { %5374 = vmatpush3.bf16.msra.mxu1 %v5994_v56  ;;  %v1318_v47 = vsel %vm1222_vm0, %v1313_v48, %v1317_v20  ;;  %v7147_v56 = vshll.u32 %v6708_v42, 16  ;;  %v1372_v29 = vrot.slane %v1370_v38, 1  ;;  %v6904_v48 = vld [vmem:[#allocation2 + $0x158] sm:$0xff]  ;;  %v1361_v20 = vor.u32 %v3089_v59, %v1360_v43  ;;  %v1219_v59 = vld [vmem:[#allocation2 + $0x160] sm:$0x1] }
  0xb5   : > { %5375 = vmatprep.subr.bf16.mxu1 %v5996_v54  ;;  %v1394_v37 = vshll.u32 %v6904_v48, 16  ;;  %v1389_v49 = vrot.slane %v1387_v8, 1 }
  0xb6   : > { %5344 = vmatmul.mubr.bf16.gmra.mrb[8].mxu1 %v1294_v26  ;;  %v1336_v21 = vrot.slane %v7147_v56, 1  ;;  %v7150_v26 = vshrl.u32 %v6721_v16, 16  ;;  %v1366_v25 = vsel %vm1222_vm0, %v1361_v20, %v1365_v53 }
  0xb7   : > { %5552 = vmatmul.mubr.bf16.gmra.mrb[24].mxu0 %v3143_v39  ;;  %5347 = vmatprep.mubr.bf16.mxu1 %v1306_v62  ;;  %v1353_v62 = vrot.slane %v1351_v10, 1  ;;  %v1396_v56 = vrot.slane %v1394_v37, 1 }
  0xb8   : > { %5555 = vmatprep.mubr.bf16.mxu0 %v3155_v46  ;;  %5376 = vmatpush3.bf16.msra.mxu1 %v5996_v54  ;;  %v1337_v3 = vor.u32 %v7149_v40, %v1336_v21  ;;  %v1341_v54 = vrot.slane %v1339_v35, 1  ;;  %v1349_v39 = vor.u32 %v7150_v26, %v1348_v58  ;;  %v1375_v46 = vshll.u32 %v1215_v19, 16  ;;  %v6935_v35 = vld [vmem:[#allocation2 + $0x170] sm:$0xff]  ;;  %v1221_v40 = vld [vmem:[#allocation2 + $0x178] sm:$0x1]  ;;  %v6005_v19 = vld [vmem:[%s7128_s3 + $0x228] sm:$0xff]  }
  0xb9   : > { %5377 = vmatprep.subr.bf16.mxu1 %v5998_v23  ;;  %v1399_v21 = vshll.u32 %v1219_v59, 16  ;;  %v1406_v58 = vshll.u32 %v6935_v35, 16  ;;  %v1404_v26 = vshrl.u32 %v6935_v35, 16  ;;  %v1697_v59 = vld [vmem:[#allocation2 + $0x78] sm:$0x80] }
  0xba   : > { %v1342_v11 = vsel %vm1222_vm0, %v1337_v3, %v1341_v54  ;;  %v1354_v51 = vsel %vm1222_vm0, %v1349_v39, %v1353_v62  ;;  %v1377_v4 = vrot.slane %v1375_v46, 1  ;;  %v1689_v3 = vld [vmem:[#allocation2 + $0x18] sm:$0x80]  ;;  %v1411_v39 = vshll.u32 %v1221_v40, 16  ;;  %v1693_v46 = vld [vmem:[#allocation2 + $0x48] sm:$0x80] }
  0xbb   : > { %v1722_v32 = vshrl.u32 %v1689_v3, 16  ;;  %v1746_v53 = vshrl.u32 %v1693_v46, 16  ;;  %v6012_v40 = vld [vmem:[%s7128_s3 + $0x110] sm:$0xff]  }
  0xbc   : > { %5378 = vmatpush3.bf16.msra.mxu1 %v5998_v23  ;;  %v6899_v23 = vld [vmem:[#allocation2 + $0x140] sm:$0xff]  ;;  %v1413_v43 = vrot.slane %v1411_v39, 1  ;;  %v6014_v39 = vld [vmem:[#allocation2 + $0x158] sm:$0xff] }
  0xbd   : > { %5379 = vmatprep.subr.bf16.mxu1 %v6000_v13  ;;  %v1382_v1 = vshll.u32 %v6899_v23, 16  ;;  %v1724_v5 = vrot.slane %v1722_v32, 7  ;;  %v1705_v32 = vld [vmem:[#allocation2 + $0xd8] sm:$0x80] }
  0xbe   : > { %5348 = vmatmul.mubr.bf16.gmra.mrb[12].mxu1 %v1318_v47  ;;  %v1392_v47 = vshrl.u32 %v6904_v48, 16  ;;  %v1818_v46 = vshrl.u32 %v1705_v32, 16 }
  0xbf   : > { %5556 = vmatmul.mubr.bf16.gmra.mrb[28].mxu0 %v3167_v27  ;;  %5351 = vmatprep.mubr.bf16.mxu1 %v1330_v34  ;;  %v6003_v27 = vld [vmem:[%s7128_s3 + $0x218] sm:$0xff]   ;;  %v1732_v20 = vsel %vm530_vm1, %v1724_v5, %v6480_v2 }
  0xc0   : > { %5575 = vmatprep.mubr.bf16.mxu0 %v6562_v45  ;;  %5380 = vmatpush3.bf16.msra.mxu1 %v6000_v13  ;;  %v1368_v45 = vshrl.u32 %v6881_v15, 16  ;;  %v6949_v10 = vor.u32 %v1396_v56, %v1392_v47  ;;  %v6010_v56 = vld [vmem:[#allocation2 + $0x128] sm:$0xff] }
  0xc1   : > { %5381 = vmatprep.subr.bf16.mxu1 %v6002_v60 }
  0xc2   : > { %v6920_v50 = vor.u32 %v1372_v29, %v1368_v45  ;;  %v6006_v29 = vld [vmem:[%s7128_s3 + $0x230] sm:$0xff]  }
  0xc4   : > { %5382 = vmatpush3.bf16.msra.mxu1 %v6002_v60  ;;  %v1378_v13 = vsel %vm1222_vm0, %v6920_v50, %v1377_v4  ;;  %v1401_v60 = vrot.slane %v1399_v21, 1 }
  0xc5   : > { %5655 = vmatprep.subr.bf16.mxu1 %v6909_v31 }
  0xc6   : > { %5352 = vmatmul.mubr.bf16.gmra.mrb[16].mxu1 %v1342_v11  ;;  %v1402_v62 = vsel %vm1222_vm0, %v6949_v10, %v1401_v60 }
  0xc7   : > { %5576 = vmatmul.mubr.bf16.vlgmr.msra.gmra.mrb[0].mxu0 %v6587_v6  ;;  %5355 = vmatprep.mubr.bf16.mxu1 %v1354_v51  ;;  %v6001_v6 = vld [vmem:[%s7128_s3 + $0x210] sm:$0xff]  }
  0xc8   : > { %5608 = vmatpush3.bf16.msra.mxu0 %v6803_v57  ;;  %5579 = vmatprep.mubr.bf16.mxu0 %v6602_v63  ;;  %v1380_v57 = vshrl.u32 %v6899_v23, 16  ;;  %v1384_v63 = vrot.slane %v1382_v1, 1  ;;  %v1691_v51 = vld [vmem:[#allocation2 + $0x30] sm:$0x80] }
  0xc9   : > { %5609 = vmatprep.subr.bf16.mxu0 %v5999_v22 }
  0xca   : > { %v6943_v34 = vor.u32 %v1384_v63, %v1380_v57  ;;  %v1770_v63 = vshrl.u32 %v1697_v59, 16 }
  0xcc   : > { %5610 = vmatpush3.bf16.msra.mxu0 %v5999_v22  ;;  %v1390_v54 = vsel %vm1222_vm0, %v6943_v34, %v1389_v49  ;;  %v1734_v22 = vshrl.u32 %v1691_v51, 16  ;;  %v1772_v21 = vrot.slane %v1770_v63, 7  ;;  %v1701_v49 = vld [vmem:[#allocation2 + $0xa8] sm:$0x80] }
  0xcd   : > { %5611 = vmatprep.subr.bf16.mxu0 %v6001_v6  ;;  %v1794_v3 = vshrl.u32 %v1701_v49, 16  ;;  %v1709_v63 = vld [vmem:[#allocation2 + $0x108] sm:$0x80]  ;;  %v3705_v49 = vld [vmem:[#allocation2 + $0x70] sm:$0x1] }
  0xce   : > { %5356 = vmatmul.mubr.bf16.gmra.mrb[20].mxu1 %v1366_v25  ;;  %v1736_v4 = vrot.slane %v1734_v22, 7  ;;  %v1758_v25 = vshrl.u32 %v1695_v14, 16  ;;  %v6017_v14 = vld [vmem:[#allocation2 + $0x170] sm:$0xff] }
  0xcf   : > { %5580 = vmatmul.mubr.bf16.gmra.mrb[4].mxu0 %v6628_v9  ;;  %5359 = vmatprep.mubr.bf16.mxu1 %v1378_v13  ;;  %v6004_v9 = vld [vmem:[%s7128_s3 + $0x220] sm:$0xff]  }
  0xd0   : > { %5583 = vmatprep.mubr.bf16.mxu0 %v6644_v52  ;;  %5612 = vmatpush3.bf16.msra.mxu0 %v6001_v6  ;;  %v1408_v52 = vrot.slane %v1406_v58, 1  ;;  %v1748_v6 = vrot.slane %v1746_v53, 7  ;;  %v1744_v2 = vsel %vm530_vm1, %v1736_v4, %v6484_v0  ;;  %v1760_v13 = vrot.slane %v1758_v25, 7  ;;  %v6011_v0 = vld [vmem:[%s7128_s3 + $0x108] sm:$0xff]   ;;  %v3703_v25 = vld [vmem:[#allocation2 + $0x58] sm:$0x1] }
  0xd1   : > { %5613 = vmatprep.subr.bf16.mxu0 %v6003_v27  ;;  %v3704_v4 = vld [vmem:[#allocation2 + $0x68] sm:$0xff] }
  0xd2   : > { %v6967_v11 = vor.u32 %v1408_v52, %v1404_v26  ;;  %v1756_v8 = vsel %vm530_vm1, %v1748_v6, %v6524_v28  ;;  %v1768_v28 = vsel %vm530_vm1, %v1760_v13, %v6528_v17  ;;  %v1796_v17 = vrot.slane %v1794_v3, 7  ;;  %v1707_v6 = vld [vmem:[#allocation2 + $0xf0] sm:$0x80] }
  0xd4   : > { %5614 = vmatpush3.bf16.msra.mxu0 %v6003_v27  ;;  %v1699_v27 = vld [vmem:[#allocation2 + $0x90] sm:$0x80] }
  0xd5   : > { %5615 = vmatprep.subr.bf16.mxu0 %v6004_v9  ;;  %v1782_v60 = vshrl.u32 %v1699_v27, 16  ;;  %v1830_v27 = vshrl.u32 %v1707_v6, 16 }
  0xd6   : > { %5360 = vmatmul.mubr.bf16.gmra.mrb[24].mxu1 %v1390_v54  ;;  %v6013_v54 = vld [vmem:[#allocation2 + $0x140] sm:$0xff] }
  0xd7   : > { %5584 = vmatmul.mubr.bf16.gmra.mrb[8].mxu0 %v6676_v41  ;;  %5363 = vmatprep.mubr.bf16.mxu1 %v1402_v62  ;;  %v1414_v41 = vsel %vm1222_vm0, %v6967_v11, %v1413_v43  ;;  %v1784_v52 = vrot.slane %v1782_v60, 7  ;;  %v1703_v62 = vld [vmem:[#allocation2 + $0xc0] sm:$0x80]  ;;  %v3701_v43 = vld [vmem:[#allocation2 + $0x40] sm:$0x1] }
  0xd8   : > { %5587 = vmatprep.mubr.bf16.mxu0 %v6679_v55  ;;  %5616 = vmatpush3.bf16.msra.mxu0 %v6004_v9  ;;  %v6007_v55 = vld [vmem:[%s7128_s3 + $0x238] sm:$0xff]   ;;  %v1806_v51 = vshrl.u32 %v1703_v62, 16  ;;  %v3740_v53 = vshll.u32 %v3701_v43, 16  ;;  %v6020_v62 = vld [vmem:[%s7128_s3 + $0x130] sm:$0xff]   ;;  %v1711_v43 = vld [vmem:[#allocation2 + $0x120] sm:$0x80] }
  0xd9   : > { %5617 = vmatprep.subr.bf16.mxu0 %v6005_v19  ;;  %v3700_v9 = vld [vmem:[#allocation2 + $0x38] sm:$0xff]  ;;  %v1792_v5 = vsel %vm530_vm1, %v1784_v52, %v6570_v33 }
  0xda   : > { %v3733_v22 = vshrl.u32 %v3700_v9, 16  ;;  %v1808_v33 = vrot.slane %v1806_v51, 7  ;;  %v3742_v13 = vrot.slane %v3740_v53, 1  ;;  %v1854_v53 = vshrl.u32 %v1711_v43, 16  ;;  %v7044_v43 = vld [vmem:[#allocation2 + $0x188] sm:$0xff] }
  0xdc   : > { %5618 = vmatpush3.bf16.msra.mxu0 %v6005_v19  ;;  %v3735_v19 = vshll.u32 %v3700_v9, 16 }
  0xdd   : > { %5619 = vmatprep.subr.bf16.mxu0 %v6006_v29 }
  0xde   : > { %5364 = vmatmul.mubr.bf16.gmra.mrb[28].mxu1 %v1414_v41  ;;  %v3702_v41 = vld [vmem:[#allocation2 + $0x50] sm:$0xff] }
  0xdf   : > { %5588 = vmatmul.mubr.bf16.gmra.mrb[12].mxu0 %v6708_v42  ;;  %5383 = vmatprep.mubr.bf16.mxu1 %v1732_v20  ;;  %v3737_v20 = vrot.slane %v3735_v19, 1  ;;  %v3747_v59 = vshll.u32 %v3702_v41, 16 }
  0xe0   : > { %5591 = vmatprep.mubr.bf16.mxu0 %v6721_v16  ;;  %5620 = vmatpush3.bf16.msra.mxu0 %v6006_v29  ;;  %v1804_v29 = vsel %vm530_vm1, %v1796_v17, %v6606_v24  ;;  %v6018_v24 = vld [vmem:[#allocation2 + $0x188] sm:$0xff]  ;;  %v3706_v17 = vld [vmem:[#allocation2 + $0x80] sm:$0xff] }
  0xe1   : > { %5621 = vmatprep.subr.bf16.mxu0 %v6007_v55  ;;  %v3749_v60 = vrot.slane %v3747_v59, 1  ;;  %v3769_v6 = vshrl.u32 %v3706_v17, 16 }
  0xe4   : > { %5622 = vmatpush3.bf16.msra.mxu0 %v6007_v55  ;;  %v6016_v55 = vld [vmem:[%s7128_s3 + $0x120] sm:$0xff]  }
  0xe6   : > { %5384 = vmatmul.mubr.bf16.vlgmr.msra.gmra.mrb[0].mxu1 %v1744_v2  ;;  %v1820_v2 = vrot.slane %v1818_v46, 7  ;;  %v3707_v46 = vld [vmem:[#allocation2 + $0x88] sm:$0x1] }
  0xe7   : > { %5592 = vmatmul.mubr.bf16.gmra.mrb[16].mxu0 %v6756_v36  ;;  %5663 = vmatpush3.bf16.msra.mxu1 %v6909_v31  ;;  %v1780_v31 = vsel %vm530_vm1, %v1772_v21, %v6566_v30  ;;  %v6015_v30 = vld [vmem:[%s7128_s3 + $0x118] sm:$0xff]   ;;  %v6019_v21 = vld [vmem:[%s7128_s3 + $0x128] sm:$0xff]  }
  0xe8   : > { %5387 = vmatprep.mubr.bf16.mxu1 %v1756_v8  ;;  %5595 = vmatprep.mubr.bf16.mxu0 %v6010_v56  ;;  %v3738_v8 = vor.u32 %v3737_v20, %v3733_v22  ;;  %v3759_v56 = vshll.u32 %v3704_v4, 16  ;;  %v1828_v3 = vsel %vm530_vm1, %v1820_v2, %v6767_v18  ;;  %v6021_v20 = vld [vmem:[%s7128_s3 + $0x138] sm:$0xff]  }
  0xe9   : > { %5656 = vmatprep.subr.bf16.mxu1 %v6011_v0 }
  0xea   : > { %v3743_v9 = vsel %vm1222_vm0, %v3738_v8, %v3742_v13  ;;  %v3761_v52 = vrot.slane %v3759_v56, 1 }
  0xeb   : > { %5664 = vmatpush3.bf16.msra.mxu1 %v6011_v0  ;;  %v3745_v0 = vshrl.u32 %v3702_v41, 16  ;;  %v1713_v41 = vld [vmem:[#allocation2 + $0x138] sm:$0x80] }
  0xec   : > { %5657 = vmatprep.subr.bf16.mxu1 %v6012_v40  ;;  %v1866_v2 = vshrl.u32 %v1713_v41, 16 }
  0xed   : > { %v3750_v32 = vor.u32 %v3749_v60, %v3745_v0 }
  0xee   : > { %5388 = vmatmul.mubr.bf16.gmra.mrb[4].mxu1 %v1768_v28  ;;  %v1816_v28 = vsel %vm530_vm1, %v1808_v33, %v6610_v12  ;;  %v1832_v12 = vrot.slane %v1830_v27, 7  ;;  %v1860_v33 = vrot.slane %v1368_v45, 7  ;;  %v1715_v27 = vld [vmem:[#allocation2 + $0x150] sm:$0x80] }
  0xef   : > { %5596 = vmatmul.mubr.bf16.gmra.mrb[20].mxu0 %v6013_v54  ;;  %5391 = vmatprep.mubr.bf16.mxu1 %v1780_v31  ;;  %v3752_v31 = vshll.u32 %v3703_v25, 16  ;;  %v3757_v54 = vshrl.u32 %v3704_v4, 16  ;;  %v1872_v25 = vrot.slane %v1380_v57, 7 }
  0xf0   : > { %5599 = vmatprep.mubr.bf16.mxu0 %v6014_v39  ;;  %5665 = vmatpush3.bf16.msra.mxu1 %v6012_v40  ;;  %v1842_v40 = vshrl.u32 %v1709_v63, 16  ;;  %v3764_v39 = vshll.u32 %v3705_v49, 16  ;;  %v3710_v63 = vld [vmem:[#allocation2 + $0xb0] sm:$0xff]  ;;  %v1863_v45 = vor.u32 %v1860_v33, %v1370_v38 }
  0xf1   : > { %5658 = vmatprep.subr.bf16.mxu1 %v6015_v30  ;;  %v3754_v18 = vrot.slane %v3752_v31, 1  ;;  %v3762_v51 = vor.u32 %v3761_v52, %v3757_v54  ;;  %v3795_v0 = vshll.u32 %v3710_v63, 16  ;;  %v1875_v60 = vor.u32 %v1872_v25, %v1382_v1  ;;  %v3711_v31 = vld [vmem:[#allocation2 + $0xb8] sm:$0x1]  ;;  %v3717_v25 = vld [vmem:[#allocation2 + $0x100] sm:$0x1] }
  0xf2   : > { %v1844_v19 = vrot.slane %v1842_v40, 7  ;;  %v1878_v52 = vshrl.u32 %v1715_v27, 16 }
  0xf3   : > { %v3755_v4 = vsel %vm1222_vm0, %v3750_v32, %v3754_v18 }
  0xf4   : > { %5666 = vmatpush3.bf16.msra.mxu1 %v6015_v30  ;;  %v3708_v30 = vld [vmem:[#allocation2 + $0x98] sm:$0xff]  ;;  %v1880_v41 = vrot.slane %v1878_v52, 7 }
  0xf5   : > { %5659 = vmatprep.subr.bf16.mxu1 %v6016_v55  ;;  %v3783_v22 = vshll.u32 %v3708_v30, 16  ;;  %v3781_v8 = vshrl.u32 %v3708_v30, 16  ;;  %v3800_v30 = vshll.u32 %v3711_v31, 16  ;;  %v3719_v52 = vld [vmem:[#allocation2 + $0x118] sm:$0x1] }
  0xf6   : > { %5392 = vmatmul.mubr.bf16.gmra.mrb[8].mxu1 %v1792_v5  ;;  %v3771_v5 = vshll.u32 %v3706_v17, 16  ;;  %v3713_v17 = vld [vmem:[#allocation2 + $0xd0] sm:$0x1] }
  0xf7   : > { %5600 = vmatmul.mubr.bf16.gmra.mrb[24].mxu0 %v6017_v14  ;;  %5395 = vmatprep.mubr.bf16.mxu1 %v1804_v29  ;;  %v3766_v29 = vrot.slane %v3764_v39, 1  ;;  %v1852_v14 = vsel %vm530_vm1, %v1844_v19, %v6796_v44  ;;  %v3785_v13 = vrot.slane %v3783_v22, 1  ;;  %v1856_v44 = vrot.slane %v1854_v53, 7 }
  0xf8   : > { %5603 = vmatprep.mubr.bf16.mxu0 %v6018_v24  ;;  %5667 = vmatpush3.bf16.msra.mxu1 %v6016_v55  ;;  %v3709_v55 = vld [vmem:[#allocation2 + $0xa0] sm:$0x1]  ;;  %v3773_v59 = vrot.slane %v3771_v5, 1  ;;  %v3776_v24 = vshll.u32 %v3707_v46, 16  ;;  %v1884_v39 = vrot.slane %v1392_v47, 7  ;;  %v1896_v19 = vrot.slane %v1404_v26, 7 }
  0xf9   : > { %5660 = vmatprep.subr.bf16.mxu1 %v6019_v21  ;;  %v3788_v56 = vshll.u32 %v3709_v55, 16  ;;  %v3786_v40 = vor.u32 %v3785_v13, %v3781_v8  ;;  %v1864_v38 = vsel %vm530_vm1, %v1856_v44, %v1863_v45  ;;  %v3714_v46 = vld [vmem:[#allocation2 + $0xe0] sm:$0xff]  ;;  %v3802_v53 = vrot.slane %v3800_v30, 1 }
  0xfa   : > { %v3774_v49 = vor.u32 %v3773_v59, %v3769_v6  ;;  %v3778_v57 = vrot.slane %v3776_v24, 1  ;;  %v1887_v22 = vor.u32 %v1884_v39, %v1394_v37  ;;  %v1906_v26 = vshrl.u32 %v7044_v43, 16  ;;  %v3715_v24 = vld [vmem:[#allocation2 + $0xe8] sm:$0x1]  ;;  %v3721_v39 = vld [vmem:[#allocation2 + $0x130] sm:$0x1] }
  0xfb   : > { %v3819_v33 = vshll.u32 %v3714_v46, 16  ;;  %v1909_v13 = vshll.u32 %v7044_v43, 16  ;;  %v3824_v44 = vshll.u32 %v3715_v24, 16  ;;  %v3848_v30 = vshll.u32 %v3719_v52, 16 }
  0xfc   : > { %5668 = vmatpush3.bf16.msra.mxu1 %v6019_v21  ;;  %v3712_v21 = vld [vmem:[#allocation2 + $0xc8] sm:$0xff]  ;;  %v3779_v32 = vsel %vm1222_vm0, %v3774_v49, %v3778_v57  ;;  %v1888_v37 = vsel %vm530_vm1, %v1880_v41, %v1887_v22  ;;  %v1908_v8 = vrot.slane %v1906_v26, 7  ;;  %v3836_v49 = vshll.u32 %v3717_v25, 16  ;;  %v3718_v57 = vld [vmem:[#allocation2 + $0x110] sm:$0xff] }
  0xfd   : > { %5661 = vmatprep.subr.bf16.mxu1 %v6020_v62  ;;  %v3807_v54 = vshll.u32 %v3712_v21, 16 }
  0xfe   : > { %5396 = vmatmul.mubr.bf16.gmra.mrb[12].mxu1 %v1816_v28  ;;  %v1868_v28 = vrot.slane %v1866_v2, 7 }
  0xff   : > { %5604 = vmatmul.mubr.bf16.gmra.mrb[28].mxu0 %v6730_v7  ;;  %5399 = vmatprep.mubr.bf16.mxu1 %v1828_v3  ;;  %v1840_v7 = vsel %vm530_vm1, %v1832_v12, %v6774_v61  ;;  %v3767_v61 = vsel %vm1222_vm0, %v3762_v51, %v3766_v29  ;;  %v3790_v3 = vrot.slane %v3788_v56, 1  ;;  %v3797_v12 = vrot.slane %v3795_v0, 1 }
 0x100   : > { %5623 = vmatprep.mubr.bf16.mxu0 %v3743_v9  ;;  %5669 = vmatpush3.bf16.msra.mxu1 %v6020_v62  ;;  %v1717_v9 = vld [vmem:[#allocation2 + $0x168] sm:$0x80]  ;;  %v3793_v62 = vshrl.u32 %v3710_v63, 16  ;;  %v1876_v18 = vsel %vm530_vm1, %v1868_v28, %v1875_v60  ;;  %v3805_v51 = vshrl.u32 %v3712_v21, 16  ;;  %v3809_v47 = vrot.slane %v3807_v54, 1 }
 0x101   : > { %5662 = vmatprep.subr.bf16.mxu1 %v6021_v20  ;;  %v1890_v1 = vshrl.u32 %v1717_v9, 16  ;;  %v3791_v5 = vsel %vm1222_vm0, %v3786_v40, %v3790_v3  ;;  %v3812_v29 = vshll.u32 %v3713_v17, 16  ;;  %v3821_v21 = vrot.slane %v3819_v33, 1 }
 0x102   : > { %v3810_v6 = vor.u32 %v3809_v47, %v3805_v51  ;;  %v1911_v60 = vor.u32 %v1909_v13, %v1908_v8  ;;  %v3826_v40 = vrot.slane %v3824_v44, 1  ;;  %v3843_v3 = vshll.u32 %v3718_v57, 16  ;;  %v3723_v51 = vld [vmem:[#allocation2 + $0x148] sm:$0x1]  ;;  %v3725_v47 = vld [vmem:[#allocation2 + $0x160] sm:$0x1] }
 0x103   : > { %v1892_v55 = vrot.slane %v1890_v1, 7  ;;  %v3814_v59 = vrot.slane %v3812_v29, 1  ;;  %v3838_v54 = vrot.slane %v3836_v49, 1  ;;  %v3884_v22 = vshll.u32 %v3725_v47, 16 }
 0x104   : > { %5670 = vmatpush3.bf16.msra.mxu1 %v6021_v20  ;;  %v3716_v20 = vld [vmem:[#allocation2 + $0xf8] sm:$0xff]  ;;  %v3905_v33 = vrot.slane %v1909_v13, 1 }
 0x105   : > { %v3831_v2 = vshll.u32 %v3716_v20, 16  ;;  %v3815_v45 = vsel %vm1222_vm0, %v3810_v6, %v3814_v59  ;;  %v3829_v27 = vshrl.u32 %v3716_v20, 16  ;;  %v3886_v20 = vrot.slane %v3884_v22, 1 }
 0x106   : > { %5400 = vmatmul.mubr.bf16.gmra.mrb[16].mxu1 %v1840_v7  ;;  %v3798_v7 = vor.u32 %v3797_v12, %v3793_v62  ;;  %v3841_v62 = vshrl.u32 %v3718_v57, 16  ;;  %v3845_v12 = vrot.slane %v3843_v3, 1  ;;  %v3906_v59 = vor.u32 %v3905_v33, %v1906_v26 }
 0x107   : > { %5624 = vmatmul.mubr.bf16.vlgmr.msra.gmra.mrb[0].mxu0 %v3755_v4  ;;  %5403 = vmatprep.mubr.bf16.mxu1 %v1852_v14  ;;  %v1899_v4 = vor.u32 %v1896_v19, %v1406_v58  ;;  %v1719_v14 = vld [vmem:[#allocation2 + $0x180] sm:$0x80]  ;;  %v3817_v58 = vshrl.u32 %v3714_v46, 16  ;;  %v3833_v0 = vrot.slane %v3831_v2, 1  ;;  %v3850_v19 = vrot.slane %v3848_v30, 1 }
 0x108   : > { %5627 = vmatprep.mubr.bf16.mxu0 %v3767_v61  ;;  %v3803_v63 = vsel %vm1222_vm0, %v3798_v7, %v3802_v53  ;;  %v1902_v61 = vshrl.u32 %v1719_v14, 16  ;;  %v3846_v1 = vor.u32 %v3845_v12, %v3841_v62  ;;  %v3872_v46 = vshll.u32 %v3723_v51, 16  ;;  %v3727_v7 = vld [vmem:[#allocation2 + $0x178] sm:$0x1]  ;;  %v3729_v53 = vld [vmem:[#allocation2 + $0x190] sm:$0x1] }
 0x109   : > { %v1900_v56 = vsel %vm530_vm1, %v1892_v55, %v1899_v4  ;;  %v3822_v31 = vor.u32 %v3821_v21, %v3817_v58  ;;  %v3834_v9 = vor.u32 %v3833_v0, %v3829_v27  ;;  %v3896_v4 = vshll.u32 %v3727_v7, 16 }
 0x10a   : > { %v1904_v28 = vrot.slane %v1902_v61, 7  ;;  %v3851_v29 = vsel %vm1222_vm0, %v3846_v1, %v3850_v19  ;;  %v3887_v14 = vsel %vm1222_vm0, %v6949_v10, %v3886_v20 }
 0x10c   : > { %v1912_v17 = vsel %vm530_vm1, %v1904_v28, %v1911_v60 }
 0x10e   : > { %5404 = vmatmul.mubr.bf16.gmra.mrb[20].mxu1 %v1864_v38  ;;  %v3827_v38 = vsel %vm1222_vm0, %v3822_v31, %v3826_v40 }
 0x10f   : > { %5628 = vmatmul.mubr.bf16.gmra.mrb[4].mxu0 %v3779_v32  ;;  %5407 = vmatprep.mubr.bf16.mxu1 %v1876_v18  ;;  %v3839_v32 = vsel %vm1222_vm0, %v3834_v9, %v3838_v54  ;;  %v3860_v18 = vshll.u32 %v3721_v39, 16 }
 0x110   : > { %5631 = vmatprep.mubr.bf16.mxu0 %v3791_v5 }
 0x111   : > { %v3862_v5 = vrot.slane %v3860_v18, 1 }
 0x113   : > { %v3863_v41 = vsel %vm1222_vm0, %v6920_v50, %v3862_v5  ;;  %v3908_v50 = vshll.u32 %v3729_v53, 16 }
 0x115   : > { %v3910_v24 = vrot.slane %v3908_v50, 1 }
 0x116   : > { %5408 = vmatmul.mubr.bf16.gmra.mrb[24].mxu1 %v1888_v37 }
 0x117   : > { %5632 = vmatmul.mubr.bf16.gmra.mrb[8].mxu0 %v3803_v63  ;;  %5411 = vmatprep.mubr.bf16.mxu1 %v1900_v56 }
 0x118   : > { %5635 = vmatprep.mubr.bf16.mxu0 %v3815_v45 }
 0x11e   : > { %5412 = vmatmul.mubr.bf16.gmra.mrb[28].mxu1 %v1912_v17 }
 0x11f   : > { %5636 = vmatmul.mubr.bf16.gmra.mrb[12].mxu0 %v3827_v38  ;;  %5447 = vmatprep.mubr.bf16.mxu1 %v6708_v42  ;;  %v3874_v42 = vrot.slane %v3872_v46, 1 }
 0x120   : > { %5639 = vmatprep.mubr.bf16.mxu0 %v3839_v32 }
 0x121   : > { %v3875_v55 = vsel %vm1222_vm0, %v6943_v34, %v3874_v42  ;;  %v3731_v34 = vld [vmem:[#allocation2 + $0x1a8] sm:$0x1] }
 0x122   : > { %v3920_v25 = vshll.u32 %v3731_v34, 16 }
 0x124   : > { %v3922_v63 = vrot.slane %v3920_v25, 1 }
 0x126   : > { %5448 = vmatmul.mubr.bf16.vlgmr.msra.gmra.mrb[16].mxu1 %v6721_v16  ;;  %v3898_v16 = vrot.slane %v3896_v4, 1 }
 0x127   : > { %5640 = vmatmul.mubr.bf16.gmra.mrb[16].mxu0 %v3851_v29  ;;  %5451 = vmatprep.mubr.bf16.mxu1 %v6756_v36  ;;  %v6022_v36 = vld [vmem:[#allocation2 + $0x8] sm:$0xff] }
 0x128   : > { %5643 = vmatprep.mubr.bf16.mxu0 %v3863_v41  ;;  %v3915_v6 = vshll.u32 %v6022_v36, 16  ;;  %v3899_v2 = vsel %vm1222_vm0, %v6967_v11, %v3898_v16  ;;  %v3913_v10 = vshrl.u32 %v6022_v36, 16 }
 0x12a   : > { %v3917_v37 = vrot.slane %v3915_v6, 1 }
 0x12e   : > { %5452 = vmatmul.mubr.bf16.gmra.mrb[20].mxu1 %v6881_v15  ;;  %v3911_v15 = vsel %vm1222_vm0, %v3906_v59, %v3910_v24 }
 0x12f   : > { %5644 = vmatmul.mubr.bf16.gmra.mrb[20].mxu0 %v3875_v55  ;;  %5455 = vmatprep.mubr.bf16.mxu1 %v6899_v23  ;;  %v3918_v23 = vor.u32 %v3917_v37, %v3913_v10 }
 0x130   : > { %5647 = vmatprep.mubr.bf16.mxu0 %v3887_v14 }
 0x131   : > { %v3923_v26 = vsel %vm1222_vm0, %v3918_v23, %v3922_v63 }
 0x136   : > { %5456 = vmatmul.mubr.bf16.gmra.mrb[24].mxu1 %v6904_v48 }
 0x137   : > { %5648 = vmatmul.mubr.bf16.gmra.mrb[24].mxu0 %v3899_v2  ;;  %5459 = vmatprep.mubr.bf16.mxu1 %v6935_v35 }
 0x138   : > { %5651 = vmatprep.mubr.bf16.mxu0 %v3911_v15 }
 0x13e   : > { %5460 = vmatmul.mubr.bf16.gmra.mrb[28].mxu1 %v7044_v43 }
 0x13f   : > { %5652 = vmatmul.mubr.bf16.gmra.mrb[28].mxu0 %v3923_v26 }
 0x1b9   : > { %v5385_v61 = vpop.f32.mrb[0].mxu1 }
 0x1ba   : > { %v2028_v11 = vpop.f32.mrb[1].mxu1 }
 0x1bb   : > { %v5386_v8 = vpop.f32.mrb[2].mxu1 }
 0x1bc   : > { %v2031_v13 = vpop.f32.mrb[3].mxu1 }
 0x1c1   : > { %v5389_v56 = vpop.f32.mrb[4].mxu1 }
 0x1c2   : > { %v2044_v58 = vpop.f32.mrb[5].mxu1 }
 0x1c3   : > { %v5390_v21 = vpop.f32.mrb[6].mxu1 }
 0x1c4   : > { %v2047_v44 = vpop.f32.mrb[7].mxu1 }
 0x1c9   : > { %v5393_v48 = vpop.f32.mrb[8].mxu1 }
 0x1ca   : > { %v2060_v45 = vpop.f32.mrb[9].mxu1 }
 0x1cb   : > { %v5394_v35 = vpop.f32.mrb[10].mxu1 }
 0x1cc   : > { %v2063_v27 = vpop.f32.mrb[11].mxu1 }
 0x1d1   : > { %v7083_v0 = vpop.f32.mrb[12].mxu1 }
 0x1d2   : > { %v7085_v49 = vpop.f32.mrb[13].mxu1 }
 0x1d3   : > { %v7087_v57 = vpop.f32.mrb[14].mxu1 }
 0x1d4   : > { %v7089_v43 = vpop.f32.mrb[15].mxu1 }
 0x1da   : > { %v5625_v28 = vpop.f32.mrb[0].mxu0 }
 0x1db   : > { %v5671_v60 = vadd.f32 %v5625_v28, %v5385_v61  ;;  %v4039_v31 = vpop.f32.mrb[1].mxu0 }
 0x1dc   : > { %v5672_v40 = vadd.f32 %v4039_v31, %v2028_v11  ;;  %v5626_v3 = vpop.f32.mrb[2].mxu0 }
 0x1dd   : > { %v5673_v9 = vadd.f32 %v5626_v3, %v5386_v8  ;;  %v4042_v54 = vpop.f32.mrb[3].mxu0  ;;  %v4237_v30 = vmul.f32 %v5671_v60, %v5671_v60 }
 0x1de   : > { %v5674_v52 = vadd.f32 %v4042_v54, %v2031_v13  ;;  %v4235_v17 = vmul.f32 %v5672_v40, %v5672_v40 }
 0x1df   : > { %v4905_v39 = vpack.c.bf16 %v5673_v9, %v5671_v60  ;;  %v4238_v51 = vmul.f32 %v5673_v9, %v5673_v9 }
 0x1e0   : > { %v4198_v38 = vadd.f32 %v5674_v52, %v5672_v40  ;;  %v4236_v62 = vmul.f32 %v5674_v52, %v5674_v52  ;;  %v4900_v12 = vpack.c.bf16 %v5674_v52, %v5672_v40 }
 0x1e1   : > { %4992 = vst [vmem:[%s7096_s13 + $0x8] sm:$0xff] %v4905_v39  }
 0x1e2   : > { %v4199_v32 = vadd.f32 %v5671_v60, %v4198_v38  ;;  %v4267_v18 = vadd.f32 %v4236_v62, %v4235_v17  ;;  %4901 = vst [vmem:[%s7096_s13] sm:$0xff] %v4900_v12   ;;  %v5629_v1 = vpop.f32.mrb[4].mxu0 }
 0x1e3   : > { %v5675_v19 = vadd.f32 %v5629_v1, %v5389_v56  ;;  %v4055_v5 = vpop.f32.mrb[5].mxu0 }
 0x1e4   : > { %v4268_v47 = vadd.f32 %v4267_v18, %v4237_v30  ;;  %v5676_v29 = vadd.f32 %v4055_v5, %v2044_v58  ;;  %v4200_v46 = vadd.f32 %v5673_v9, %v4199_v32  ;;  %v5630_v41 = vpop.f32.mrb[6].mxu0 }
 0x1e5   : > { %v5677_v22 = vadd.f32 %v5630_v41, %v5390_v21  ;;  %v4058_v42 = vpop.f32.mrb[7].mxu0  ;;  %v4241_v36 = vmul.f32 %v5675_v19, %v5675_v19 }
 0x1e6   : > { %v4201_v20 = vadd.f32 %v5676_v29, %v4200_v46  ;;  %v4239_v7 = vmul.f32 %v5676_v29, %v5676_v29  ;;  %v4269_v53 = vadd.f32 %v4268_v47, %v4238_v51  ;;  %v5678_v55 = vadd.f32 %v4058_v42, %v2047_v44 }
 0x1e7   : > { %v4915_v4 = vpack.c.bf16 %v5677_v22, %v5675_v19  ;;  %v4242_v10 = vmul.f32 %v5677_v22, %v5677_v22 }
 0x1e8   : > { %v4270_v14 = vadd.f32 %v4269_v53, %v4239_v7  ;;  %v4202_v33 = vadd.f32 %v5678_v55, %v4201_v20  ;;  %v4240_v50 = vmul.f32 %v5678_v55, %v5678_v55  ;;  %v4910_v16 = vpack.c.bf16 %v5678_v55, %v5676_v29 }
 0x1e9   : > { %4994 = vst [vmem:[%s7096_s13 + $0x18] sm:$0xff] %v4915_v4  }
 0x1ea   : > { %v4203_v6 = vadd.f32 %v5675_v19, %v4202_v33  ;;  %v4271_v59 = vadd.f32 %v4270_v14, %v4240_v50  ;;  %4993 = vst [vmem:[%s7096_s13 + $0x10] sm:$0xff] %v4910_v16   ;;  %v5633_v24 = vpop.f32.mrb[8].mxu0 }
 0x1eb   : > { %v5679_v34 = vadd.f32 %v5633_v24, %v5393_v48  ;;  %v4071_v2 = vpop.f32.mrb[9].mxu0 }
 0x1ec   : > { %v4272_v37 = vadd.f32 %v4271_v59, %v4241_v36  ;;  %v5680_v25 = vadd.f32 %v4071_v2, %v2060_v45  ;;  %v4204_v15 = vadd.f32 %v5677_v22, %v4203_v6  ;;  %v5634_v23 = vpop.f32.mrb[10].mxu0 }
 0x1ed   : > { %v5681_v63 = vadd.f32 %v5634_v23, %v5394_v35  ;;  %v4074_v26 = vpop.f32.mrb[11].mxu0  ;;  %v4245_v48 = vmul.f32 %v5679_v34, %v5679_v34 }
 0x1ee   : > { %v4205_v61 = vadd.f32 %v5680_v25, %v4204_v15  ;;  %v4243_v11 = vmul.f32 %v5680_v25, %v5680_v25  ;;  %v4273_v8 = vadd.f32 %v4272_v37, %v4242_v10  ;;  %v5682_v13 = vadd.f32 %v4074_v26, %v2063_v27 }
 0x1ef   : > { %v4925_v56 = vpack.c.bf16 %v5681_v63, %v5679_v34  ;;  %v4246_v35 = vmul.f32 %v5681_v63, %v5681_v63 }
 0x1f0   : > { %v4274_v58 = vadd.f32 %v4273_v8, %v4243_v11  ;;  %v4206_v21 = vadd.f32 %v5682_v13, %v4205_v61  ;;  %v4244_v44 = vmul.f32 %v5682_v13, %v5682_v13  ;;  %v4920_v28 = vpack.c.bf16 %v5682_v13, %v5680_v25 }
 0x1f1   : > { %4996 = vst [vmem:[%s7096_s13 + $0x28] sm:$0xff] %v4925_v56  }
 0x1f2   : > { %v4207_v60 = vadd.f32 %v5679_v34, %v4206_v21  ;;  %v4275_v31 = vadd.f32 %v4274_v58, %v4244_v44  ;;  %4995 = vst [vmem:[%s7096_s13 + $0x20] sm:$0xff] %v4920_v28   ;;  %v5637_v45 = vpop.f32.mrb[12].mxu0 }
 0x1f3   : > { %v5683_v40 = vadd.f32 %v5637_v45, %v7083_v0  ;;  %v4087_v3 = vpop.f32.mrb[13].mxu0 }
 0x1f4   : > { %v4276_v9 = vadd.f32 %v4275_v31, %v4245_v48  ;;  %v5684_v54 = vadd.f32 %v4087_v3, %v7085_v49  ;;  %v4208_v27 = vadd.f32 %v5681_v63, %v4207_v60  ;;  %v5638_v52 = vpop.f32.mrb[14].mxu0 }
 0x1f5   : > { %v5685_v39 = vadd.f32 %v5638_v52, %v7087_v57  ;;  %v4090_v17 = vpop.f32.mrb[15].mxu0  ;;  %v4249_v51 = vmul.f32 %v5683_v40, %v5683_v40 }
 0x1f6   : > { %v4209_v38 = vadd.f32 %v5684_v54, %v4208_v27  ;;  %v4247_v62 = vmul.f32 %v5684_v54, %v5684_v54  ;;  %v4277_v12 = vadd.f32 %v4276_v9, %v4246_v35  ;;  %v5686_v30 = vadd.f32 %v4090_v17, %v7089_v43 }
 0x1f7   : > { %v4935_v32 = vpack.c.bf16 %v5685_v39, %v5683_v40  ;;  %v4250_v42 = vmul.f32 %v5685_v39, %v5685_v39 }
 0x1f8   : > { %v4278_v18 = vadd.f32 %v4277_v12, %v4247_v62  ;;  %v4210_v0 = vadd.f32 %v5686_v30, %v4209_v38  ;;  %v4248_v1 = vmul.f32 %v5686_v30, %v5686_v30  ;;  %v4930_v19 = vpack.c.bf16 %v5686_v30, %v5684_v54 }
 0x1f9   : > { %4998 = vst [vmem:[%s7096_s13 + $0x38] sm:$0xff] %v4935_v32   ;;  %v5449_v5 = vpop.f32.mrb[16].mxu1 }
 0x1fa   : > { %v4211_v49 = vadd.f32 %v5683_v40, %v4210_v0  ;;  %v4279_v47 = vadd.f32 %v4278_v18, %v4248_v1  ;;  %4997 = vst [vmem:[%s7096_s13 + $0x30] sm:$0xff] %v4930_v19   ;;  %v5641_v29 = vpop.f32.mrb[16].mxu0  ;;  %v2350_v57 = vpop.f32.mrb[17].mxu1 }
 0x1fb   : > { %v5687_v46 = vadd.f32 %v5641_v29, %v5449_v5  ;;  %v4103_v41 = vpop.f32.mrb[17].mxu0  ;;  %v5450_v22 = vpop.f32.mrb[18].mxu1 }
 0x1fc   : > { %v4280_v20 = vadd.f32 %v4279_v47, %v4249_v51  ;;  %v5688_v43 = vadd.f32 %v4103_v41, %v2350_v57  ;;  %v4212_v7 = vadd.f32 %v5685_v39, %v4211_v49  ;;  %v5642_v53 = vpop.f32.mrb[18].mxu0  ;;  %v2353_v55 = vpop.f32.mrb[19].mxu1 }
 0x1fd   : > { %v5689_v4 = vadd.f32 %v5642_v53, %v5450_v22  ;;  %v4106_v14 = vpop.f32.mrb[19].mxu0  ;;  %v4253_v37 = vmul.f32 %v5687_v46, %v5687_v46 }
 0x1fe   : > { %v4213_v33 = vadd.f32 %v5688_v43, %v4212_v7  ;;  %v4251_v50 = vmul.f32 %v5688_v43, %v5688_v43  ;;  %v4281_v16 = vadd.f32 %v4280_v20, %v4250_v42  ;;  %v5690_v36 = vadd.f32 %v4106_v14, %v2353_v55 }
 0x1ff   : > { %v4945_v6 = vpack.c.bf16 %v5689_v4, %v5687_v46  ;;  %v4254_v8 = vmul.f32 %v5689_v4, %v5689_v4 }
 0x200   : > { %v4282_v59 = vadd.f32 %v4281_v16, %v4251_v50  ;;  %v4214_v24 = vadd.f32 %v5690_v36, %v4213_v33  ;;  %v4252_v34 = vmul.f32 %v5690_v36, %v5690_v36  ;;  %v4940_v2 = vpack.c.bf16 %v5690_v36, %v5688_v43 }
 0x201   : > { %5000 = vst [vmem:[%s7096_s13 + $0x48] sm:$0xff] %v4945_v6   ;;  %v5453_v10 = vpop.f32.mrb[20].mxu1 }
 0x202   : > { %v4215_v25 = vadd.f32 %v5687_v46, %v4214_v24  ;;  %v4283_v15 = vadd.f32 %v4282_v59, %v4252_v34  ;;  %4999 = vst [vmem:[%s7096_s13 + $0x40] sm:$0xff] %v4940_v2   ;;  %v5645_v23 = vpop.f32.mrb[20].mxu0  ;;  %v2366_v63 = vpop.f32.mrb[21].mxu1 }
 0x203   : > { %v5691_v26 = vadd.f32 %v5645_v23, %v5453_v10  ;;  %v4119_v61 = vpop.f32.mrb[21].mxu0  ;;  %v5454_v11 = vpop.f32.mrb[22].mxu1 }
 0x204   : > { %v4284_v13 = vadd.f32 %v4283_v15, %v4253_v37  ;;  %v5692_v56 = vadd.f32 %v4119_v61, %v2366_v63  ;;  %v4216_v58 = vadd.f32 %v5689_v4, %v4215_v25  ;;  %v5646_v21 = vpop.f32.mrb[22].mxu0  ;;  %v2369_v44 = vpop.f32.mrb[23].mxu1 }
 0x205   : > { %v5693_v28 = vadd.f32 %v5646_v21, %v5454_v11  ;;  %v4122_v48 = vpop.f32.mrb[23].mxu0  ;;  %v4257_v39 = vmul.f32 %v5691_v26, %v5691_v26 }
 0x206   : > { %v4217_v60 = vadd.f32 %v5692_v56, %v4216_v58  ;;  %v4255_v31 = vmul.f32 %v5692_v56, %v5692_v56  ;;  %v4285_v45 = vadd.f32 %v4284_v13, %v4254_v8  ;;  %v5694_v40 = vadd.f32 %v4122_v48, %v2369_v44 }
 0x207   : > { %v4955_v3 = vpack.c.bf16 %v5693_v28, %v5691_v26  ;;  %v4258_v0 = vmul.f32 %v5693_v28, %v5693_v28 }
 0x208   : > { %v4286_v35 = vadd.f32 %v4285_v45, %v4255_v31  ;;  %v4218_v9 = vadd.f32 %v5694_v40, %v4217_v60  ;;  %v4256_v54 = vmul.f32 %v5694_v40, %v5694_v40  ;;  %v4950_v27 = vpack.c.bf16 %v5694_v40, %v5692_v56 }
 0x209   : > { %5002 = vst [vmem:[%s7096_s13 + $0x58] sm:$0xff] %v4955_v3   ;;  %v5457_v52 = vpop.f32.mrb[24].mxu1 }
 0x20a   : > { %v4219_v17 = vadd.f32 %v5691_v26, %v4218_v9  ;;  %v4287_v38 = vadd.f32 %v4286_v35, %v4256_v54  ;;  %5001 = vst [vmem:[%s7096_s13 + $0x50] sm:$0xff] %v4950_v27   ;;  %v5649_v62 = vpop.f32.mrb[24].mxu0  ;;  %v2382_v12 = vpop.f32.mrb[25].mxu1 }
 0x20b   : > { %v5695_v30 = vadd.f32 %v5649_v62, %v5457_v52  ;;  %v4135_v32 = vpop.f32.mrb[25].mxu0  ;;  %v5458_v18 = vpop.f32.mrb[26].mxu1 }
 0x20c   : > { %v4288_v1 = vadd.f32 %v4287_v38, %v4257_v39  ;;  %v5696_v19 = vadd.f32 %v4135_v32, %v2382_v12  ;;  %v4220_v5 = vadd.f32 %v5693_v28, %v4219_v17  ;;  %v5650_v51 = vpop.f32.mrb[26].mxu0  ;;  %v2385_v49 = vpop.f32.mrb[27].mxu1 }
 0x20d   : > { %v5697_v47 = vadd.f32 %v5650_v51, %v5458_v18  ;;  %v4138_v29 = vpop.f32.mrb[27].mxu0  ;;  %v4261_v4 = vmul.f32 %v5695_v30, %v5695_v30 }
 0x20e   : > { %v4221_v57 = vadd.f32 %v5696_v19, %v4220_v5  ;;  %v4259_v46 = vmul.f32 %v5696_v19, %v5696_v19  ;;  %v4289_v41 = vadd.f32 %v4288_v1, %v4258_v0  ;;  %v5698_v22 = vadd.f32 %v4138_v29, %v2385_v49 }
 0x20f   : > { %v4965_v42 = vpack.c.bf16 %v5697_v47, %v5695_v30  ;;  %v4262_v24 = vmul.f32 %v5697_v47, %v5697_v47 }
 0x210   : > { %v4290_v20 = vadd.f32 %v4289_v41, %v4259_v46  ;;  %v4222_v43 = vadd.f32 %v5698_v22, %v4221_v57  ;;  %v4260_v7 = vmul.f32 %v5698_v22, %v5698_v22  ;;  %v4960_v53 = vpack.c.bf16 %v5698_v22, %v5696_v19 }
 0x211   : > { %5004 = vst [vmem:[%s7096_s13 + $0x68] sm:$0xff] %v4965_v42   ;;  %v5461_v55 = vpop.f32.mrb[28].mxu1 }
 0x212   : > { %v4223_v14 = vadd.f32 %v5695_v30, %v4222_v43  ;;  %v4291_v33 = vadd.f32 %v4290_v20, %v4260_v7  ;;  %5003 = vst [vmem:[%s7096_s13 + $0x60] sm:$0xff] %v4960_v53   ;;  %v5653_v50 = vpop.f32.mrb[28].mxu0  ;;  %v2398_v16 = vpop.f32.mrb[29].mxu1 }
 0x213   : > { %v5699_v36 = vadd.f32 %v5653_v50, %v5461_v55  ;;  %v4151_v6 = vpop.f32.mrb[29].mxu0  ;;  %v5462_v59 = vpop.f32.mrb[30].mxu1 }
 0x214   : > { %v4292_v34 = vadd.f32 %v4291_v33, %v4261_v4  ;;  %v5700_v2 = vadd.f32 %v4151_v6, %v2398_v16  ;;  %v4224_v10 = vadd.f32 %v5697_v47, %v4223_v14  ;;  %v5654_v37 = vpop.f32.mrb[30].mxu0  ;;  %v2401_v25 = vpop.f32.mrb[31].mxu1 }
 0x215   : > { %v5701_v15 = vadd.f32 %v5654_v37, %v5462_v59  ;;  %v4154_v23 = vpop.f32.mrb[31].mxu0  ;;  %v4265_v44 = vmul.f32 %v5699_v36, %v5699_v36 }
 0x216   : > { %v4225_v63 = vadd.f32 %v5700_v2, %v4224_v10  ;;  %v4263_v26 = vmul.f32 %v5700_v2, %v5700_v2  ;;  %v4293_v61 = vadd.f32 %v4292_v34, %v4262_v24  ;;  %v5702_v11 = vadd.f32 %v4154_v23, %v2401_v25 }
 0x217   : > { %v4975_v8 = vpack.c.bf16 %v5701_v15, %v5699_v36  ;;  %v4266_v60 = vmul.f32 %v5701_v15, %v5701_v15 }
 0x218   : > { %v4294_v13 = vadd.f32 %v4293_v61, %v4263_v26  ;;  %v4226_v56 = vadd.f32 %v5702_v11, %v4225_v63  ;;  %v4264_v58 = vmul.f32 %v5702_v11, %v5702_v11  ;;  %v4970_v21 = vpack.c.bf16 %v5702_v11, %v5700_v2 }
 0x219   : > { %5006 = vst [vmem:[%s7096_s13 + $0x78] sm:$0xff] %v4975_v8  }
 0x21a   : > { %v4227_v28 = vadd.f32 %v5699_v36, %v4226_v56  ;;  %v4295_v48 = vadd.f32 %v4294_v13, %v4264_v58  ;;  %5005 = vst [vmem:[%s7096_s13 + $0x70] sm:$0xff] %v4970_v21  }
 0x21c   : > { %v4228_v31 = vadd.f32 %v5701_v15, %v4227_v28  ;;  %v4296_v45 = vadd.f32 %v4295_v48, %v4265_v44 }
 0x21e   : > { %v4229_v40 = vrot.slane %v4228_v31, 4  ;;  %v4297_v3 = vadd.f32 %v4296_v45, %v4266_v60 }
 0x220   : > { %v4230_v35 = vadd.f32 %v4229_v40, %v4228_v31  ;;  %v4298_v9 = vrot.slane %v4297_v3, 4 }
 0x222   : > { %v4231_v54 = vrot.slane %v4230_v35, 2  ;;  %v4299_v27 = vadd.f32 %v4298_v9, %v4297_v3 }
 0x224   : > { %v4232_v52 = vadd.f32 %v4231_v54, %v4230_v35  ;;  %v4300_v39 = vrot.slane %v4299_v27, 2 }
 0x226   : > { %v4233_v17 = vrot.slane %v4232_v52, 1  ;;  %v4301_v38 = vadd.f32 %v4300_v39, %v4299_v27 }
 0x228   : > { %v4302_v62 = vrot.slane %v4301_v38, 1  ;;  %v4234_v12 = vadd.f32 %v4233_v17, %v4232_v52 }
 0x22a   : > { %v4303_v30 = vadd.f32 %v4302_v62, %v4301_v38 }
 0x22c   : > { %v4305_v32 = vsel %vm4304_vm2, %v4234_v12, %v4303_v30 }
 0x22d   : > { %4306 = vst [vmem:[%s235_s16] sm:$0x3] %v4305_v32 }
 0x22e PF: > { %s16_s18 = sadd.s32 1, %s6029_s18  }
 0x22f   : > { %p13_p4 = scmp.ge.s32.totalorder %s16_s18, 4  }
 0x231   :  { %15 = sbr.rel (!%p13_p4) target bundleno = 1 (0x1), region = 88 }

// kernel: double_conv_block.3
= control target key start
LH: loop header
LB: loop body
LE: loop exit
PB: predicated region body
PF: predicated region fallthrough
CT: control target
= control target key end

     0   :  { %s6673_s12 = smov 0   ;;  %s8425_s0 = inlined_call_operand.vmem [shape: bf16[2,18,18,8], index: 0, kind: input, shape index: {}]   ;;  %s8426_s1 = inlined_call_operand.vmem [shape: bf16[9,8,128], index: 1, kind: input, shape index: {}]   ;;  %s8427_s2 = inlined_call_operand.vmem [shape: bf16[2,16,16,128], index: 2, kind: output, shape index: {0}]   ;;  %s8428_s3 = inlined_call_operand.vmem [shape: f32[2,2,128], index: 3, kind: output, shape index: {1}]  }
   0x1 LB: > { %s5097_s13 = sadd.s32 4294967295, %s6651_s12   ;;  %p5101_p0 = scmp.ge.s32.totalorder %s6651_s12, 1  ;;  %s6651_s12 = sphi %s6673_s12, %s14_s12  }
   0x2   : > { %p140_p1 = scmp.lt.s32.totalorder %s6651_s12, 3 }
   0x4   : > { %p141_p2 = pnand %p5101_p0, %p140_p1 }
   0x6   : > { %144 = sbr.rel (%p141_p2) target bundleno = 604 (0x25c), region = 28 }
   0xd   : > { %v5106_v0 = vld [vmem:[%s8426_s1 + $0x4] sm:$0xf]  ;;  %vm718_vm0 = vcmask 1043456   ;;  %v5333_v1 = vld [vmem:[%s8426_s1 + $0x10] sm:$0xf]  ;;  %p168_p3 = scmp.lt.s32.totalorder %s5097_s13, 1 }
   0xe   : > { %6521 = vmatprep.subr.msk.bf16.mxu1 %vm718_vm0, %v5106_v0  ;;  %6525 = vmatprep.subr.msk.bf16.mxu0 %vm718_vm0, %v5333_v1  ;;  %v720_v2 = vsel %vm718_vm0, %v5106_v0, 0  ;;  %v6691_v3 = vsel %vm718_vm0, %v5333_v1, 0  ;;  %v215_v4 = vld [vmem:[%s8426_s1] sm:$0xf]  ;;  %v5398_v5 = vld [vmem:[%s8426_s1 + $0x14] sm:$0xf] }
   0xf   : > { %8442 = vst [vmem:[#allocation2_spill] sm:$0xff] %v6691_v3  ;;  %5958 = vmatpush3.bf16.msra.mxu1 %v720_v2  ;;  %6094 = vmatpush3.bf16.msra.mxu0 %v6691_v3  ;;  %s8497_s13 = smov (!%p168_p3, %s5097_s13), 1  ;;  %vm232_vm1 = vsmask.f32 3328  ;;  %vm233_vm2 = vsmask.f32 7440 }
  0x10   : > { %6522 = vmatprep.subr.msk.bf16.mxu1 %vm718_vm0, %v215_v4  ;;  %6527 = vmatprep.subr.msk.bf16.mxu0 %vm718_vm0, %v5398_v5  ;;  %s6531_s22 = smul.u32 216, %s8497_s13  ;;  %vm669_vm3 = vcmask 64512   ;;  %v6721_v17 = vsel %vm718_vm0, %v215_v4, 0  ;;  %v6727_v26 = vld [vmem:[%s8426_s1 + $0x18] sm:$0xf]  ;;  %vm6734_vm4 = vmor %vm232_vm1, %vm233_vm2  ;;  %v6740_v37 = vsel %vm718_vm0, %v5398_v5, 0 }
  0x11   : > { %v6744_v41 = vsel %vm718_vm0, %v6727_v26, 0  ;;  %vm1223_vm5 = vcmask 1042432   ;;  %vm1224_vm6 = vcmask 1046532   ;;  %s5676_s15 = sshll.u32 %s8497_s13, 7  ;;  %s5105_s19 = sshll.u32 %s8497_s13, 1  ;;  %vm4848_vm8 = vcmask 1040384  }
  0x12   : > { %s6708_s25 = scalar_lea.vmem %s8425_s0, %s6531_s22  ;;  %vm6960_vm7 = vmor %vm1223_vm5, %vm1224_vm6  ;;  %s8396_s18 = scalar_lea.vmem %s8427_s2, %s5676_s15 }
  0x13   : > { %v183_v6 = vld [vmem:[%s6708_s25] sm:$0xf]  ;;  %v184_v7 = vld [vmem:[%s6708_s25 + $0x4] sm:$0xf]  ;;  %v216_v8 = vld [vmem:[%s6708_s25 + $0x8] sm:$0x1]  ;;  %s181_s22 = scalar_lea.vmem %s8428_s3, %s5105_s19 }
  0x14   : > { %v236_v9 = vshrl.u32 %v183_v6, 16  ;;  %v239_v10 = vshll.u32 %v183_v6, 16  ;;  %v245_v11 = vshll.u32 %v184_v7, 16  ;;  %v249_v12 = vshrl.u32 %v184_v7, 16  ;;  %v5285_v13 = vld [vmem:[%s6708_s25 + $0xc] sm:$0xf] }
  0x15   : > { %v255_v14 = vshll.u32 %v216_v8, 16  ;;  %v6715_v15 = vld [vmem:[%s6708_s25 + $0x10] sm:$0xf]  ;;  %v6718_v16 = vld [vmem:[%s6708_s25 + $0x14] sm:$0x1]  ;;  %v2040_v23 = vshrl.u32 %v5285_v13, 16 }
  0x16   : > { %v238_v18 = vrot.slane %v236_v9, 4  ;;  %v241_v19 = vrot.slane %v239_v10, 5  ;;  %v247_v20 = vrot.slane %v245_v11, 5  ;;  %v251_v21 = vrot.slane %v249_v12, 4  ;;  %v185_v31 = vld [vmem:[%s6708_s25 + $0xc] sm:$0xf] }
  0x17   : > { %v257_v22 = vrot.slane %v255_v14, 5  ;;  %v2043_v24 = vshll.u32 %v5285_v13, 16  ;;  %v2049_v25 = vshll.u32 %v6715_v15, 16  ;;  %v2053_v29 = vshrl.u32 %v6715_v15, 16  ;;  %v186_v36 = vld [vmem:[%s6708_s25 + $0x10] sm:$0xf] }
  0x18   : > { %v242_v27 = vor.u32 %v241_v19, %v238_v18  ;;  %v252_v28 = vor.u32 %v251_v21, %v247_v20  ;;  %v2059_v30 = vshll.u32 %v6718_v16, 16  ;;  %v2042_v33 = vrot.slane %v2040_v23, 4  ;;  %v217_v44 = vld [vmem:[%s6708_s25 + $0x14] sm:$0x1]  ;;  %v5288_v55 = vld [vmem:[%s6708_s25 + $0x18] sm:$0xf] }
  0x19   : > { %v2045_v34 = vrot.slane %v2043_v24, 5  ;;  %v2051_v35 = vrot.slane %v2049_v25, 5  ;;  %v2055_v40 = vrot.slane %v2053_v29, 4  ;;  %v260_v45 = vshrl.u32 %v185_v31, 16  ;;  %v6753_v60 = vld [vmem:[%s6708_s25 + $0x1c] sm:$0xf] }
  0x1a   : > { %v243_v38 = vrot.slane %v242_v27, 4  ;;  %v253_v39 = vrot.slane %v252_v28, 4  ;;  %v2061_v43 = vrot.slane %v2059_v30, 5  ;;  %v263_v46 = vshll.u32 %v185_v31, 16  ;;  %v6761_v1 = vld [vmem:[%s6708_s25 + $0x20] sm:$0x1] }
  0x1b   : > { %v2046_v42 = vor.u32 %v2045_v34, %v2042_v33  ;;  %v2056_v49 = vor.u32 %v2055_v40, %v2051_v35  ;;  %v269_v50 = vshll.u32 %v186_v36, 16  ;;  %v262_v53 = vrot.slane %v260_v45, 4  ;;  %v187_v18 = vld [vmem:[%s6708_s25 + $0x18] sm:$0xf]  ;;  %v188_v23 = vld [vmem:[%s6708_s25 + $0x1c] sm:$0xf] }
  0x1c   : > { %v248_v47 = vsel %vm6734_vm4, %v243_v38, %v247_v20  ;;  %v258_v48 = vsel %vm6734_vm4, %v253_v39, %v257_v22  ;;  %v265_v54 = vrot.slane %v263_v46, 5  ;;  %v273_v58 = vshrl.u32 %v186_v36, 16  ;;  %v218_v31 = vld [vmem:[%s6708_s25 + $0x20] sm:$0x1]  ;;  %v5291_v40 = vld [vmem:[%s6708_s25 + $0x24] sm:$0xf] }
  0x1d   : > { %v5107_v51 = vcombine.low %v248_v47, %v258_v48  ;;  %v2047_v52 = vrot.slane %v2046_v42, 4  ;;  %v2057_v56 = vrot.slane %v2056_v49, 4  ;;  %v271_v57 = vrot.slane %v269_v50, 5  ;;  %v6784_v46 = vld [vmem:[%s6708_s25 + $0x28] sm:$0xf] }
  0x1e   : > { %v279_v59 = vshll.u32 %v217_v44, 16  ;;  %v2783_v62 = vrot.slane %v6715_v15, 5  ;;  %v2786_v63 = vrot.slane %v6718_v16, 5  ;;  %v266_v0 = vor.u32 %v265_v54, %v262_v53  ;;  %v6793_v54 = vld [vmem:[%s6708_s25 + $0x2c] sm:$0x1] }
  0x1f   : > { %5959 = vmatprep.mubr.msk.bf16.mxu1 %vm669_vm3, %v5107_v51  ;;  %v2052_v61 = vsel %vm6734_vm4, %v2047_v52, %v2051_v35  ;;  %v2062_v2 = vsel %vm6734_vm4, %v2057_v56, %v2061_v43  ;;  %v275_v4 = vrot.slane %v273_v58, 4  ;;  %v2064_v6 = vshrl.u32 %v5288_v55, 16  ;;  %v5187_v51 = vld [vmem:[%s8426_s1 + $0x8] sm:$0xf]  ;;  %v6993_v16 = vld [vmem:[%s6708_s25 + $0x7c] sm:$0xf] }
  0x20   : > { %v281_v5 = vrot.slane %v279_v59, 5  ;;  %v5334_v7 = vcombine.low %v2052_v61, %v2062_v2  ;;  %v267_v8 = vrot.slane %v266_v0, 4  ;;  %v2067_v9 = vshll.u32 %v5288_v55, 16  ;;  %v189_v0 = vld [vmem:[%s6708_s25 + $0x24] sm:$0xf] }
  0x21   : > { %v2073_v10 = vshll.u32 %v6753_v60, 16  ;;  %v276_v11 = vor.u32 %v275_v4, %v271_v57  ;;  %v2066_v12 = vrot.slane %v2064_v6, 4  ;;  %v2077_v13 = vshrl.u32 %v6753_v60, 16 }
  0x22   : > { %v2083_v14 = vshll.u32 %v6761_v1, 16  ;;  %6095 = vmatprep.mubr.msk.bf16.mxu0 %vm669_vm3, %v5334_v7  ;;  %v272_v19 = vsel %vm6734_vm4, %v267_v8, %v271_v57  ;;  %v2069_v20 = vrot.slane %v2067_v9, 5  ;;  %v2790_v22 = vrot.slane %v6753_v60, 5  ;;  %v190_v7 = vld [vmem:[%s6708_s25 + $0x28] sm:$0xf] }
  0x23   : > { %v2075_v21 = vrot.slane %v2073_v10, 5  ;;  %v277_v24 = vrot.slane %v276_v11, 4  ;;  %v2079_v25 = vrot.slane %v2077_v13, 4  ;;  %v2793_v28 = vrot.slane %v6761_v1, 5  ;;  %v219_v13 = vld [vmem:[%s6708_s25 + $0x2c] sm:$0x1] }
  0x24   : > { %v2085_v27 = vrot.slane %v2083_v14, 5  ;;  %v2070_v29 = vor.u32 %v2069_v20, %v2066_v12  ;;  %v6777_v30 = vrot.slane %v2790_v22, 4  ;;  %v284_v33 = vshrl.u32 %v187_v18, 16 }
  0x25   : > { %v287_v34 = vshll.u32 %v187_v18, 16  ;;  %v282_v35 = vsel %vm6734_vm4, %v277_v24, %v281_v5  ;;  %v2080_v36 = vor.u32 %v2079_v25, %v2075_v21  ;;  %v293_v38 = vshll.u32 %v188_v23, 16  ;;  %v5294_v24 = vld [vmem:[%s6708_s25 + $0x30] sm:$0xf] }
  0x26   : > { %v297_v39 = vshrl.u32 %v188_v23, 16  ;;  %v5108_v42 = vcombine.low %v272_v19, %v282_v35  ;;  %v2071_v43 = vrot.slane %v2070_v29, 4  ;;  %v286_v44 = vrot.slane %v284_v33, 4  ;;  %v6813_v33 = vld [vmem:[%s6708_s25 + $0x34] sm:$0xf] }
  0x27   : > { %v289_v45 = vrot.slane %v287_v34, 5  ;;  %v2081_v47 = vrot.slane %v2080_v36, 4  ;;  %v295_v48 = vrot.slane %v293_v38, 5  ;;  %v303_v50 = vshll.u32 %v218_v31, 16 }
  0x28   : > { %v299_v49 = vrot.slane %v297_v39, 4  ;;  %5960 = vmatmul.mubr.msk.bf16.vlgmr.msra.gmra.mrb[0].mxu1 %vm669_vm3, %v5108_v42  ;;  %v2076_v52 = vsel %vm6734_vm4, %v2071_v43, %v2075_v21  ;;  %v2088_v55 = vshrl.u32 %v5291_v40, 16  ;;  %v2091_v56 = vshll.u32 %v5291_v40, 16  ;;  %v6821_v40 = vld [vmem:[%s6708_s25 + $0x38] sm:$0x1] }
  0x29   : > { %v290_v53 = vor.u32 %v289_v45, %v286_v44  ;;  %5992 = vmatpush3.bf16.msra.mxu1 %v6721_v17  ;;  %v2086_v57 = vsel %vm6734_vm4, %v2081_v47, %v2085_v27  ;;  %v305_v59 = vrot.slane %v303_v50, 5  ;;  %v2097_v61 = vshll.u32 %v6784_v46, 16 }
  0x2a   : > { %v300_v58 = vor.u32 %v299_v49, %v295_v48  ;;  %v5335_v2 = vcombine.low %v2076_v52, %v2086_v57  ;;  %v2090_v5 = vrot.slane %v2088_v55, 4  ;;  %v2093_v6 = vrot.slane %v2091_v56, 5  ;;  %6523 = vmatprep.subr.msk.bf16.mxu1 %vm718_vm0, %v5187_v51  ;;  %v191_v52 = vld [vmem:[%s6708_s25 + $0x30] sm:$0xf] }
  0x2b   : > { %v291_v4 = vrot.slane %v290_v53, 4  ;;  %v2099_v9 = vrot.slane %v2097_v61, 5  ;;  %v2101_v17 = vshrl.u32 %v6784_v46, 16  ;;  %v2107_v10 = vshll.u32 %v6793_v54, 16 }
  0x2c   : > { %v301_v8 = vrot.slane %v300_v58, 4  ;;  %6096 = vmatmul.mubr.msk.bf16.vlgmr.msra.gmra.mrb[0].mxu0 %vm669_vm3, %v5335_v2  ;;  %v2094_v12 = vor.u32 %v2093_v6, %v2090_v5  ;;  %v308_v14 = vshrl.u32 %v189_v0, 16  ;;  %v311_v18 = vshll.u32 %v189_v0, 16  ;;  %v192_v58 = vld [vmem:[%s6708_s25 + $0x34] sm:$0xf] }
  0x2d   : > { %v296_v11 = vsel %vm6734_vm4, %v291_v4, %v295_v48  ;;  %6128 = vmatpush3.bf16.msra.mxu0 %v6740_v37  ;;  %v2103_v20 = vrot.slane %v2101_v17, 4  ;;  %v2109_v21 = vrot.slane %v2107_v10, 5  ;;  %v317_v23 = vshll.u32 %v190_v7, 16  ;;  %v220_v4 = vld [vmem:[%s6708_s25 + $0x38] sm:$0x1] }
  0x2e   : > { %v306_v19 = vsel %vm6734_vm4, %v301_v8, %v305_v59  ;;  %v2095_v27 = vrot.slane %v2094_v12, 4  ;;  %v310_v29 = vrot.slane %v308_v14, 4  ;;  %v313_v31 = vrot.slane %v311_v18, 5  ;;  %6528 = vmatprep.subr.msk.bf16.mxu0 %vm718_vm0, %v6727_v26  ;;  %v5297_v12 = vld [vmem:[%s6708_s25 + $0x3c] sm:$0xf] }
  0x2f   : > { %v5109_v25 = vcombine.low %v296_v11, %v306_v19  ;;  %v2104_v34 = vor.u32 %v2103_v20, %v2099_v9  ;;  %v319_v35 = vrot.slane %v317_v23, 5  ;;  %v321_v37 = vshrl.u32 %v190_v7, 16  ;;  %v6838_v20 = vld [vmem:[%s6708_s25 + $0x40] sm:$0xf] }
  0x30   : > { %v327_v36 = vshll.u32 %v219_v13, 16  ;;  %v2100_v38 = vsel %vm6734_vm4, %v2095_v27, %v2099_v9  ;;  %v314_v39 = vor.u32 %v313_v31, %v310_v29  ;;  %v2112_v42 = vshrl.u32 %v5294_v24, 16 }
  0x31   : > { %5963 = vmatprep.mubr.msk.bf16.mxu1 %vm669_vm3, %v5109_v25  ;;  %v2115_v43 = vshll.u32 %v5294_v24, 16  ;;  %v2105_v44 = vrot.slane %v2104_v34, 4  ;;  %v323_v45 = vrot.slane %v321_v37, 4  ;;  %v2121_v26 = vshll.u32 %v6813_v33, 16  ;;  %v6843_v34 = vld [vmem:[%s6708_s25 + $0x44] sm:$0x1] }
  0x32   : > { %v329_v47 = vrot.slane %v327_v36, 5  ;;  %v315_v48 = vrot.slane %v314_v39, 4  ;;  %v2114_v49 = vrot.slane %v2112_v42, 4  ;;  %v2125_v51 = vshrl.u32 %v6813_v33, 16  ;;  %v193_v42 = vld [vmem:[%s6708_s25 + $0x3c] sm:$0xf] }
  0x33   : > { %v2117_v50 = vrot.slane %v2115_v43, 5  ;;  %v2110_v53 = vsel %vm6734_vm4, %v2105_v44, %v2109_v21  ;;  %v324_v55 = vor.u32 %v323_v45, %v319_v35  ;;  %v2123_v56 = vrot.slane %v2121_v26, 5  ;;  %v194_v26 = vld [vmem:[%s6708_s25 + $0x40] sm:$0xf] }
  0x34   : > { %v2131_v57 = vshll.u32 %v6821_v40, 16  ;;  %v5336_v59 = vcombine.low %v2100_v38, %v2110_v53  ;;  %v320_v61 = vsel %vm6734_vm4, %v315_v48, %v319_v35  ;;  %v2127_v2 = vrot.slane %v2125_v51, 4 }
  0x35   : > { %v2118_v0 = vor.u32 %v2117_v50, %v2114_v49  ;;  %v325_v5 = vrot.slane %v324_v55, 4  ;;  %v332_v7 = vshrl.u32 %v191_v52, 16  ;;  %v335_v8 = vshll.u32 %v191_v52, 16 }
  0x36   : > { %v2133_v6 = vrot.slane %v2131_v57, 5  ;;  %6099 = vmatprep.mubr.msk.bf16.mxu0 %vm669_vm3, %v5336_v59  ;;  %v2128_v17 = vor.u32 %v2127_v2, %v2123_v56  ;;  %v341_v10 = vshll.u32 %v192_v58, 16  ;;  %v345_v11 = vshrl.u32 %v192_v58, 16  ;;  %v5300_v2 = vld [vmem:[%s6708_s25 + $0x48] sm:$0xf] }
  0x37   : > { %v2119_v9 = vrot.slane %v2118_v0, 4  ;;  %v330_v13 = vsel %vm6734_vm4, %v325_v5, %v329_v47  ;;  %v334_v14 = vrot.slane %v332_v7, 4  ;;  %v337_v18 = vrot.slane %v335_v8, 5  ;;  %v6861_v8 = vld [vmem:[%s6708_s25 + $0x4c] sm:$0xf] }
  0x38   : > { %v351_v19 = vshll.u32 %v220_v4, 16  ;;  %v5110_v21 = vcombine.low %v320_v61, %v330_v13  ;;  %v2129_v24 = vrot.slane %v2128_v17, 4  ;;  %v343_v25 = vrot.slane %v341_v10, 5  ;;  %v221_v61 = vld [vmem:[%s6708_s25 + $0x44] sm:$0x1] }
  0x39   : > { %v2124_v23 = vsel %vm6734_vm4, %v2119_v9, %v2123_v56  ;;  %v338_v27 = vor.u32 %v337_v18, %v334_v14  ;;  %v347_v29 = vrot.slane %v345_v11, 4  ;;  %v2136_v35 = vshrl.u32 %v5297_v12, 16 }
  0x3a   : > { %v353_v31 = vrot.slane %v351_v19, 5  ;;  %5964 = vmatmul.mubr.msk.bf16.gmra.mrb[4].mxu1 %vm669_vm3, %v5110_v21  ;;  %v2134_v37 = vsel %vm6734_vm4, %v2129_v24, %v2133_v6  ;;  %v2139_v36 = vshll.u32 %v5297_v12, 16  ;;  %v2145_v38 = vshll.u32 %v6838_v20, 16 }
  0x3b   : > { %v2149_v39 = vshrl.u32 %v6838_v20, 16  ;;  %v5337_v43 = vcombine.low %v2124_v23, %v2134_v37  ;;  %v339_v44 = vrot.slane %v338_v27, 4  ;;  %v348_v45 = vor.u32 %v347_v29, %v343_v25  ;;  %v6869_v23 = vld [vmem:[%s6708_s25 + $0x50] sm:$0x1]  ;;  %v6873_v27 = vld [vmem:[%s6708_s25 + $0x48] sm:$0xf] }
  0x3c   : > { %v2138_v47 = vrot.slane %v2136_v35, 4  ;;  %v2141_v48 = vrot.slane %v2139_v36, 5  ;;  %v2147_v49 = vrot.slane %v2145_v38, 5  ;;  %v2155_v51 = vshll.u32 %v6843_v34, 16  ;;  %v6876_v36 = vld [vmem:[%s6708_s25 + $0x4c] sm:$0xf] }
  0x3d   : > { %v2151_v50 = vrot.slane %v2149_v39, 4  ;;  %6100 = vmatmul.mubr.msk.bf16.gmra.mrb[4].mxu0 %vm669_vm3, %v5337_v43  ;;  %v344_v52 = vsel %vm6734_vm4, %v339_v44, %v343_v25  ;;  %v349_v53 = vrot.slane %v348_v45, 4  ;;  %v356_v55 = vshrl.u32 %v193_v42, 16 }
  0x3e   : > { %v359_v56 = vshll.u32 %v193_v42, 16  ;;  %v2142_v57 = vor.u32 %v2141_v48, %v2138_v47  ;;  %v2157_v59 = vrot.slane %v2155_v51, 5  ;;  %v365_v0 = vshll.u32 %v194_v26, 16 }
  0x3f   : > { %v2152_v58 = vor.u32 %v2151_v50, %v2147_v49  ;;  %v354_v4 = vsel %vm6734_vm4, %v349_v53, %v353_v31  ;;  %v358_v5 = vrot.slane %v356_v55, 4  ;;  %v369_v7 = vshrl.u32 %v194_v26, 16  ;;  %v222_v26 = vld [vmem:[%s6708_s25 + $0x50] sm:$0x1]  ;;  %v5303_v53 = vld [vmem:[%s6708_s25 + $0x54] sm:$0xf] }
  0x40   : > { %v361_v6 = vrot.slane %v359_v56, 5  ;;  %v5111_v9 = vcombine.low %v344_v52, %v354_v4  ;;  %v2143_v17 = vrot.slane %v2142_v57, 4  ;;  %v367_v11 = vrot.slane %v365_v0, 5  ;;  %v6892_v4 = vld [vmem:[%s6708_s25 + $0x58] sm:$0xf] }
  0x41   : > { %v2153_v10 = vrot.slane %v2152_v58, 4  ;;  %v371_v13 = vrot.slane %v369_v7, 4  ;;  %v375_v14 = vshll.u32 %v221_v61, 16  ;;  %v2160_v18 = vshrl.u32 %v5300_v2, 16 }
  0x42   : > { %v362_v12 = vor.u32 %v361_v6, %v358_v5  ;;  %5967 = vmatprep.mubr.msk.bf16.mxu1 %vm669_vm3, %v5111_v9  ;;  %v2148_v19 = vsel %vm6734_vm4, %v2143_v17, %v2147_v49  ;;  %v2163_v24 = vshll.u32 %v5300_v2, 16  ;;  %v2169_v25 = vshll.u32 %v6861_v8, 16 }
  0x43   : > { %v2158_v21 = vsel %vm6734_vm4, %v2153_v10, %v2157_v59  ;;  %v372_v35 = vor.u32 %v371_v13, %v367_v11  ;;  %v377_v37 = vrot.slane %v375_v14, 5  ;;  %v2162_v38 = vrot.slane %v2160_v18, 4 }
  0x44   : > { %v5338_v29 = vcombine.low %v2148_v19, %v2158_v21  ;;  %v363_v31 = vrot.slane %v362_v12, 4  ;;  %v2165_v39 = vrot.slane %v2163_v24, 5  ;;  %v2171_v42 = vrot.slane %v2169_v25, 5  ;;  %v6898_v12 = vld [vmem:[%s6708_s25 + $0x5c] sm:$0x1] }
  0x45   : > { %v2173_v43 = vshrl.u32 %v6861_v8, 16  ;;  %v373_v45 = vrot.slane %v372_v35, 4  ;;  %v2179_v47 = vshll.u32 %v6869_v23, 16  ;;  %v380_v48 = vshrl.u32 %v6873_v27, 16  ;;  %v6902_v24 = vld [vmem:[%s6708_s25 + $0x54] sm:$0xf] }
  0x46   : > { %6103 = vmatprep.mubr.msk.bf16.mxu0 %vm669_vm3, %v5338_v29  ;;  %v368_v44 = vsel %vm6734_vm4, %v363_v31, %v367_v11  ;;  %v2166_v49 = vor.u32 %v2165_v39, %v2162_v38  ;;  %v383_v51 = vshll.u32 %v6873_v27, 16  ;;  %v389_v52 = vshll.u32 %v6876_v36, 16 }
  0x47   : > { %v2175_v50 = vrot.slane %v2173_v43, 4  ;;  %v378_v55 = vsel %vm6734_vm4, %v373_v45, %v377_v37  ;;  %v2181_v56 = vrot.slane %v2179_v47, 5  ;;  %v382_v57 = vrot.slane %v380_v48, 4  ;;  %v6908_v37 = vld [vmem:[%s6708_s25 + $0x58] sm:$0xf] }
  0x48   : > { %v393_v58 = vshrl.u32 %v6876_v36, 16  ;;  %v5112_v59 = vcombine.low %v368_v44, %v378_v55  ;;  %v2167_v61 = vrot.slane %v2166_v49, 4  ;;  %v385_v2 = vrot.slane %v383_v51, 5 }
  0x49   : > { %v2176_v0 = vor.u32 %v2175_v50, %v2171_v42  ;;  %v391_v5 = vrot.slane %v389_v52, 5  ;;  %v399_v7 = vshll.u32 %v222_v26, 16  ;;  %v2184_v9 = vshrl.u32 %v5303_v53, 16  ;;  %v223_v26 = vld [vmem:[%s6708_s25 + $0x5c] sm:$0x1] }
  0x4a   : > { %v395_v6 = vrot.slane %v393_v58, 4  ;;  %5968 = vmatmul.mubr.msk.bf16.gmra.mrb[8].mxu1 %vm669_vm3, %v5112_v59  ;;  %v2172_v17 = vsel %vm6734_vm4, %v2167_v61, %v2171_v42  ;;  %v386_v11 = vor.u32 %v385_v2, %v382_v57  ;;  %v2187_v13 = vshll.u32 %v5303_v53, 16  ;;  %v5306_v53 = vld [vmem:[%s6708_s25 + $0x60] sm:$0xf]  ;;  %v6922_v59 = vld [vmem:[%s6708_s25 + $0x64] sm:$0xf] }
  0x4b   : > { %v2177_v10 = vrot.slane %v2176_v0, 4  ;;  %v401_v18 = vrot.slane %v399_v7, 5  ;;  %v2186_v19 = vrot.slane %v2184_v9, 4  ;;  %v2193_v21 = vshll.u32 %v6892_v4, 16  ;;  %v6929_v9 = vld [vmem:[%s6708_s25 + $0x68] sm:$0x1] }
  0x4c   : > { %v396_v14 = vor.u32 %v395_v6, %v391_v5  ;;  %v387_v29 = vrot.slane %v386_v11, 4  ;;  %v2189_v31 = vrot.slane %v2187_v13, 5  ;;  %v2197_v35 = vshrl.u32 %v6892_v4, 16 }
  0x4d   : > { %v2182_v25 = vsel %vm6734_vm4, %v2177_v10, %v2181_v56  ;;  %v2195_v42 = vrot.slane %v2193_v21, 5  ;;  %v2203_v43 = vshll.u32 %v6898_v12, 16  ;;  %v404_v48 = vshrl.u32 %v6902_v24, 16 }
  0x4e   : > { %v5339_v38 = vcombine.low %v2172_v17, %v2182_v25  ;;  %v397_v39 = vrot.slane %v396_v14, 4  ;;  %v392_v44 = vsel %vm6734_vm4, %v387_v29, %v391_v5  ;;  %v2190_v45 = vor.u32 %v2189_v31, %v2186_v19  ;;  %v6933_v19 = vld [vmem:[%s6708_s25 + $0x60] sm:$0xf] }
  0x4f   : > { %v2199_v47 = vrot.slane %v2197_v35, 4  ;;  %v2205_v50 = vrot.slane %v2203_v43, 5  ;;  %v407_v51 = vshll.u32 %v6902_v24, 16  ;;  %v413_v52 = vshll.u32 %v6908_v37, 16  ;;  %v6939_v35 = vld [vmem:[%s6708_s25 + $0x64] sm:$0xf] }
  0x50   : > { %6104 = vmatmul.mubr.msk.bf16.gmra.mrb[8].mxu0 %vm669_vm3, %v5339_v38  ;;  %v402_v49 = vsel %vm6734_vm4, %v397_v39, %v401_v18  ;;  %v2191_v56 = vrot.slane %v2190_v45, 4  ;;  %v406_v58 = vrot.slane %v404_v48, 4  ;;  %v417_v2 = vshrl.u32 %v6908_v37, 16 }
  0x51   : > { %v5113_v55 = vcombine.low %v392_v44, %v402_v49  ;;  %v2200_v57 = vor.u32 %v2199_v47, %v2195_v42  ;;  %v409_v61 = vrot.slane %v407_v51, 5  ;;  %v415_v0 = vrot.slane %v413_v52, 5 }
  0x52   : > { %v423_v5 = vshll.u32 %v223_v26, 16  ;;  %v2196_v6 = vsel %vm6734_vm4, %v2191_v56, %v2195_v42  ;;  %v2208_v17 = vshrl.u32 %v5306_v53, 16  ;;  %v2211_v10 = vshll.u32 %v5306_v53, 16 }
  0x53   : > { %5971 = vmatprep.mubr.msk.bf16.mxu1 %vm669_vm3, %v5113_v55  ;;  %v2201_v7 = vrot.slane %v2200_v57, 4  ;;  %v410_v11 = vor.u32 %v409_v61, %v406_v58  ;;  %v419_v13 = vrot.slane %v417_v2, 4  ;;  %v2217_v18 = vshll.u32 %v6922_v59, 16  ;;  %v5366_v58 = vld [vmem:[%s6708_s25 + $0xc] sm:$0xe] }
  0x54   : > { %v425_v14 = vrot.slane %v423_v5, 5  ;;  %v2210_v25 = vrot.slane %v2208_v17, 4  ;;  %v2213_v29 = vrot.slane %v2211_v10, 5  ;;  %v2221_v31 = vshrl.u32 %v6922_v59, 16 }
  0x55   : > { %v2206_v21 = vsel %vm6734_vm4, %v2201_v7, %v2205_v50  ;;  %v411_v39 = vrot.slane %v410_v11, 4  ;;  %v420_v42 = vor.u32 %v419_v13, %v415_v0  ;;  %v2219_v43 = vrot.slane %v2217_v18, 5  ;;  %v224_v50 = vld [vmem:[%s6708_s25 + $0x68] sm:$0x1] }
  0x56   : > { %v5340_v38 = vcombine.low %v2196_v6, %v2206_v21  ;;  %v2214_v44 = vor.u32 %v2213_v29, %v2210_v25  ;;  %v2223_v45 = vrot.slane %v2221_v31, 4  ;;  %v2227_v47 = vshll.u32 %v6929_v9, 16  ;;  %v6967_v29 = vld [vmem:[%s6708_s25 + $0x70] sm:$0xf] }
  0x57   : > { %v428_v26 = vshrl.u32 %v6933_v19, 16  ;;  %v416_v48 = vsel %vm6734_vm4, %v411_v39, %v415_v0  ;;  %v421_v49 = vrot.slane %v420_v42, 4  ;;  %v431_v51 = vshll.u32 %v6933_v19, 16  ;;  %v6954_v0 = vld [vmem:[%s6708_s25 + $0x6c] sm:$0xf] }
  0x58   : > { %6107 = vmatprep.mubr.msk.bf16.mxu0 %vm669_vm3, %v5340_v38  ;;  %v437_v52 = vshll.u32 %v6939_v35, 16  ;;  %v2215_v53 = vrot.slane %v2214_v44, 4  ;;  %v2224_v55 = vor.u32 %v2223_v45, %v2219_v43  ;;  %v2229_v56 = vrot.slane %v2227_v47, 5 }
  0x59   : > { %v430_v57 = vrot.slane %v428_v26, 4  ;;  %v426_v61 = vsel %vm6734_vm4, %v421_v49, %v425_v14  ;;  %v433_v2 = vrot.slane %v431_v51, 5  ;;  %v441_v6 = vshrl.u32 %v6939_v35, 16  ;;  %v225_v26 = vld [vmem:[%s6708_s25 + $0x74] sm:$0x1] }
  0x5a   : > { %v439_v5 = vrot.slane %v437_v52, 5  ;;  %v5114_v7 = vcombine.low %v416_v48, %v426_v61  ;;  %v2220_v17 = vsel %vm6734_vm4, %v2215_v53, %v2219_v43  ;;  %v2225_v10 = vrot.slane %v2224_v55, 4  ;;  %v5367_v48 = vld [vmem:[%s6708_s25 + $0x18] sm:$0xe] }
  0x5b   : > { %v447_v11 = vshll.u32 %v224_v50, 16  ;;  %v434_v14 = vor.u32 %v433_v2, %v430_v57  ;;  %v443_v18 = vrot.slane %v441_v6, 4  ;;  %v5382_v21 = vrot.slane %v5366_v58, 9  ;;  %v6986_v53 = vld [vmem:[%s6708_s25 + $0x78] sm:$0xf] }
  0x5c   : > { %v2785_v25 = vrot.slane %v2783_v62, 4  ;;  %5972 = vmatmul.mubr.msk.bf16.gmra.mrb[12].mxu1 %vm669_vm3, %v5114_v7  ;;  %v2230_v31 = vsel %vm6734_vm4, %v2225_v10, %v2229_v56  ;;  %v452_v39 = vshrl.u32 %v6954_v0, 16  ;;  %v455_v42 = vshll.u32 %v6954_v0, 16  ;;  %v226_v57 = vld [vmem:[%s6708_s25 + $0x80] sm:$0x1] }
  0x5d   : > { %v449_v38 = vrot.slane %v447_v11, 5  ;;  %v5341_v43 = vcombine.low %v2220_v17, %v2230_v31  ;;  %v435_v44 = vrot.slane %v434_v14, 4  ;;  %v444_v45 = vor.u32 %v443_v18, %v439_v5  ;;  %v5368_v10 = vld [vmem:[%s6708_s25 + $0x24] sm:$0xe] }
  0x5e   : > { %v2784_v47 = vsel %vm6960_vm7, %v5382_v21, %v2783_v62  ;;  %v2787_v49 = vsel %vm6960_vm7, %v2785_v25, %v2786_v63  ;;  %v454_v50 = vrot.slane %v452_v39, 4  ;;  %v457_v51 = vrot.slane %v455_v42, 5  ;;  %v7012_v39 = vld [vmem:[%s6708_s25 + $0x84] sm:$0xf] }
  0x5f   : > { %v461_v52 = vshll.u32 %v6967_v29, 16  ;;  %6108 = vmatmul.mubr.msk.bf16.gmra.mrb[12].mxu0 %vm669_vm3, %v5341_v43  ;;  %v440_v15 = vsel %vm6734_vm4, %v435_v44, %v439_v5  ;;  %v445_v62 = vrot.slane %v444_v45, 4  ;;  %v5399_v55 = vcombine.low %v2784_v47, %v2787_v49  ;;  %v7020_v43 = vld [vmem:[%s6708_s25 + $0x88] sm:$0xf] }
  0x60   : > { %v465_v56 = vshrl.u32 %v6967_v29, 16  ;;  %v458_v63 = vor.u32 %v457_v51, %v454_v50  ;;  %v471_v61 = vshll.u32 %v225_v26, 16  ;;  %v5383_v2 = vrot.slane %v5367_v48, 9 }
  0x61   : > { %v463_v58 = vrot.slane %v461_v52, 5  ;;  %v450_v6 = vsel %vm6734_vm4, %v445_v62, %v449_v38  ;;  %6129 = vmatprep.mubr.msk.bf16.mxu0 %vm669_vm3, %v5399_v55  ;;  %v2794_v5 = vsel %vm6960_vm7, %v6777_v30, %v2793_v28  ;;  %v476_v17 = vshrl.u32 %v6986_v53, 16  ;;  %v227_v52 = vld [vmem:[%s6708_s25 + $0x8c] sm:$0x1] }
  0x62   : > { %v467_v7 = vrot.slane %v465_v56, 4  ;;  %v5115_v11 = vcombine.low %v440_v15, %v450_v6  ;;  %v459_v14 = vrot.slane %v458_v63, 4  ;;  %v473_v18 = vrot.slane %v471_v61, 5 }
  0x63   : > { %v2791_v21 = vsel %vm6960_vm7, %v5383_v2, %v2790_v22  ;;  %v478_v38 = vrot.slane %v476_v17, 4  ;;  %v479_v1 = vshll.u32 %v6986_v53, 16  ;;  %v485_v30 = vshll.u32 %v6993_v16, 16  ;;  %v7025_v22 = vld [vmem:[%s8426_s1 + $0x1c] sm:$0xf] }
  0x64   : > { %v468_v25 = vor.u32 %v467_v7, %v463_v58  ;;  %v5400_v31 = vcombine.low %v2791_v21, %v2794_v5  ;;  %5975 = vmatprep.mubr.msk.bf16.mxu1 %vm669_vm3, %v5115_v11  ;;  %v464_v28 = vsel %vm6734_vm4, %v459_v14, %v463_v58  ;;  %v489_v60 = vshrl.u32 %v6993_v16, 16  ;;  %v7044_v5 = vld [vmem:[%s6708_s25 + $0x90] sm:$0xf] }
  0x65   : > { %v495_v42 = vshll.u32 %v226_v57, 16  ;;  %v481_v45 = vrot.slane %v479_v1, 5  ;;  %v5384_v47 = vrot.slane %v5368_v10, 9  ;;  %v2797_v26 = vrot.slane %v6784_v46, 5  ;;  %v5369_v57 = vld [vmem:[%s6708_s25 + $0x30] sm:$0xe] }
  0x66   : > { %v469_v44 = vrot.slane %v468_v25, 4  ;;  %v487_v48 = vrot.slane %v485_v30, 5  ;;  %v491_v49 = vrot.slane %v489_v60, 4  ;;  %v2800_v51 = vrot.slane %v6793_v54, 5  ;;  %v7056_v30 = vld [vmem:[%s6708_s25 + $0x94] sm:$0xf] }
  0x67   : > { %v497_v50 = vrot.slane %v495_v42, 5  ;;  %6130 = vmatmul.mubr.msk.bf16.vlgmr.msra.gmra.mrb[0].mxu0 %vm669_vm3, %v5400_v31  ;;  %v482_v62 = vor.u32 %v481_v45, %v478_v38  ;;  %v2798_v55 = vsel %vm6960_vm7, %v5384_v47, %v2797_v26  ;;  %v2799_v56 = vrot.slane %v2797_v26, 4  ;;  %v228_v60 = vld [vmem:[%s6708_s25 + $0x98] sm:$0x1]  ;;  %v5370_v26 = vld [vmem:[%s6708_s25 + $0x3c] sm:$0xe] }
  0x68   : > { %v474_v15 = vsel %vm6734_vm4, %v469_v44, %v473_v18  ;;  %6162 = vmatpush3.bf16.msra.mxu0 %v6744_v41  ;;  %v492_v46 = vor.u32 %v491_v49, %v487_v48  ;;  %v500_v58 = vshrl.u32 %v7012_v39, 16  ;;  %v503_v54 = vshll.u32 %v7012_v39, 16 }
  0x69   : > { %v5116_v63 = vcombine.low %v464_v28, %v474_v15  ;;  %v483_v61 = vrot.slane %v482_v62, 4  ;;  %v2801_v2 = vsel %vm6960_vm7, %v2799_v56, %v2800_v51  ;;  %v509_v6 = vshll.u32 %v7020_v43, 16  ;;  %6529 = vmatprep.subr.msk.bf16.mxu0 %vm718_vm0, %v7025_v22 }
  0x6a   : > { %v513_v7 = vshrl.u32 %v7020_v43, 16  ;;  %v493_v41 = vrot.slane %v492_v46, 4  ;;  %v5401_v17 = vcombine.low %v2798_v55, %v2801_v2  ;;  %v502_v10 = vrot.slane %v500_v58, 4  ;;  %v7076_v46 = vld [vmem:[%s6708_s25 + $0xa0] sm:$0xf] }
  0x6b   : > { %5976 = vmatmul.mubr.msk.bf16.gmra.mrb[16].mxu1 %vm669_vm3, %v5116_v63  ;;  %v505_v11 = vrot.slane %v503_v54, 5  ;;  %v488_v14 = vsel %vm6734_vm4, %v483_v61, %v487_v48  ;;  %v511_v18 = vrot.slane %v509_v6, 5  ;;  %v519_v25 = vshll.u32 %v227_v52, 16  ;;  %v7065_v52 = vld [vmem:[%s6708_s25 + $0x9c] sm:$0xf] }
  0x6c   : > { %v515_v21 = vrot.slane %v513_v7, 4  ;;  %v498_v31 = vsel %vm6734_vm4, %v493_v41, %v497_v50  ;;  %6133 = vmatprep.mubr.msk.bf16.mxu0 %vm669_vm3, %v5401_v17  ;;  %v5385_v1 = vrot.slane %v5369_v57, 9  ;;  %v2804_v28 = vrot.slane %v6813_v33, 5 }
  0x6d   : > { %v506_v38 = vor.u32 %v505_v11, %v502_v10  ;;  %v5117_v42 = vcombine.low %v488_v14, %v498_v31  ;;  %v521_v45 = vrot.slane %v519_v25, 5  ;;  %v2807_v47 = vrot.slane %v6821_v40, 5  ;;  %v229_v10 = vld [vmem:[%s6708_s25 + $0xa4] sm:$0x1]  ;;  %v5371_v11 = vld [vmem:[%s6708_s25 + $0x48] sm:$0xe] }
  0x6e   : > { %v516_v44 = vor.u32 %v515_v21, %v511_v18  ;;  %v2805_v49 = vsel %vm6960_vm7, %v5385_v1, %v2804_v28  ;;  %v2806_v50 = vrot.slane %v2804_v28, 4  ;;  %v524_v51 = vshrl.u32 %v7044_v5, 16 }
  0x6f   : > { %v507_v48 = vrot.slane %v506_v38, 4  ;;  %5979 = vmatprep.mubr.msk.bf16.mxu1 %vm669_vm3, %v5117_v42  ;;  %v527_v15 = vshll.u32 %v7044_v5, 16  ;;  %v533_v62 = vshll.u32 %v7056_v30, 16  ;;  %v537_v40 = vshrl.u32 %v7056_v30, 16 }
  0x70   : > { %v517_v33 = vrot.slane %v516_v44, 4  ;;  %v2808_v56 = vsel %vm6960_vm7, %v2806_v50, %v2807_v47  ;;  %v526_v57 = vrot.slane %v524_v51, 4  ;;  %v543_v63 = vshll.u32 %v228_v60, 16 }
  0x71   : > { %v512_v55 = vsel %vm6734_vm4, %v507_v48, %v511_v18  ;;  %v5402_v54 = vcombine.low %v2805_v49, %v2808_v56  ;;  %v529_v61 = vrot.slane %v527_v15, 5  ;;  %v535_v2 = vrot.slane %v533_v62, 5  ;;  %v7102_v56 = vld [vmem:[%s6708_s25 + $0xac] sm:$0xf] }
  0x72   : > { %v522_v58 = vsel %vm6734_vm4, %v517_v33, %v521_v45  ;;  %v539_v7 = vrot.slane %v537_v40, 4  ;;  %v545_v41 = vrot.slane %v543_v63, 5  ;;  %v5386_v17 = vrot.slane %v5370_v26, 9  ;;  %v7097_v33 = vld [vmem:[%s6708_s25 + $0xa8] sm:$0xf] }
  0x73   : > { %v5118_v6 = vcombine.low %v512_v55, %v522_v58  ;;  %6134 = vmatmul.mubr.msk.bf16.gmra.mrb[4].mxu0 %vm669_vm3, %v5402_v54  ;;  %v530_v14 = vor.u32 %v529_v61, %v526_v57  ;;  %v2811_v18 = vrot.slane %v6838_v20, 5  ;;  %v2814_v21 = vrot.slane %v6843_v34, 5  ;;  %v230_v61 = vld [vmem:[%s6708_s25 + $0xb0] sm:$0x1] }
  0x74   : > { %v548_v25 = vshrl.u32 %v7065_v52, 16  ;;  %v540_v31 = vor.u32 %v539_v7, %v535_v2  ;;  %v551_v38 = vshll.u32 %v7065_v52, 16  ;;  %v557_v1 = vshll.u32 %v7076_v46, 16 }
  0x75   : > { %5980 = vmatmul.mubr.msk.bf16.gmra.mrb[20].mxu1 %vm669_vm3, %v5118_v6  ;;  %v561_v28 = vshrl.u32 %v7076_v46, 16  ;;  %v531_v60 = vrot.slane %v530_v14, 4  ;;  %v2812_v42 = vsel %vm6960_vm7, %v5386_v17, %v2811_v18  ;;  %v2813_v20 = vrot.slane %v2811_v18, 4  ;;  %v7117_v14 = vld [vmem:[%s6708_s25 + $0xb4] sm:$0xf] }
  0x76   : > { %v550_v44 = vrot.slane %v548_v25, 4  ;;  %v541_v34 = vrot.slane %v540_v31, 4  ;;  %v553_v45 = vrot.slane %v551_v38, 5  ;;  %v559_v47 = vrot.slane %v557_v1, 5 }
  0x77   : > { %v563_v26 = vrot.slane %v561_v28, 4  ;;  %v536_v48 = vsel %vm6734_vm4, %v531_v60, %v535_v2  ;;  %v2815_v49 = vsel %vm6960_vm7, %v2813_v20, %v2814_v21  ;;  %v567_v50 = vshll.u32 %v229_v10, 16  ;;  %v5372_v2 = vld [vmem:[%s6708_s25 + $0x54] sm:$0xe] }
  0x78   : > { %v5387_v51 = vrot.slane %v5371_v11, 9  ;;  %v546_v15 = vsel %vm6734_vm4, %v541_v34, %v545_v41  ;;  %v5403_v62 = vcombine.low %v2812_v42, %v2815_v49  ;;  %v554_v40 = vor.u32 %v553_v45, %v550_v44  ;;  %v7126_v42 = vld [vmem:[%s6708_s25 + $0xb8] sm:$0xf]  ;;  %v231_v49 = vld [vmem:[%s6708_s25 + $0xbc] sm:$0x1] }
  0x79   : > { %v564_v55 = vor.u32 %v563_v26, %v559_v47  ;;  %v5119_v57 = vcombine.low %v536_v48, %v546_v15  ;;  %v569_v63 = vrot.slane %v567_v50, 5  ;;  %v2818_v58 = vrot.slane %v6861_v8, 5 }
  0x7a   : > { %v2821_v54 = vrot.slane %v6869_v23, 5  ;;  %6137 = vmatprep.mubr.msk.bf16.mxu0 %vm669_vm3, %v5403_v62  ;;  %v555_v6 = vrot.slane %v554_v40, 4  ;;  %v572_v41 = vshrl.u32 %v7097_v33, 16  ;;  %v575_v17 = vshll.u32 %v7097_v33, 16 }
  0x7b   : > { %v565_v7 = vrot.slane %v564_v55, 4  ;;  %5983 = vmatprep.mubr.msk.bf16.mxu1 %vm669_vm3, %v5119_v57  ;;  %v2819_v10 = vsel %vm6960_vm7, %v5387_v51, %v2818_v58  ;;  %v2820_v11 = vrot.slane %v2818_v58, 4  ;;  %v581_v8 = vshll.u32 %v7102_v56, 16  ;;  %v5373_v55 = vld [vmem:[%s6708_s25 + $0x60] sm:$0xe] }
  0x7c   : > { %v585_v23 = vshrl.u32 %v7102_v56, 16  ;;  %v560_v18 = vsel %vm6734_vm4, %v555_v6, %v559_v47  ;;  %v574_v25 = vrot.slane %v572_v41, 4  ;;  %v577_v31 = vrot.slane %v575_v17, 5  ;;  %v5374_v6 = vld [vmem:[%s6708_s25 + $0x6c] sm:$0xe] }
  0x7d   : > { %v570_v21 = vsel %vm6734_vm4, %v565_v7, %v569_v63  ;;  %v2822_v1 = vsel %vm6960_vm7, %v2820_v11, %v2821_v54  ;;  %v583_v28 = vrot.slane %v581_v8, 5  ;;  %v591_v34 = vshll.u32 %v230_v61, 16  ;;  %v5310_v11 = vld [vmem:[%s6708_s25 + $0x70] sm:$0xf]  ;;  %v5311_v8 = vld [vmem:[%s6708_s25 + $0x74] sm:$0x1] }
  0x7e   : > { %v5120_v38 = vcombine.low %v560_v18, %v570_v21  ;;  %v587_v60 = vrot.slane %v585_v23, 4  ;;  %v5404_v20 = vcombine.low %v2819_v10, %v2822_v1  ;;  %v578_v44 = vor.u32 %v577_v31, %v574_v25 }
  0x7f   : > { %v5388_v45 = vrot.slane %v5372_v2, 9  ;;  %v2825_v26 = vrot.slane %v6892_v4, 5  ;;  %v2828_v48 = vrot.slane %v6898_v12, 5  ;;  %v596_v50 = vshrl.u32 %v7117_v14, 16 }
  0x80   : > { %5984 = vmatmul.mubr.msk.bf16.gmra.mrb[24].mxu1 %vm669_vm3, %v5120_v38  ;;  %v588_v47 = vor.u32 %v587_v60, %v583_v28  ;;  %6138 = vmatmul.mubr.msk.bf16.gmra.mrb[8].mxu0 %vm669_vm3, %v5404_v20  ;;  %v579_v51 = vrot.slane %v578_v44, 4  ;;  %v593_v15 = vrot.slane %v591_v34, 5  ;;  %v599_v62 = vshll.u32 %v7117_v14, 16 }
  0x81   : > { %v605_v40 = vshll.u32 %v7126_v42, 16  ;;  %v2826_v4 = vsel %vm6960_vm7, %v5388_v45, %v2825_v26  ;;  %v2827_v12 = vrot.slane %v2825_v26, 4  ;;  %v598_v63 = vrot.slane %v596_v50, 4 }
  0x82   : > { %v589_v57 = vrot.slane %v588_v47, 4  ;;  %v584_v58 = vsel %vm6734_vm4, %v579_v51, %v583_v28  ;;  %v601_v54 = vrot.slane %v599_v62, 5  ;;  %v609_v2 = vshrl.u32 %v7126_v42, 16  ;;  %v5375_v47 = vld [vmem:[%s6708_s25 + $0x78] sm:$0xe] }
  0x83   : > { %v607_v61 = vrot.slane %v605_v40, 5  ;;  %v2829_v41 = vsel %vm6960_vm7, %v2827_v12, %v2828_v48  ;;  %v615_v17 = vshll.u32 %v231_v49, 16  ;;  %v5389_v10 = vrot.slane %v5373_v55, 9  ;;  %v6588_v51 = vld [vmem:[%s6708_s25] sm:$0xf] }
  0x84   : > { %v594_v7 = vsel %vm6734_vm4, %v589_v57, %v593_v15  ;;  %v5405_v18 = vcombine.low %v2826_v4, %v2829_v41  ;;  %v602_v21 = vor.u32 %v601_v54, %v598_v63  ;;  %v611_v25 = vrot.slane %v609_v2, 4  ;;  %v7164_v15 = vld [vmem:[%s6708_s25 + $0x4] sm:$0xf]  ;;  %v7168_v40 = vld [vmem:[%s6708_s25 + $0x7c] sm:$0xf] }
  0x85   : > { %v5121_v23 = vcombine.low %v584_v58, %v594_v7  ;;  %v617_v31 = vrot.slane %v615_v17, 5  ;;  %v2832_v38 = vrot.slane %v6922_v59, 5  ;;  %v2835_v1 = vrot.slane %v6929_v9, 5  ;;  %v7171_v55 = vld [vmem:[%s6708_s25 + $0x80] sm:$0x1] }
  0x86   : > { %v5390_v28 = vrot.slane %v5374_v6, 9  ;;  %6141 = vmatprep.mubr.msk.bf16.mxu0 %vm669_vm3, %v5405_v18  ;;  %v603_v60 = vrot.slane %v602_v21, 4  ;;  %v612_v20 = vor.u32 %v611_v25, %v607_v61  ;;  %v2839_v44 = vrot.slane %v5310_v11, 5  ;;  %v5316_v57 = vld [vmem:[%s6708_s25 + $0x88] sm:$0xf] }
  0x87   : > { %5987 = vmatprep.mubr.msk.bf16.mxu1 %vm669_vm3, %v5121_v23  ;;  %v2842_v34 = vrot.slane %v5311_v8, 5  ;;  %v2833_v45 = vsel %vm6960_vm7, %v5389_v10, %v2832_v38  ;;  %v2834_v59 = vrot.slane %v2832_v38, 4  ;;  %v5139_v62 = vcombine.low %v6588_v51, %v7164_v15  ;;  %v5317_v54 = vld [vmem:[%s6708_s25 + $0x8c] sm:$0x1]  ;;  %v5319_v17 = vld [vmem:[%s6708_s25 + $0x94] sm:$0xf] }
  0x88   : > { %v608_v9 = vsel %vm6734_vm4, %v603_v60, %v607_v61  ;;  %v613_v26 = vrot.slane %v612_v20, 4  ;;  %v2840_v48 = vsel %vm6960_vm7, %v5390_v28, %v2839_v44  ;;  %v2841_v49 = vrot.slane %v2839_v44, 4  ;;  %v5376_v61 = vld [vmem:[%s6708_s25 + $0x84] sm:$0xe]  ;;  %v5377_v23 = vld [vmem:[%s6708_s25 + $0x90] sm:$0xe] }
  0x89   : > { %v2836_v50 = vsel %vm6960_vm7, %v2834_v59, %v2835_v1  ;;  %v5391_v58 = vrot.slane %v5375_v47, 9  ;;  %v2846_v7 = vrot.slane %v7168_v40, 5  ;;  %v2849_v41 = vrot.slane %v7171_v55, 5  ;;  %v5320_v25 = vld [vmem:[%s6708_s25 + $0x98] sm:$0x1] }
  0x8a   : > { %v618_v4 = vsel %vm6734_vm4, %v613_v26, %v617_v31  ;;  %v5406_v12 = vcombine.low %v2833_v45, %v2836_v50  ;;  %v2843_v63 = vsel %vm6960_vm7, %v2841_v49, %v2842_v34  ;;  %v5392_v10 = vrot.slane %v5376_v61, 9  ;;  %v5322_v31 = vld [vmem:[%s6708_s25 + $0xa0] sm:$0xf]  ;;  %v5323_v60 = vld [vmem:[%s6708_s25 + $0xa4] sm:$0x1] }
  0x8b   : > { %v5122_v2 = vcombine.low %v608_v9, %v618_v4  ;;  %v5407_v6 = vcombine.low %v2840_v48, %v2843_v63  ;;  %v2853_v11 = vrot.slane %v5316_v57, 5  ;;  %v2856_v8 = vrot.slane %v5317_v54, 5  ;;  %v5378_v20 = vld [vmem:[%s6708_s25 + $0x9c] sm:$0xe]  ;;  %v6590_v44 = vld [vmem:[%s6708_s25 + $0xc] sm:$0xf] }
  0x8c   : > { %6142 = vmatmul.mubr.msk.bf16.gmra.mrb[12].mxu0 %vm669_vm3, %v5406_v12  ;;  %v2847_v18 = vsel %vm6960_vm7, %v5391_v58, %v2846_v7  ;;  %v2848_v21 = vrot.slane %v2846_v7, 4  ;;  %v2860_v28 = vrot.slane %v5319_v17, 5  ;;  %v7198_v34 = vld [vmem:[%s6708_s25 + $0x10] sm:$0xf]  ;;  %v6592_v47 = vld [vmem:[%s6708_s25 + $0x18] sm:$0xf] }
  0x8d   : > { %5988 = vmatmul.mubr.msk.bf16.gmra.mrb[28].mxu1 %vm669_vm3, %v5122_v2  ;;  %6145 = vmatprep.mubr.msk.bf16.mxu0 %vm669_vm3, %v5407_v6  ;;  %v2854_v38 = vsel %vm6960_vm7, %v5392_v10, %v2853_v11  ;;  %v2855_v1 = vrot.slane %v2853_v11, 4  ;;  %v5140_v45 = vcombine.low %v6590_v44, %v7198_v34  ;;  %v7205_v9 = vld [vmem:[%s6708_s25 + $0x1c] sm:$0xf]  ;;  %v5393_v48 = vrot.slane %v5377_v23, 9  ;;  %v5325_v57 = vld [vmem:[%s6708_s25 + $0xac] sm:$0xf] }
  0x8e   : > { %5993 = vmatprep.mubr.msk.bf16.mxu1 %vm669_vm3, %v5139_v62  ;;  %v2850_v59 = vsel %vm6960_vm7, %v2848_v21, %v2849_v41  ;;  %v5141_v26 = vcombine.low %v6592_v47, %v7205_v9  ;;  %v2862_v51 = vrot.slane %v2860_v28, 4  ;;  %v2863_v62 = vrot.slane %v5320_v25, 5  ;;  %v6594_v54 = vld [vmem:[%s8426_s1 + $0x8] sm:$0xf]  ;;  %v5328_v2 = vld [vmem:[%s6708_s25 + $0xb8] sm:$0xf] }
  0x8f   : > { %v5408_v49 = vcombine.low %v2847_v18, %v2850_v59  ;;  %v2857_v50 = vsel %vm6960_vm7, %v2855_v1, %v2856_v8  ;;  %v5394_v12 = vrot.slane %v5378_v20, 9  ;;  %v2867_v63 = vrot.slane %v5322_v31, 5  ;;  %v7220_v7 = vld [vmem:[%s8426_s1 + $0xc] sm:$0xf]  ;;  %v5326_v10 = vld [vmem:[%s6708_s25 + $0xb0] sm:$0x1] }
  0x90   : > { %v5409_v4 = vcombine.low %v2854_v38, %v2857_v50  ;;  %v2870_v58 = vrot.slane %v5323_v60, 5  ;;  %v1437_v61 = vsel %vm718_vm0, %v6594_v54, 0  ;;  %v2861_v41 = vsel %vm6960_vm7, %v5393_v48, %v2860_v28  ;;  %v5379_v11 = vld [vmem:[%s6708_s25 + $0xa8] sm:$0xe]  ;;  %v5329_v25 = vld [vmem:[%s6708_s25 + $0xbc] sm:$0x1] }
  0x91   : > { %v2869_v6 = vrot.slane %v2867_v63, 4  ;;  %v2864_v17 = vsel %vm6960_vm7, %v2862_v51, %v2863_v62  ;;  %v2874_v8 = vrot.slane %v5325_v57, 5  ;;  %v2868_v23 = vsel %vm6960_vm7, %v5394_v12, %v2867_v63  ;;  %v5380_v31 = vld [vmem:[%s6708_s25 + $0xb4] sm:$0xe]  ;;  %v6595_v38 = vld [vmem:[%s6708_s25 + $0x24] sm:$0xf] }
  0x92   : > { %v2881_v21 = vrot.slane %v5328_v2, 5  ;;  %v7241_v1 = vld [vmem:[%s6708_s25 + $0x28] sm:$0xf]  ;;  %v5410_v60 = vcombine.low %v2861_v41, %v2864_v17  ;;  %v5395_v44 = vrot.slane %v5379_v11, 9  ;;  %v2877_v59 = vrot.slane %v5326_v10, 5 }
  0x93   : > { %v2871_v18 = vsel %vm6960_vm7, %v2869_v6, %v2870_v58  ;;  %v5142_v28 = vcombine.low %v6595_v38, %v7241_v1  ;;  %v6597_v47 = vld [vmem:[%s6708_s25 + $0x30] sm:$0xf]  ;;  %v2884_v51 = vrot.slane %v5329_v25, 5  ;;  %v5331_v62 = vld [vmem:[%s6708_s25 + $0xc4] sm:$0xf]  ;;  %v2269_v25 = vshrl.u32 %v7168_v40, 16 }
  0x94   : > { %6146 = vmatmul.mubr.msk.bf16.gmra.mrb[16].mxu0 %vm669_vm3, %v5408_v49  ;;  %v5411_v20 = vcombine.low %v2868_v23, %v2871_v18  ;;  %v5396_v49 = vrot.slane %v5380_v31, 9  ;;  %v2883_v50 = vrot.slane %v2881_v21, 4  ;;  %v2875_v57 = vsel %vm6960_vm7, %v5395_v44, %v2874_v8  ;;  %v5381_v12 = vld [vmem:[%s6708_s25 + $0xc0] sm:$0xe]  ;;  %v6599_v41 = vld [vmem:[%s6708_s25 + $0x3c] sm:$0xf] }
  0x95   : > { %5994 = vmatmul.mubr.msk.bf16.vlgmr.msra.gmra.mrb[0].mxu1 %vm669_vm3, %v5140_v45  ;;  %6149 = vmatprep.mubr.msk.bf16.mxu0 %vm669_vm3, %v5409_v4  ;;  %v2876_v45 = vrot.slane %v2874_v8, 4  ;;  %v2888_v63 = vrot.slane %v5331_v62, 5  ;;  %v5397_v6 = vrot.slane %v5381_v12, 9  ;;  %v7266_v17 = vld [vmem:[%s6708_s25 + $0x40] sm:$0xf]  ;;  %v5145_v18 = vcombine.low %v6873_v27, %v6876_v36  ;;  %v6551_v62 = vld [vmem:[%s6708_s25 + $0x24] sm:$0xff]  }
  0x96   : > { %6026 = vmatpush3.bf16.msra.mxu1 %v1437_v61  ;;  %5997 = vmatprep.mubr.msk.bf16.mxu1 %vm669_vm3, %v5141_v26  ;;  %v7246_v26 = vld [vmem:[%s6708_s25 + $0x34] sm:$0xf]  ;;  %v2882_v58 = vsel %vm6960_vm7, %v5396_v49, %v2881_v21  ;;  %v2885_v54 = vsel %vm6960_vm7, %v2883_v50, %v2884_v51  ;;  %v5332_v61 = vld [vmem:[%s6708_s25 + $0xc8] sm:$0x1]  ;;  %v5144_v10 = vcombine.low %v6599_v41, %v7266_v17  ;;  %v2265_v21 = vshll.u32 %v7168_v40, 16 }
  0x97   : > { %6524 = vmatprep.subr.msk.bf16.mxu1 %vm718_vm0, %v7220_v7  ;;  %v5143_v48 = vcombine.low %v6597_v47, %v7246_v26  ;;  %v2878_v4 = vsel %vm6960_vm7, %v2876_v45, %v2877_v59  ;;  %v5413_v11 = vcombine.low %v2882_v58, %v2885_v54  ;;  %v2890_v8 = vrot.slane %v2888_v63, 4  ;;  %v1175_v45 = vld [vmem:[%s6708_s25] sm:$0xe]  ;;  %v1176_v59 = vld [vmem:[%s6708_s25 + $0xc] sm:$0xe] }
  0x98   : > { %v5412_v2 = vcombine.low %v2875_v57, %v2878_v4  ;;  %v2891_v23 = vrot.slane %v5332_v61, 5  ;;  %v2889_v31 = vsel %vm6960_vm7, %v5397_v6, %v2888_v63  ;;  %v7281_v27 = vrot.slane %v2265_v21, 5  ;;  %v1179_v41 = vld [vmem:[%s6708_s25 + $0x30] sm:$0xe] }
  0x99   : > { %v2271_v36 = vrot.slane %v2269_v25, 4  ;;  %v5147_v44 = vcombine.low %v6933_v19, %v6939_v35  ;;  %v2275_v47 = vshll.u32 %v7171_v55, 16  ;;  %v5171_v19 = vrot.slane %v1175_v45, 9 }
  0x9a   : > { %v2892_v38 = vsel %vm6960_vm7, %v2890_v8, %v2891_v23  ;;  %8447 = vst [vmem:[#allocation3_spill] sm:$0xff] %v7281_v27  ;;  %v5172_v35 = vrot.slane %v1176_v59, 9  ;;  %v1242_v4 = vrot.slane %v7205_v9, 5  ;;  %v1249_v12 = vrot.slane %v7241_v1, 5  ;;  %v1180_v8 = vld [vmem:[%s6708_s25 + $0x3c] sm:$0xe] }
  0x9b   : > { %v5414_v40 = vcombine.low %v2889_v31, %v2892_v38  ;;  %v2272_v49 = vor.u32 %v2271_v36, %v7281_v27  ;;  %v7301_v51 = vrot.slane %v2275_v47, 5  ;;  %v5148_v58 = vcombine.low %v6954_v0, %v6967_v29  ;;  %v1181_v31 = vld [vmem:[%s6708_s25 + $0x48] sm:$0xe]  ;;  %v6605_v59 = vld [vmem:[%s6708_s25 + $0x38] sm:$0x1] }
  0x9c   : > { %6150 = vmatmul.mubr.msk.bf16.gmra.mrb[20].mxu0 %vm669_vm3, %v5410_v60  ;;  %v5146_v60 = vcombine.low %v6902_v24, %v6908_v37  ;;  %v6602_v24 = vld [vmem:[%s6708_s25 + $0x14] sm:$0x1]  ;;  %v4077_v54 = vsel %vm718_vm0, %v7025_v22, 0  ;;  %v5149_v61 = vcombine.low %v6986_v53, %v6993_v16  ;;  %v5150_v6 = vcombine.low %v7012_v39, %v7020_v43  ;;  %v6603_v16 = vld [vmem:[%s6708_s25 + $0x20] sm:$0x1] }
  0x9d   : > { %5998 = vmatmul.mubr.msk.bf16.gmra.mrb[4].mxu1 %vm669_vm3, %v5142_v28  ;;  %6153 = vmatprep.mubr.msk.bf16.mxu0 %vm669_vm3, %v5411_v20  ;;  %v1235_v28 = vrot.slane %v7198_v34, 5  ;;  %v6549_v20 = vld [vmem:[%s6708_s25 + $0x18] sm:$0xff]   ;;  %v6601_v34 = vld [vmem:[%s6708_s25 + $0x8] sm:$0x1]  ;;  %v1238_v37 = vrot.slane %v6602_v24, 5  ;;  %8448 = vst [vmem:[#allocation4_spill] sm:$0xff] %v7301_v51  ;;  %v5151_v9 = vcombine.low %v7044_v5, %v7056_v30 }
  0x9e   : > { %6001 = vmatprep.mubr.msk.bf16.mxu1 %vm669_vm3, %v5143_v48  ;;  %v1228_v48 = vrot.slane %v7164_v15, 5  ;;  %v1231_v50 = vrot.slane %v6601_v34, 5  ;;  %v1177_v15 = vld [vmem:[%s6708_s25 + $0x18] sm:$0xe]  ;;  %v7306_v63 = vrot.slane %v2272_v49, 4  ;;  %v1245_v22 = vrot.slane %v6603_v16, 5 }
  0x9f   : > { %v1237_v55 = vrot.slane %v1235_v28, 4  ;;  %v5173_v1 = vrot.slane %v1177_v15, 9  ;;  %v7328_v29 = vsel %vm6960_vm7, %v5172_v35, %v1235_v28  ;;  %v1251_v25 = vrot.slane %v1249_v12, 4  ;;  %v5496_v24 = vld [vmem:[%s6708_s25 + $0x18] sm:$0xf] }
  0xa0   : > { %v1230_v57 = vrot.slane %v1228_v48, 4  ;;  %8449 = vst [vmem:[#allocation5_spill] sm:$0xff] %v7306_v63  ;;  %v7324_v0 = vsel %vm6960_vm7, %v5171_v19, %v1228_v48  ;;  %v1259_v47 = vrot.slane %v6605_v59, 5  ;;  %v7365_v49 = vsel %vm718_vm0, %v7220_v7, 0  ;;  %v5497_v7 = vld [vmem:[%s6708_s25 + $0x1c] sm:$0xf] }
  0xa1   : > { %v7332_v53 = vsel %vm6960_vm7, %v1237_v55, %v1238_v37  ;;  %v7369_v34 = vsel %vm6960_vm7, %v5173_v1, %v1242_v4  ;;  %v6555_v37 = vld [vmem:[%s6708_s25 + $0x3c] sm:$0xff]   ;;  %v5176_v35 = vrot.slane %v1180_v8, 9  ;;  %v6606_v55 = vld [vmem:[%s6708_s25 + $0x44] sm:$0x1]  ;;  %v3598_v8 = vshll.u32 %v5496_v24, 16 }
  0xa2   : > { %v7343_v23 = vsel %vm6960_vm7, %v1230_v57, %v1231_v50  ;;  %v1182_v50 = vld [vmem:[%s6708_s25 + $0x54] sm:$0xe]  ;;  %v1266_v15 = vrot.slane %v6606_v55, 5  ;;  %v5500_v39 = vld [vmem:[%s6708_s25 + $0x28] sm:$0xf] }
  0xa3   : > { %v6613_v5 = vld [vmem:[%s6708_s25 + $0x70] sm:$0xf] }
  0xa4   : > { %6154 = vmatmul.mubr.msk.bf16.gmra.mrb[24].mxu0 %vm669_vm3, %v5412_v2  ;;  %v1178_v2 = vld [vmem:[%s6708_s25 + $0x24] sm:$0xe]  ;;  %v1291_v30 = vrot.slane %v6613_v5, 5 }
  0xa5   : > { %6002 = vmatmul.mubr.msk.bf16.gmra.mrb[8].mxu1 %vm669_vm3, %v5144_v10  ;;  %6157 = vmatprep.mubr.msk.bf16.mxu0 %vm669_vm3, %v5413_v11  ;;  %v1256_v10 = vrot.slane %v7246_v26, 5  ;;  %v6553_v11 = vld [vmem:[%s6708_s25 + $0x30] sm:$0xff]   ;;  %v7339_v26 = vld [vmem:[%s8426_s1 + $0x20] sm:$0xf]  ;;  %v5174_v21 = vrot.slane %v1178_v2, 9 }
  0xa6   : > { %6005 = vmatprep.mubr.msk.bf16.mxu1 %vm669_vm3, %v5145_v18  ;;  %v1244_v18 = vrot.slane %v1242_v4, 4  ;;  %v1293_v48 = vrot.slane %v1291_v30, 4 }
  0xa7   : > { %v1258_v45 = vrot.slane %v1256_v10, 4  ;;  %v7376_v19 = vsel %vm6960_vm7, %v5174_v21, %v1249_v12  ;;  %v3608_v21 = vshrl.u32 %v5497_v7, 16 }
  0xa8   : > { %v7385_v4 = vsel %vm6960_vm7, %v1244_v18, %v1245_v22  ;;  %v3595_v22 = vshrl.u32 %v5496_v24, 16  ;;  %v3604_v18 = vshll.u32 %v5497_v7, 16  ;;  %v5499_v24 = vld [vmem:[%s6708_s25 + $0x24] sm:$0xf] }
  0xa9   : > { %v7398_v1 = vsel %vm6960_vm7, %v1258_v45, %v1259_v47 }
  0xaa   : > { %v3597_v43 = vrot.slane %v3595_v22, 4  ;;  %v7440_v7 = vrot.slane %v3604_v18, 5  ;;  %v3622_v22 = vshll.u32 %v5499_v24, 16  ;;  %v3632_v18 = vshrl.u32 %v5500_v39, 16 }
  0xac   : > { %6158 = vmatmul.mubr.msk.bf16.gmra.mrb[28].mxu0 %vm669_vm3, %v5414_v40  ;;  %v6604_v40 = vld [vmem:[%s6708_s25 + $0x2c] sm:$0x1]  ;;  %v3624_v27 = vrot.slane %v3622_v22, 5 }
  0xad   : > { %6006 = vmatmul.mubr.msk.bf16.gmra.mrb[12].mxu1 %vm669_vm3, %v5146_v60  ;;  %6163 = vmatprep.mubr.msk.bf16.mxu0 %vm669_vm3, %v6549_v20  ;;  %v1252_v28 = vrot.slane %v6604_v40, 5  ;;  %v1263_v60 = vrot.slane %v7266_v17, 5  ;;  %v6609_v40 = vld [vmem:[%s6708_s25 + $0x50] sm:$0x1]  ;;  %v6614_v17 = vld [vmem:[%s6708_s25 + $0x74] sm:$0x1] }
  0xae   : > { %6009 = vmatprep.mubr.msk.bf16.mxu1 %vm669_vm3, %v5147_v44  ;;  %v5175_v44 = vrot.slane %v1179_v41, 9  ;;  %v5178_v41 = vrot.slane %v1182_v50, 9  ;;  %v1183_v50 = vld [vmem:[%s6708_s25 + $0x60] sm:$0xe]  ;;  %v5501_v20 = vld [vmem:[%s6708_s25 + $0x2c] sm:$0x1] }
  0xaf   : > { %v1265_v12 = vrot.slane %v1263_v60, 4  ;;  %v7411_v45 = vsel %vm6960_vm7, %v5176_v35, %v1263_v60  ;;  %v6610_v35 = vld [vmem:[%s6708_s25 + $0x5c] sm:$0x1] }
  0xb0   : > { %v7394_v2 = vsel %vm6960_vm7, %v5175_v44, %v1256_v10  ;;  %v1280_v55 = vrot.slane %v6610_v35, 5  ;;  %v1184_v35 = vld [vmem:[%s6708_s25 + $0x6c] sm:$0xe] }
  0xb1   : > { %v7415_v59 = vsel %vm6960_vm7, %v1265_v12, %v1266_v15  ;;  %v6611_v15 = vld [vmem:[%s6708_s25 + $0x64] sm:$0xf]  ;;  %v3610_v12 = vrot.slane %v3608_v21, 4  ;;  %v5180_v5 = vrot.slane %v1184_v35, 9 }
  0xb2   : > { %v6561_v21 = vld [vmem:[%s6708_s25 + $0x60] sm:$0xff]  }
  0xb4   : > { %6164 = vmatmul.mubr.msk.bf16.vlgmr.msra.gmra.mrb[0].mxu0 %vm669_vm3, %v6551_v62  ;;  %v6607_v62 = vld [vmem:[%s6708_s25 + $0x4c] sm:$0xf] }
  0xb5   : > { %6010 = vmatmul.mubr.msk.bf16.gmra.mrb[16].mxu1 %vm669_vm3, %v5148_v58  ;;  %6196 = vmatpush3.bf16.msra.mxu0 %v4077_v54  ;;  %v1270_v57 = vrot.slane %v6607_v62, 5  ;;  %v7389_v58 = vsel %vm6960_vm7, %v1251_v25, %v1252_v28  ;;  %v5177_v54 = vrot.slane %v1181_v31, 9  ;;  %v1273_v28 = vrot.slane %v6609_v40, 5 }
  0xb6   : > { %6013 = vmatprep.mubr.msk.bf16.mxu1 %vm669_vm3, %v5149_v61  ;;  %6167 = vmatprep.mubr.msk.bf16.mxu0 %vm669_vm3, %v6553_v11  ;;  %v6557_v61 = vld [vmem:[%s6708_s25 + $0x48] sm:$0xff]   ;;  %v6608_v11 = vld [vmem:[%s6708_s25 + $0x58] sm:$0xf]  ;;  %v1284_v62 = vrot.slane %v6611_v15, 5  ;;  %v5503_v15 = vld [vmem:[%s6708_s25 + $0x34] sm:$0xf] }
  0xb7   : > { %6530 = vmatprep.subr.msk.bf16.mxu0 %vm718_vm0, %v7339_v26  ;;  %v1277_v16 = vrot.slane %v6608_v11, 5  ;;  %v1272_v31 = vrot.slane %v1270_v57, 4  ;;  %v7419_v47 = vsel %vm6960_vm7, %v5177_v54, %v1270_v57  ;;  %v5498_v57 = vld [vmem:[%s6708_s25 + $0x20] sm:$0x1]  ;;  %v5502_v54 = vld [vmem:[%s6708_s25 + $0x30] sm:$0xf] }
  0xb8   : > { %v5179_v11 = vrot.slane %v1183_v50, 9  ;;  %v3646_v50 = vshll.u32 %v5502_v54, 16  ;;  %v3614_v25 = vshll.u32 %v5498_v57, 16  ;;  %v3652_v36 = vshll.u32 %v5503_v15, 16 }
  0xb9   : > { %v7430_v60 = vsel %vm6960_vm7, %v5178_v41, %v1277_v16  ;;  %v7446_v41 = vsel %vm6960_vm7, %v1272_v31, %v1273_v28  ;;  %v1286_v31 = vrot.slane %v1284_v62, 4  ;;  %v3643_v28 = vshrl.u32 %v5502_v54, 16 }
  0xba   : > { %v7488_v35 = vrot.slane %v3652_v36, 5 }
  0xbc   : > { %6168 = vmatmul.mubr.msk.bf16.gmra.mrb[4].mxu0 %vm669_vm3, %v6555_v37  ;;  %v1279_v37 = vrot.slane %v1277_v16, 4  ;;  %v6612_v16 = vld [vmem:[%s6708_s25 + $0x68] sm:$0x1] }
  0xbd   : > { %6014 = vmatmul.mubr.msk.bf16.gmra.mrb[20].mxu1 %vm669_vm3, %v5150_v6  ;;  %6171 = vmatprep.mubr.msk.bf16.mxu0 %vm669_vm3, %v6557_v61  ;;  %v3600_v6 = vrot.slane %v3598_v8, 5  ;;  %v6559_v61 = vld [vmem:[%s6708_s25 + $0x54] sm:$0xff]   ;;  %v1287_v40 = vrot.slane %v6612_v16, 5  ;;  %v3628_v8 = vshll.u32 %v5500_v39, 16  ;;  %v3611_v16 = vor.u32 %v3610_v12, %v7440_v7 }
  0xbe   : > { %6017 = vmatprep.mubr.msk.bf16.mxu1 %vm669_vm3, %v5151_v9  ;;  %v3619_v9 = vshrl.u32 %v5499_v24, 16  ;;  %v7455_v44 = vsel %vm6960_vm7, %v1279_v37, %v1280_v55  ;;  %v1294_v24 = vrot.slane %v6614_v17, 5  ;;  %v3656_v39 = vshrl.u32 %v5503_v15, 16 }
  0xbf   : > { %v3601_v10 = vor.u32 %v3600_v6, %v3597_v43  ;;  %v7461_v37 = vrot.slane %v3628_v8, 5  ;;  %v3634_v55 = vrot.slane %v3632_v18, 4  ;;  %v8450_v43 = vcombine.low %v7065_v52, %v7076_v46  ;;  %v6615_v8 = vld [vmem:[%s6708_s25 + $0x7c] sm:$0xf]  ;;  %v7497_v18 = vld [vmem:[%s6708_s25 + $0x38] sm:$0x1] }
  0xc0   : > { %v3621_v38 = vrot.slane %v3619_v9, 4  ;;  %v7470_v17 = vsel %vm6960_vm7, %v5179_v11, %v1284_v62  ;;  %v7474_v57 = vsel %vm6960_vm7, %v1286_v31, %v1287_v40  ;;  %v3645_v6 = vrot.slane %v3643_v28, 4  ;;  %8452 = vst [vmem:[#allocation6_spill] sm:$0xff] %v7497_v18 }
  0xc1   : > { %v3648_v12 = vrot.slane %v3646_v50, 5  ;;  %v8451_v52 = vcombine.low %v7097_v33, %v7102_v56  ;;  %v3602_v46 = vrot.slane %v3601_v10, 4  ;;  %v3612_v54 = vrot.slane %v3611_v16, 4  ;;  %v6563_v33 = vld [vmem:[%s6708_s25 + $0x6c] sm:$0xff]   ;;  %v1186_v16 = vld [vmem:[%s6708_s25 + $0x84] sm:$0xe] }
  0xc2   : > { %v3638_v62 = vshll.u32 %v5501_v20, 16  ;;  %v7482_v11 = vsel %vm6960_vm7, %v5180_v5, %v1291_v30  ;;  %v7486_v40 = vsel %vm6960_vm7, %v1293_v48, %v1294_v24  ;;  %v3658_v9 = vrot.slane %v3656_v39, 4  ;;  %v6564_v48 = vld [vmem:[%s6708_s25 + $0x78] sm:$0xff]  }
  0xc3   : > { %v3625_v10 = vor.u32 %v3624_v27, %v3621_v38  ;;  %v3635_v20 = vor.u32 %v3634_v55, %v7461_v37  ;;  %v1298_v30 = vrot.slane %v6615_v8, 5  ;;  %v3649_v38 = vor.u32 %v3648_v12, %v3645_v6  ;;  %v5505_v5 = vld [vmem:[%s6708_s25 + $0x3c] sm:$0xf] }
  0xc4   : > { %6172 = vmatmul.mubr.msk.bf16.gmra.mrb[8].mxu0 %vm669_vm3, %v6559_v61  ;;  %v3616_v61 = vrot.slane %v3614_v25, 5  ;;  %v1185_v25 = vld [vmem:[%s6708_s25 + $0x78] sm:$0xe]  ;;  %v7513_v50 = vrot.slane %v3638_v62, 5  ;;  %v3659_v39 = vor.u32 %v3658_v9, %v7488_v35  ;;  %v3662_v55 = vshll.u32 %v7497_v18, 16 }
  0xc5   : > { %6018 = vmatmul.mubr.msk.bf16.gmra.mrb[24].mxu1 %vm669_vm3, %v8450_v43  ;;  %6175 = vmatprep.mubr.msk.bf16.mxu0 %vm669_vm3, %v6561_v21  ;;  %v3607_v21 = vsel %vm6734_vm4, %v3602_v46, %v7440_v7  ;;  %v5181_v24 = vrot.slane %v1185_v25, 9  ;;  %v6616_v43 = vld [vmem:[%s6708_s25 + $0x88] sm:$0xf]  ;;  %v7521_v7 = vld [vmem:[%s6708_s25 + $0x40] sm:$0xf]  ;;  %v3626_v12 = vrot.slane %v3625_v10, 4  ;;  %v8454_v62 = vcombine.low %v7117_v14, %v7126_v42 }
  0xc6   : > { %6021 = vmatprep.mubr.msk.bf16.mxu1 %vm669_vm3, %v8451_v52  ;;  %v3617_v31 = vsel %vm6734_vm4, %v3612_v54, %v3616_v61  ;;  %v1305_v6 = vrot.slane %v6616_v43, 5  ;;  %8453 = vst [vmem:[#allocation7_spill] sm:$0xff] %v7521_v7  ;;  %v3636_v52 = vrot.slane %v3635_v20, 4  ;;  %v1300_v46 = vrot.slane %v1298_v30, 4  ;;  %v6617_v54 = vld [vmem:[%s6708_s25 + $0x80] sm:$0x1] }
  0xc7   : > { %v1301_v61 = vrot.slane %v6617_v54, 5  ;;  %v3650_v9 = vrot.slane %v3649_v38, 4  ;;  %v5182_v25 = vrot.slane %v1186_v16, 9  ;;  %v3667_v8 = vshrl.u32 %v5505_v5, 16  ;;  %v6565_v10 = vld [vmem:[%s6708_s25 + $0x84] sm:$0xff]  }
  0xc8   : > { %v3670_v43 = vshll.u32 %v5505_v5, 16  ;;  %v7535_v20 = vcombine.low %v3607_v21, %v3617_v31  ;;  %v7539_v14 = vsel %vm718_vm0, %v7339_v26, 0  ;;  %v3680_v38 = vshrl.u32 %v7521_v7, 16  ;;  %v6566_v21 = vld [vmem:[%s6708_s25 + $0x90] sm:$0xff]   ;;  %v6622_v18 = vld [vmem:[%s6708_s25 + $0xa0] sm:$0xf] }
  0xc9   : > { %v3660_v16 = vrot.slane %v3659_v39, 4  ;;  %v3664_v5 = vrot.slane %v3662_v55, 5  ;;  %v1307_v54 = vrot.slane %v1305_v6, 4  ;;  %v3631_v31 = vsel %vm6734_vm4, %v3626_v12, %v7461_v37 }
  0xca   : > { %v3641_v26 = vsel %vm6734_vm4, %v3636_v52, %v7513_v50  ;;  %v7554_v39 = vsel %vm6960_vm7, %v5181_v24, %v1298_v30  ;;  %v7558_v55 = vsel %vm6960_vm7, %v1300_v46, %v1301_v61  ;;  %v3655_v37 = vsel %vm6734_vm4, %v3650_v9, %v7488_v35  ;;  %v5511_v30 = vld [vmem:[%s6708_s25 + $0x54] sm:$0xf]  ;;  %v7575_v24 = vld [vmem:[%s6708_s25 + $0x58] sm:$0xf]  ;;  %v7580_v61 = vld [vmem:[%s6708_s25 + $0x90] sm:$0xe] }
  0xcb   : > { %v7571_v12 = vsel %vm6960_vm7, %v5182_v25, %v1305_v6  ;;  %v3669_v50 = vrot.slane %v3667_v8, 4  ;;  %v3672_v52 = vrot.slane %v3670_v43, 5  ;;  %v3682_v46 = vrot.slane %v3680_v38, 4 }
  0xcc   : > { %6176 = vmatmul.mubr.msk.bf16.gmra.mrb[12].mxu0 %vm669_vm3, %v6563_v33  ;;  %v8455_v33 = vcombine.low %v7324_v0, %v7343_v23  ;;  %v6618_v0 = vld [vmem:[%s6708_s25 + $0x8c] sm:$0x1]  ;;  %v3665_v36 = vsel %vm6734_vm4, %v3660_v16, %v3664_v5  ;;  %v3715_v25 = vshrl.u32 %v5511_v30, 16  ;;  %v3718_v8 = vshll.u32 %v5511_v30, 16 }
  0xcd   : > { %6022 = vmatmul.mubr.msk.bf16.gmra.mrb[28].mxu1 %vm669_vm3, %v8454_v62  ;;  %6179 = vmatprep.mubr.msk.bf16.mxu0 %vm669_vm3, %v6564_v48  ;;  %v3676_v48 = vshll.u32 %v7521_v7, 16  ;;  %v1308_v23 = vrot.slane %v6618_v0, 5  ;;  %v5508_v62 = vld [vmem:[%s6708_s25 + $0x48] sm:$0xf]  ;;  %v7564_v0 = vld [vmem:[%s6708_s25 + $0x4c] sm:$0xf]  ;;  %v8457_v38 = vcombine.low %v7328_v29, %v7332_v53  ;;  %v7598_v16 = vcombine.low %v3631_v31, %v3641_v26 }
  0xce   : > { %6027 = vmatprep.mubr.msk.bf16.mxu1 %vm669_vm3, %v8455_v33  ;;  %v7561_v33 = vld [vmem:[%s6708_s25 + $0x44] sm:$0x1]  ;;  %v3691_v27 = vshrl.u32 %v5508_v62, 16  ;;  %v3694_v15 = vshll.u32 %v5508_v62, 16  ;;  %v3700_v6 = vshll.u32 %v7564_v0, 16  ;;  %v3704_v9 = vshrl.u32 %v7564_v0, 16 }
  0xcf   : > { %8456 = vst [vmem:[#allocation8_spill] sm:$0xff] %v7561_v33  ;;  %v7577_v28 = vrot.slane %v3676_v48, 5  ;;  %v7586_v35 = vsel %vm6960_vm7, %v1307_v54, %v1308_v23  ;;  %v3724_v43 = vshll.u32 %v7575_v24, 16  ;;  %v3728_v48 = vshrl.u32 %v7575_v24, 16  ;;  %v5514_v31 = vld [vmem:[%s6708_s25 + $0x60] sm:$0xf] }
  0xd0   : > { %v3686_v5 = vshll.u32 %v7561_v33, 16  ;;  %v5183_v54 = vrot.slane %v7580_v61, 9  ;;  %v8458_v23 = vcombine.low %v7369_v34, %v7385_v4  ;;  %v7609_v29 = vcombine.low %v3655_v37, %v3665_v36  ;;  %v6567_v26 = vld [vmem:[%s6708_s25 + $0x9c] sm:$0xff]   ;;  %v6568_v30 = vld [vmem:[%s6708_s25 + $0xa8] sm:$0xff]   ;;  %v6619_v36 = vld [vmem:[%s8426_s1 + $0x10] sm:$0xf] }
  0xd1   : > { %v3673_v53 = vor.u32 %v3672_v52, %v3669_v50  ;;  %v3693_v62 = vrot.slane %v3691_v27, 4  ;;  %v7620_v34 = vrot.slane %v3700_v6, 5  ;;  %v3706_v4 = vrot.slane %v3704_v9, 4  ;;  %v6620_v6 = vld [vmem:[%s6708_s25 + $0x94] sm:$0xf] }
  0xd2   : > { %v3717_v27 = vrot.slane %v3715_v25, 4  ;;  %v3720_v37 = vrot.slane %v3718_v8, 5  ;;  %v7629_v50 = vrot.slane %v3724_v43, 5  ;;  %v3730_v52 = vrot.slane %v3728_v48, 4  ;;  %v7635_v9 = vld [vmem:[%s6708_s25 + $0x64] sm:$0xf] }
  0xd3   : > { %8459 = vst [vmem:[#allocation9_spill] sm:$0xff] %v7635_v9  ;;  %v3739_v61 = vshrl.u32 %v5514_v31, 16  ;;  %v7637_v22 = vrot.slane %v3673_v53, 4  ;;  %v1319_v25 = vrot.slane %v6622_v18, 5  ;;  %v3707_v43 = vor.u32 %v3706_v4, %v7620_v34 }
  0xd4   : > { %6180 = vmatmul.mubr.msk.bf16.gmra.mrb[16].mxu0 %vm669_vm3, %v6565_v10  ;;  %v3742_v10 = vshll.u32 %v5514_v31, 16  ;;  %v3721_v31 = vor.u32 %v3720_v37, %v3717_v27  ;;  %v3731_v53 = vor.u32 %v3730_v52, %v7629_v50  ;;  %v8460_v18 = vcombine.low %v7376_v19, %v7389_v58  ;;  %v6569_v37 = vld [vmem:[%s6708_s25 + $0xb4] sm:$0xff]  }
  0xd5   : > { %6028 = vmatmul.mubr.msk.bf16.vlgmr.msra.gmra.mrb[0].mxu1 %vm669_vm3, %v8457_v38  ;;  %6183 = vmatprep.mubr.msk.bf16.mxu0 %vm669_vm3, %v6566_v21  ;;  %v3696_v21 = vrot.slane %v3694_v15, 5  ;;  %v7618_v38 = vld [vmem:[%s6708_s25 + $0x50] sm:$0x1]  ;;  %v7627_v15 = vld [vmem:[%s6708_s25 + $0x5c] sm:$0x1]  ;;  %v8461_v27 = vcombine.low %v7394_v2, %v7398_v1  ;;  %v1321_v52 = vrot.slane %v1319_v25, 4 }
  0xd6   : > { %6060 = vmatpush3.bf16.msra.mxu1 %v7365_v49  ;;  %6031 = vmatprep.mubr.msk.bf16.mxu1 %vm669_vm3, %v8458_v23  ;;  %v3683_v49 = vor.u32 %v3682_v46, %v7577_v28  ;;  %v7631_v46 = vrot.slane %v3686_v5, 5  ;;  %v1312_v23 = vrot.slane %v6620_v6, 5  ;;  %v3710_v48 = vshll.u32 %v7618_v38, 16  ;;  %v1188_v5 = vld [vmem:[%s6708_s25 + $0x9c] sm:$0xe] }
  0xd7   : > { %6526 = vmatprep.subr.msk.bf16.mxu1 %vm718_vm0, %v6619_v36  ;;  %v6621_v36 = vld [vmem:[%s6708_s25 + $0x98] sm:$0x1]  ;;  %v3697_v7 = vor.u32 %v3696_v21, %v3693_v62  ;;  %v3734_v6 = vshll.u32 %v7627_v15, 16  ;;  %v3752_v62 = vshrl.u32 %v7635_v9, 16  ;;  %v3744_v4 = vrot.slane %v3742_v10, 5 }
  0xd8   : > { %v1315_v33 = vrot.slane %v6621_v36, 5  ;;  %v3684_v8 = vrot.slane %v3683_v49, 4  ;;  %v3748_v36 = vshll.u32 %v7635_v9, 16  ;;  %v7656_v21 = vsel %vm6960_vm7, %v5183_v54, %v1312_v23  ;;  %v7667_v2 = vld [vmem:[%s6708_s25 + $0x68] sm:$0x1] }
  0xd9   : > { %v3741_v49 = vrot.slane %v3739_v61, 4  ;;  %v3698_v19 = vrot.slane %v3697_v7, 4  ;;  %v5184_v58 = vrot.slane %v1188_v5, 9  ;;  %v3708_v3 = vrot.slane %v3707_v43, 4  ;;  %8462 = vst [vmem:[#allocation10_spill] sm:$0xff] %v7667_v2  ;;  %v6570_v5 = vld [vmem:[%s6708_s25 + $0xc0] sm:$0xff]  }
  0xda   : > { %v3712_v54 = vrot.slane %v3710_v48, 5  ;;  %v3736_v63 = vrot.slane %v3734_v6, 5  ;;  %v1326_v61 = vrot.slane %v7102_v56, 5  ;;  %v3722_v10 = vrot.slane %v3721_v31, 4  ;;  %v1190_v31 = vld [vmem:[%s6708_s25 + $0xb4] sm:$0xe] }
  0xdb   : > { %v3732_v51 = vrot.slane %v3731_v53, 4  ;;  %v7669_v1 = vrot.slane %v3748_v36, 5  ;;  %v3754_v7 = vrot.slane %v3752_v62, 4  ;;  %v3679_v43 = vsel %vm6734_vm4, %v7637_v22, %v7577_v28  ;;  %v6624_v62 = vld [vmem:[%s6708_s25 + $0xb0] sm:$0x1] }
  0xdc   : > { %6184 = vmatmul.mubr.msk.bf16.gmra.mrb[20].mxu0 %vm669_vm3, %v6567_v26  ;;  %v1314_v26 = vrot.slane %v1312_v23, 4  ;;  %v1189_v23 = vld [vmem:[%s6708_s25 + $0xa8] sm:$0xe]  ;;  %v3689_v48 = vsel %vm6734_vm4, %v3684_v8, %v7631_v46  ;;  %v3745_v6 = vor.u32 %v3744_v4, %v3741_v49  ;;  %v3703_v53 = vsel %vm6734_vm4, %v3698_v19, %v7620_v34  ;;  %v5517_v46 = vld [vmem:[%s6708_s25 + $0x6c] sm:$0xf] }
  0xdd   : > { %6032 = vmatmul.mubr.msk.bf16.gmra.mrb[4].mxu1 %vm669_vm3, %v8460_v18  ;;  %6187 = vmatprep.mubr.msk.bf16.mxu0 %vm669_vm3, %v6568_v30  ;;  %v6623_v18 = vld [vmem:[%s6708_s25 + $0xa4] sm:$0x1]  ;;  %v7689_v36 = vsel %vm6960_vm7, %v5184_v58, %v1319_v25  ;;  %v5185_v28 = vrot.slane %v1189_v23, 9  ;;  %v1328_v8 = vrot.slane %v1326_v61, 4  ;;  %v3758_v49 = vshll.u32 %v7667_v2, 16 }
  0xde   : > { %6035 = vmatprep.mubr.msk.bf16.mxu1 %vm669_vm3, %v8461_v27  ;;  %v1322_v30 = vrot.slane %v6623_v18, 5  ;;  %v7681_v56 = vsel %vm6960_vm7, %v1314_v26, %v1315_v33  ;;  %v3713_v33 = vsel %vm6734_vm4, %v3708_v3, %v3712_v54  ;;  %v1329_v26 = vrot.slane %v6624_v62, 5  ;;  %v5520_v18 = vld [vmem:[%s6708_s25 + $0x78] sm:$0xf]  ;;  %v7744_v54 = vld [vmem:[%s6708_s25 + $0xbc] sm:$0x1] }
  0xdf   : > { %v3727_v34 = vsel %vm6734_vm4, %v3722_v10, %v7629_v50  ;;  %v3737_v25 = vsel %vm6734_vm4, %v3732_v51, %v3736_v63  ;;  %v3755_v4 = vor.u32 %v3754_v7, %v7669_v1  ;;  %v5186_v27 = vrot.slane %v1190_v31, 9  ;;  %v7718_v51 = vld [vmem:[%s6708_s25 + $0x70] sm:$0xf]  ;;  %v7748_v10 = vld [vmem:[%s6708_s25 + $0x7c] sm:$0xf] }
  0xe0   : > { %v7693_v22 = vsel %vm6960_vm7, %v1321_v52, %v1322_v30  ;;  %v8464_v3 = vcombine.low %v7411_v45, %v7415_v59  ;;  %v7714_v19 = vrot.slane %v3745_v6, 4  ;;  %v1333_v50 = vrot.slane %v7126_v42, 5  ;;  %8465 = vst [vmem:[#allocation12_spill] sm:$0xff] %v7718_v51  ;;  %8467 = vst [vmem:[#allocation13_spill] sm:$0xff] %v7748_v10  ;;  %v5523_v7 = vld [vmem:[%s6708_s25 + $0x84] sm:$0xf] }
  0xe1   : > { %8463 = vst [vmem:[#allocation11_spill] sm:$0xff] %v7693_v22  ;;  %v3763_v63 = vshrl.u32 %v5517_v46, 16  ;;  %v8466_v45 = vcombine.low %v7419_v47, %v7446_v41  ;;  %v7726_v58 = vcombine.low %v3703_v53, %v3713_v33  ;;  %v7732_v42 = vsel %vm6960_vm7, %v5185_v28, %v1326_v61  ;;  %v6571_v61 = vld [vmem:[%s6708_s25 + $0xcc] sm:$0xff]   ;;  %v7760_v31 = vld [vmem:[%s6708_s25 + $0x88] sm:$0xf] }
  0xe2   : > { %v7735_v30 = vcombine.low %v3727_v34, %v3737_v25  ;;  %v7739_v47 = vsel %vm6960_vm7, %v1328_v8, %v1329_v26  ;;  %v7741_v41 = vrot.slane %v3758_v49, 5  ;;  %v3772_v6 = vshll.u32 %v7718_v51, 16  ;;  %8468 = vst [vmem:[#allocation14_spill] sm:$0xff] %v7760_v31  ;;  %v5526_v62 = vld [vmem:[%s6708_s25 + $0x90] sm:$0xf] }
  0xe3   : > { %v7766_v28 = vrot.slane %v1333_v50, 4  ;;  %v7768_v33 = vrot.slane %v3763_v63, 4  ;;  %v3776_v8 = vshrl.u32 %v7718_v51, 16  ;;  %v3787_v26 = vshrl.u32 %v5520_v18, 16  ;;  %v7775_v25 = vld [vmem:[%s6708_s25 + $0x94] sm:$0xf] }
  0xe4   : > { %6188 = vmatmul.mubr.msk.bf16.gmra.mrb[24].mxu0 %vm669_vm3, %v6569_v37  ;;  %v7712_v37 = vcombine.low %v3679_v43, %v3689_v48  ;;  %v7756_v43 = vsel %vm6960_vm7, %v5186_v27, %v1333_v50  ;;  %v3766_v48 = vshll.u32 %v5517_v46, 16  ;;  %v3790_v49 = vshll.u32 %v5520_v18, 16  ;;  %8469 = vst [vmem:[#allocation15_spill] sm:$0xff] %v7775_v25  ;;  %v7813_v2 = vld [vmem:[%s6708_s25 + $0x8c] sm:$0x1] }
  0xe5   : > { %6036 = vmatmul.mubr.msk.bf16.gmra.mrb[8].mxu1 %vm669_vm3, %v8464_v3  ;;  %6191 = vmatprep.mubr.msk.bf16.mxu0 %vm669_vm3, %v6570_v5  ;;  %v7752_v5 = vrot.slane %v3755_v4, 4  ;;  %v3796_v46 = vshll.u32 %v7748_v10, 16  ;;  %v3800_v34 = vshrl.u32 %v7748_v10, 16  ;;  %v3811_v4 = vshrl.u32 %v5523_v7, 16 }
  0xe6   : > { %6039 = vmatprep.mubr.msk.bf16.mxu1 %vm669_vm3, %v8466_v45  ;;  %v3814_v27 = vshll.u32 %v5523_v7, 16  ;;  %v3820_v3 = vshll.u32 %v7760_v31, 16  ;;  %v3824_v50 = vshrl.u32 %v7760_v31, 16  ;;  %v7785_v45 = vld [vmem:[%s6708_s25 + $0x74] sm:$0x1]  ;;  %v3768_v18 = vrot.slane %v3766_v48, 5 }
  0xe7   : > { %v3835_v52 = vshrl.u32 %v5526_v62, 16  ;;  %v3838_v53 = vshll.u32 %v5526_v62, 16  ;;  %v8470_v7 = vcombine.low %v7430_v60, %v7455_v44  ;;  %v3778_v59 = vrot.slane %v3776_v8, 4  ;;  %v5529_v48 = vld [vmem:[%s6708_s25 + $0x9c] sm:$0xf] }
  0xe8   : > { %v3844_v63 = vshll.u32 %v7775_v25, 16  ;;  %v3848_v23 = vshrl.u32 %v7775_v25, 16  ;;  %v8471_v62 = vcombine.low %v7470_v17, %v7474_v57  ;;  %v7803_v44 = vld [vmem:[%s6708_s25 + $0x80] sm:$0x1]  ;;  %v3789_v60 = vrot.slane %v3787_v26, 4 }
  0xe9   : > { %8472 = vst [vmem:[#allocation16_spill] sm:$0xff] %v7803_v44  ;;  %v3813_v31 = vrot.slane %v3811_v4, 4  ;;  %v3816_v8 = vrot.slane %v3814_v27, 5  ;;  %v7807_v10 = vrot.slane %v3820_v3, 5  ;;  %v3826_v51 = vrot.slane %v3824_v50, 4 }
  0xea   : > { %v7810_v25 = vld [vmem:[%s6708_s25 + $0xa0] sm:$0xf]  ;;  %v3837_v17 = vrot.slane %v3835_v52, 4  ;;  %v3840_v57 = vrot.slane %v3838_v53, 5  ;;  %v3862_v9 = vshll.u32 %v5529_v48, 16  ;;  %v3769_v26 = vor.u32 %v3768_v18, %v7768_v33 }
  0xeb   : > { %v3806_v27 = vshll.u32 %v7803_v44, 16  ;;  %v7822_v3 = vld [vmem:[%s6708_s25 + $0x98] sm:$0x1]  ;;  %v3868_v50 = vshll.u32 %v7810_v25, 16  ;;  %v3872_v52 = vshrl.u32 %v7810_v25, 16  ;;  %v3817_v22 = vor.u32 %v3816_v8, %v3813_v31 }
  0xec   : > { %6192 = vmatmul.mubr.msk.bf16.gmra.mrb[28].mxu0 %vm669_vm3, %v6571_v61  ;;  %v7793_v61 = vrot.slane %v3772_v6, 5  ;;  %v3802_v6 = vrot.slane %v3800_v34, 4  ;;  %v3850_v34 = vrot.slane %v3848_v23, 4  ;;  %v3830_v33 = vshll.u32 %v7813_v2, 16 }
  0xed   : > { %6040 = vmatmul.mubr.msk.bf16.gmra.mrb[12].mxu1 %vm669_vm3, %v8470_v7  ;;  %6197 = vmatprep.mubr.msk.bf16.mxu0 %vm669_vm3, %v7535_v20  ;;  %v3792_v7 = vrot.slane %v3790_v49, 5  ;;  %v7805_v20 = vrot.slane %v3796_v46, 5  ;;  %v3782_v49 = vshll.u32 %v7785_v45, 16  ;;  %v7817_v46 = vrot.slane %v3844_v63, 5 }
  0xee   : > { %6043 = vmatprep.mubr.msk.bf16.mxu1 %vm669_vm3, %v8471_v62  ;;  %v3859_v62 = vshrl.u32 %v5529_v48, 16  ;;  %v3779_v4 = vor.u32 %v3778_v59, %v7793_v61  ;;  %v3827_v23 = vor.u32 %v3826_v51, %v7807_v10  ;;  %v3841_v59 = vor.u32 %v3840_v57, %v3837_v17  ;;  %v7855_v57 = vld [vmem:[%s6708_s25 + $0xa4] sm:$0x1] }
  0xef   : > { %v3793_v53 = vor.u32 %v3792_v7, %v3789_v60  ;;  %v3803_v48 = vor.u32 %v3802_v6, %v7805_v20  ;;  %v3864_v18 = vrot.slane %v3862_v9, 5  ;;  %v8473_v44 = vcombine.low %v7482_v11, %v7486_v40 }
  0xf0   : > { %v3861_v63 = vrot.slane %v3859_v62, 4  ;;  %v8474_v31 = vrot.slane %v7744_v54, 5  ;;  %v3784_v51 = vrot.slane %v3782_v49, 5  ;;  %v3851_v60 = vor.u32 %v3850_v34, %v7817_v46  ;;  %v7858_v34 = vld [vmem:[%s6708_s25 + $0xac] sm:$0xf] }
  0xf1   : > { %v3854_v9 = vshll.u32 %v7822_v3, 16  ;;  %v8475_v11 = vcombine.low %v7554_v39, %v7558_v55  ;;  %v3770_v40 = vrot.slane %v3769_v26, 4  ;;  %v7851_v54 = vrot.slane %v3868_v50, 5 }
  0xf2   : > { %v3794_v7 = vrot.slane %v3793_v53, 4  ;;  %v3804_v6 = vrot.slane %v3803_v48, 4  ;;  %v3808_v8 = vrot.slane %v3806_v27, 5  ;;  %v3832_v17 = vrot.slane %v3830_v33, 5  ;;  %v7868_v48 = vld [vmem:[%s6708_s25 + $0xb0] sm:$0x1] }
  0xf3   : > { %v3818_v39 = vrot.slane %v3817_v22, 4  ;;  %v3828_v55 = vrot.slane %v3827_v23, 4  ;;  %v3842_v62 = vrot.slane %v3841_v59, 4  ;;  %v3865_v49 = vor.u32 %v3864_v18, %v3861_v63 }
  0xf4   : > { %6198 = vmatmul.mubr.msk.bf16.vlgmr.msra.gmra.mrb[0].mxu0 %vm669_vm3, %v7598_v16  ;;  %v7841_v16 = vsel %vm6960_vm7, %v7766_v28, %v8474_v31  ;;  %v3874_v28 = vrot.slane %v3872_v52, 4  ;;  %v3856_v26 = vrot.slane %v3854_v9, 5  ;;  %v3775_v52 = vsel %vm6734_vm4, %v3770_v40, %v7793_v61 }
  0xf5   : > { %6044 = vmatmul.mubr.msk.bf16.gmra.mrb[16].mxu1 %vm669_vm3, %v8473_v44  ;;  %6230 = vmatpush3.bf16.msra.mxu0 %v7539_v14  ;;  %v3780_v14 = vrot.slane %v3779_v4, 4  ;;  %v5532_v44 = vld [vmem:[%s6708_s25 + $0xa8] sm:$0xf]  ;;  %v3878_v22 = vshll.u32 %v7855_v57, 16  ;;  %v3799_v33 = vsel %vm6734_vm4, %v3794_v7, %v7805_v20  ;;  %v3809_v23 = vsel %vm6734_vm4, %v3804_v6, %v3808_v8 }
  0xf6   : > { %6047 = vmatprep.mubr.msk.bf16.mxu1 %vm669_vm3, %v8475_v11  ;;  %6201 = vmatprep.mubr.msk.bf16.mxu0 %vm669_vm3, %v7609_v29  ;;  %v3852_v29 = vrot.slane %v3851_v60, 4  ;;  %v3883_v4 = vshrl.u32 %v5532_v44, 16  ;;  %v3886_v50 = vshll.u32 %v5532_v44, 16  ;;  %v3875_v53 = vor.u32 %v3874_v28, %v7851_v54  ;;  %v5581_v11 = vld [vmem:[%s6708_s25 + $0x48] sm:$0xe] }
  0xf7   : > { %v3785_v27 = vsel %vm6734_vm4, %v3780_v14, %v3784_v51  ;;  %v3892_v59 = vshll.u32 %v7858_v34, 16  ;;  %v3896_v61 = vshrl.u32 %v7858_v34, 16  ;;  %v3823_v63 = vsel %vm6734_vm4, %v3818_v39, %v7807_v10  ;;  %v7933_v39 = vld [vmem:[%s6708_s25 + $0xb8] sm:$0xf] }
  0xf8   : > { %v3833_v18 = vsel %vm6734_vm4, %v3828_v55, %v3832_v17  ;;  %v3847_v20 = vsel %vm6734_vm4, %v3842_v62, %v7817_v46  ;;  %v3866_v31 = vrot.slane %v3865_v49, 4  ;;  %v8476_v51 = vcombine.low %v7571_v12, %v7586_v35 }
  0xf9   : > { %v3885_v10 = vrot.slane %v3883_v4, 4  ;;  %v3888_v60 = vrot.slane %v3886_v50, 5  ;;  %v3902_v9 = vshll.u32 %v7868_v48, 16  ;;  %v8477_v46 = vcombine.low %v7656_v21, %v7681_v56  ;;  %v5535_v21 = vld [vmem:[%s6708_s25 + $0xb4] sm:$0xf] }
  0xfa   : > { %v5202_v12 = vcombine.low %v7732_v42, %v7739_v47  ;;  %v8478_v35 = vsel %vm6734_vm4, %v7752_v5, %v7741_v41  ;;  %v3876_v14 = vrot.slane %v3875_v53, 4  ;;  %v3880_v28 = vrot.slane %v3878_v22, 5  ;;  %v5583_v4 = vld [vmem:[%s6708_s25 + $0x60] sm:$0xe]  ;;  %v5584_v53 = vld [vmem:[%s6708_s25 + $0x6c] sm:$0xe] }
  0xfb   : > { %v5203_v56 = vcombine.low %v7756_v43, %v7841_v16  ;;  %v7916_v44 = vcombine.low %v3775_v52, %v3785_v27  ;;  %v7918_v42 = vrot.slane %v3892_v59, 5  ;;  %v3898_v47 = vrot.slane %v3896_v61, 4  ;;  %v8487_v16 = vld [vmem:[#allocation4_spill] sm:$0xff] }
  0xfc   : > { %6202 = vmatmul.mubr.msk.bf16.gmra.mrb[4].mxu0 %vm669_vm3, %v7712_v37  ;;  %v3857_v37 = vsel %vm6734_vm4, %v3852_v29, %v3856_v26  ;;  %v7920_v41 = vcombine.low %v3799_v33, %v3809_v23  ;;  %v7922_v5 = vcombine.low %v3823_v63, %v3833_v18  ;;  %v3871_v6 = vsel %vm6734_vm4, %v3866_v31, %v7851_v54  ;;  %v8480_v23 = vld [vmem:[#allocation11_spill] sm:$0xff]  ;;  %v5538_v63 = vld [vmem:[%s6708_s25 + $0xc0] sm:$0xf]  ;;  %v8482_v18 = vld [vmem:[#allocation9_spill] sm:$0xff] }
  0xfd   : > { %6048 = vmatmul.mubr.msk.bf16.gmra.mrb[20].mxu1 %vm669_vm3, %v8476_v51  ;;  %6205 = vmatprep.mubr.msk.bf16.mxu0 %vm669_vm3, %v7726_v58  ;;  %v8479_v58 = vsel %vm6734_vm4, %v7714_v19, %v7669_v1  ;;  %v7924_v7 = vcombine.low %v3847_v20, %v3857_v37  ;;  %v5597_v1 = vrot.slane %v5581_v11, 9  ;;  %v5582_v19 = vld [vmem:[%s6708_s25 + $0x54] sm:$0xe]  ;;  %v3889_v8 = vor.u32 %v3888_v60, %v3885_v10  ;;  %v8483_v31 = vld [vmem:[#allocation10_spill] sm:$0xff] }
  0xfe   : > { %6051 = vmatprep.mubr.msk.bf16.mxu1 %vm669_vm3, %v8477_v46  ;;  %v5551_v40 = vcombine.low %v8479_v58, %v8478_v35  ;;  %v7930_v17 = vrot.slane %v3902_v9, 5  ;;  %v3907_v55 = vshrl.u32 %v5535_v21, 16  ;;  %v3881_v62 = vsel %vm6734_vm4, %v3876_v14, %v3880_v28  ;;  %v8484_v9 = vld [vmem:[#allocation12_spill] sm:$0xff]  ;;  %v7982_v35 = vld [vmem:[%s6708_s25 + $0xbc] sm:$0x1] }
  0xff   : > { %v3910_v49 = vshll.u32 %v5535_v21, 16  ;;  %v4366_v29 = vrot.slane %v7564_v0, 5  ;;  %v4369_v26 = vrot.slane %v7618_v38, 5  ;;  %v3899_v50 = vor.u32 %v3898_v47, %v7918_v42  ;;  %v7985_v58 = vld [vmem:[%s6708_s25 + $0xc4] sm:$0xf] }
 0x100   : > { %v5598_v52 = vrot.slane %v5582_v19, 9  ;;  %v4373_v54 = vrot.slane %v7575_v24, 5  ;;  %v4376_v27 = vrot.slane %v7627_v15, 5  ;;  %v3916_v22 = vshll.u32 %v7933_v39, 16  ;;  %v5585_v19 = vld [vmem:[%s6708_s25 + $0x78] sm:$0xe] }
 0x101   : > { %v3920_v33 = vshrl.u32 %v7933_v39, 16  ;;  %v7950_v0 = vsel %vm6960_vm7, %v5597_v1, %v4366_v29  ;;  %v4368_v38 = vrot.slane %v4366_v29, 4  ;;  %v8481_v59 = vcombine.low %v7689_v36, %v8480_v23  ;;  %v8485_v23 = vld [vmem:[#allocation13_spill] sm:$0xff] }
 0x102   : > { %v7957_v24 = vcombine.low %v3871_v6, %v3881_v62  ;;  %v7961_v15 = vsel %vm6960_vm7, %v5598_v52, %v4373_v54  ;;  %v5599_v61 = vrot.slane %v5583_v4, 9  ;;  %v4380_v20 = vrot.slane %v8482_v18, 5  ;;  %v6572_v6 = vld [vmem:[%s6708_s25 + $0xc] sm:$0xff]  }
 0x103   : > { %v7967_v36 = vsel %vm6960_vm7, %v4368_v38, %v4369_v26  ;;  %v4383_v51 = vrot.slane %v8483_v31, 5  ;;  %v5600_v37 = vrot.slane %v5584_v53, 9  ;;  %v4387_v11 = vrot.slane %v8484_v9, 5 }
 0x104   : > { %6206 = vmatmul.mubr.msk.bf16.gmra.mrb[8].mxu0 %vm669_vm3, %v7735_v30  ;;  %v4375_v30 = vrot.slane %v4373_v54, 4  ;;  %v5614_v10 = vcombine.low %v7950_v0, %v7967_v36  ;;  %v4390_v46 = vrot.slane %v7785_v45, 5  ;;  %v7991_v14 = vsel %vm6960_vm7, %v5599_v61, %v4380_v20 }
 0x105   : > { %6052 = vmatmul.mubr.msk.bf16.gmra.mrb[24].mxu1 %vm669_vm3, %v8481_v59  ;;  %6209 = vmatprep.mubr.msk.bf16.mxu0 %vm669_vm3, %v5551_v40  ;;  %v4382_v28 = vrot.slane %v4380_v20, 4  ;;  %v7993_v21 = vrot.slane %v3907_v55, 4  ;;  %v3931_v47 = vshrl.u32 %v5538_v63, 16  ;;  %v7997_v45 = vsel %vm6960_vm7, %v5600_v37, %v4387_v11  ;;  %v5312_v55 = vld [vmem:[%s6708_s25 + $0x78] sm:$0xf]  ;;  %v8486_v59 = vld [vmem:[#allocation16_spill] sm:$0xff] }
 0x106   : > { %6055 = vmatprep.mubr.msk.bf16.mxu1 %vm669_vm3, %v5202_v12  ;;  %v7975_v60 = vsel %vm6960_vm7, %v4375_v30, %v4376_v27  ;;  %v7979_v12 = vrot.slane %v3889_v8, 4  ;;  %v4389_v1 = vrot.slane %v4387_v11, 4  ;;  %v8001_v8 = vrot.slane %v3899_v50, 4 }
 0x107   : > { %v5615_v40 = vcombine.low %v7961_v15, %v7975_v60  ;;  %v8003_v62 = vrot.slane %v3910_v49, 5  ;;  %v3934_v29 = vshll.u32 %v5538_v63, 16  ;;  %v8007_v26 = vsel %vm6960_vm7, %v4382_v28, %v4383_v51  ;;  %v8489_v28 = vld [vmem:[#allocation14_spill] sm:$0xff] }
 0x108   : > { %v8010_v4 = vrot.slane %v3916_v22, 5  ;;  %v8012_v52 = vrot.slane %v3920_v33, 4  ;;  %v5616_v54 = vcombine.low %v7991_v14, %v8007_v26  ;;  %v8018_v27 = vsel %vm6960_vm7, %v4389_v1, %v4390_v46  ;;  %v5586_v33 = vld [vmem:[%s6708_s25 + $0x84] sm:$0xe]  ;;  %v6573_v1 = vld [vmem:[%s6708_s25 + $0x18] sm:$0xff]  }
 0x109   : > { %v3926_v49 = vshll.u32 %v7982_v35, 16  ;;  %v3940_v50 = vshll.u32 %v7985_v58, 16  ;;  %v5617_v53 = vcombine.low %v7997_v45, %v8018_v27  ;;  %v5601_v22 = vrot.slane %v5585_v19, 9  ;;  %v6635_v60 = vld [vmem:[%s6708_s25 + $0xa0] sm:$0xf] }
 0x10a   : > { %v3933_v38 = vrot.slane %v3931_v47, 4  ;;  %v4397_v30 = vrot.slane %v8486_v59, 5  ;;  %v2256_v61 = vshrl.u32 %v5312_v55, 16  ;;  %v3936_v63 = vrot.slane %v3934_v29, 5  ;;  %v5541_v29 = vld [vmem:[%s6708_s25 + $0xcc] sm:$0xf] }
 0x10b   : > { %v3944_v18 = vshrl.u32 %v7985_v58, 16  ;;  %v2259_v43 = vshll.u32 %v5312_v55, 16  ;;  %v5602_v37 = vrot.slane %v5586_v33, 9  ;;  %v3895_v9 = vsel %vm6734_vm4, %v7979_v12, %v7918_v42  ;;  %v8061_v55 = vld [vmem:[%s6708_s25 + $0xd0] sm:$0xf] }
 0x10c   : > { %6210 = vmatmul.mubr.msk.bf16.gmra.mrb[12].mxu0 %vm669_vm3, %v7916_v44  ;;  %v4394_v44 = vrot.slane %v8485_v23, 5  ;;  %v2258_v51 = vrot.slane %v2256_v61, 4  ;;  %v3913_v11 = vor.u32 %v8003_v62, %v7993_v21  ;;  %v4401_v47 = vrot.slane %v8489_v28, 5  ;;  %v6574_v21 = vld [vmem:[%s6708_s25 + $0x24] sm:$0xff]   ;;  %v6639_v27 = vld [vmem:[%s6708_s25 + $0xac] sm:$0xf] }
 0x10d   : > { %6056 = vmatmul.mubr.msk.bf16.gmra.mrb[28].mxu1 %vm669_vm3, %v5203_v56  ;;  %6213 = vmatprep.mubr.msk.bf16.mxu0 %vm669_vm3, %v7920_v41  ;;  %v8488_v56 = vld [vmem:[#allocation5_spill] sm:$0xff]  ;;  %v2261_v46 = vrot.slane %v2259_v43, 5  ;;  %v3905_v19 = vsel %vm6734_vm4, %v8001_v8, %v7930_v17  ;;  %v4404_v12 = vrot.slane %v7813_v2, 5  ;;  %v8069_v62 = vrot.slane %v3940_v50, 5  ;;  %v5587_v8 = vld [vmem:[%s6708_s25 + $0x90] sm:$0xe] }
 0x10e   : > { %6061 = vmatprep.mubr.msk.bf16.mxu1 %vm669_vm3, %v6572_v6  ;;  %v2278_v41 = vsel %vm6734_vm4, %v8488_v56, %v8487_v16  ;;  %v8043_v20 = vsel %vm6960_vm7, %v5601_v22, %v4394_v44  ;;  %v4396_v31 = vrot.slane %v4394_v44, 4  ;;  %v3923_v6 = vor.u32 %v8012_v52, %v8010_v4  ;;  %v8075_v52 = vld [vmem:[%s6708_s25 + $0xc8] sm:$0x1]  ;;  %v8491_v16 = vld [vmem:[#allocation2_spill] sm:$0xff] }
 0x10f   : > { %v3946_v22 = vrot.slane %v3944_v18, 4  ;;  %v2262_v17 = vor.u32 %v2261_v46, %v2258_v51  ;;  %v3928_v23 = vrot.slane %v3926_v49, 5  ;;  %v3937_v44 = vor.u32 %v3936_v63, %v3933_v38  ;;  %v8492_v51 = vld [vmem:[#allocation3_spill] sm:$0xff] }
 0x110   : > { %v8065_v42 = vsel %vm6960_vm7, %v4396_v31, %v4397_v30  ;;  %v8079_v59 = vsel %vm6960_vm7, %v5602_v37, %v4401_v47  ;;  %v4403_v30 = vrot.slane %v4401_v47, 4  ;;  %v3955_v2 = vshrl.u32 %v5541_v29, 16 }
 0x111   : > { %v5618_v33 = vcombine.low %v8043_v20, %v8065_v42  ;;  %v3958_v50 = vshll.u32 %v5541_v29, 16  ;;  %v3964_v61 = vshll.u32 %v8061_v55, 16  ;;  %v2263_v18 = vrot.slane %v2262_v17, 4  ;;  %v6575_v29 = vld [vmem:[%s6708_s25 + $0x30] sm:$0xff]  }
 0x112   : > { %v3968_v49 = vshrl.u32 %v8061_v55, 16  ;;  %v8090_v38 = vsel %vm6960_vm7, %v4403_v30, %v4404_v12  ;;  %v5603_v63 = vrot.slane %v5587_v8, 9  ;;  %v3947_v56 = vor.u32 %v3946_v22, %v8069_v62 }
 0x113   : > { %v3950_v31 = vshll.u32 %v8075_v52, 16  ;;  %v5619_v37 = vcombine.low %v8079_v59, %v8090_v38  ;;  %v5557_v46 = vcombine.low %v3895_v9, %v3905_v19  ;;  %v3914_v28 = vrot.slane %v3913_v11, 4  ;;  %v5588_v11 = vld [vmem:[%s6708_s25 + $0x9c] sm:$0xe] }
 0x114   : > { %6214 = vmatmul.mubr.msk.bf16.gmra.mrb[16].mxu0 %vm669_vm3, %v7922_v5  ;;  %v8490_v5 = vld [vmem:[#allocation15_spill] sm:$0xff]  ;;  %v3924_v47 = vrot.slane %v3923_v6, 4  ;;  %v3938_v12 = vrot.slane %v3937_v44, 4  ;;  %v4411_v8 = vrot.slane %v7822_v3, 5  ;;  %v3957_v30 = vrot.slane %v3955_v2, 4  ;;  %v6576_v19 = vld [vmem:[%s6708_s25 + $0x3c] sm:$0xff]  }
 0x115   : > { %6062 = vmatmul.mubr.msk.bf16.vlgmr.msra.gmra.mrb[0].mxu1 %vm669_vm3, %v6573_v1  ;;  %6217 = vmatprep.mubr.msk.bf16.mxu0 %vm669_vm3, %v7924_v7  ;;  %v4408_v43 = vrot.slane %v8490_v5, 5  ;;  %v2268_v7 = vsel %vm6734_vm4, %v2263_v18, %v8492_v51  ;;  %v3960_v18 = vrot.slane %v3958_v50, 5  ;;  %v8113_v5 = vrot.slane %v3964_v61, 5 }
 0x116   : > { %6264 = vmatpush3.bf16.msra.mxu1 %v8491_v16  ;;  %6065 = vmatprep.mubr.msk.bf16.mxu1 %vm669_vm3, %v6574_v21  ;;  %v8102_v1 = vcombine.low %v2268_v7, %v2278_v41  ;;  %v8106_v21 = vld [vmem:[%s6708_s25 + $0xd4] sm:$0x1]  ;;  %v3970_v9 = vrot.slane %v3968_v49, 4  ;;  %v3948_v41 = vrot.slane %v3947_v56, 4  ;;  %v3952_v6 = vrot.slane %v3950_v31, 5 }
 0x117   : > { %v8110_v22 = vsel %vm6960_vm7, %v5603_v63, %v4408_v43  ;;  %v4410_v17 = vrot.slane %v4408_v43, 4  ;;  %v3919_v63 = vsel %vm6734_vm4, %v3914_v28, %v8010_v4  ;;  %v3929_v2 = vsel %vm6734_vm4, %v3924_v47, %v3928_v23  ;;  %v6626_v16 = vld [vmem:[%s6708_s25 + $0x1c] sm:$0xf]  ;;  %v5589_v28 = vld [vmem:[%s6708_s25 + $0xa8] sm:$0xe] }
 0x118   : > { %v3974_v50 = vshll.u32 %v8106_v21, 16  ;;  %v5604_v61 = vrot.slane %v5588_v11, 9  ;;  %v4415_v49 = vrot.slane %v7810_v25, 5  ;;  %v3943_v4 = vsel %vm6734_vm4, %v3938_v12, %v8069_v62  ;;  %v5577_v62 = vld [vmem:[%s6708_s25 + $0x18] sm:$0xe]  ;;  %v6577_v47 = vld [vmem:[%s6708_s25 + $0x48] sm:$0xff]  }
 0x119   : > { %v8119_v44 = vsel %vm6960_vm7, %v4410_v17, %v4411_v8  ;;  %v3971_v43 = vor.u32 %v3970_v9, %v8113_v5  ;;  %v4418_v23 = vrot.slane %v7855_v57, 5  ;;  %v3953_v25 = vsel %vm6734_vm4, %v3948_v41, %v3952_v6  ;;  %v6627_v11 = vld [vmem:[%s6708_s25 + $0x20] sm:$0x1] }
 0x11a   : > { %v5620_v3 = vcombine.low %v8110_v22, %v8119_v44  ;;  %v4338_v56 = vrot.slane %v6626_v16, 5  ;;  %v8145_v31 = vsel %vm6960_vm7, %v5604_v61, %v4415_v49  ;;  %v4417_v51 = vrot.slane %v4415_v49, 4  ;;  %v5590_v49 = vld [vmem:[%s6708_s25 + $0xb4] sm:$0xe] }
 0x11b   : > { %v5558_v7 = vcombine.low %v3919_v63, %v3929_v2  ;;  %v3972_v17 = vrot.slane %v3971_v43, 4  ;;  %v5605_v41 = vrot.slane %v5589_v28, 9  ;;  %v4422_v6 = vrot.slane %v7858_v34, 5  ;;  %v5578_v2 = vld [vmem:[%s6708_s25 + $0x24] sm:$0xe] }
 0x11c   : > { %6218 = vmatmul.mubr.msk.bf16.gmra.mrb[20].mxu0 %vm669_vm3, %v7957_v24  ;;  %v3961_v24 = vor.u32 %v3960_v18, %v3957_v30  ;;  %v8150_v57 = vsel %vm6960_vm7, %v4417_v51, %v4418_v23  ;;  %v6578_v30 = vld [vmem:[%s6708_s25 + $0x54] sm:$0xff]   ;;  %v5593_v18 = vrot.slane %v5577_v62, 9  ;;  %v4340_v9 = vrot.slane %v4338_v56, 4  ;;  %v6630_v28 = vld [vmem:[%s6708_s25 + $0x2c] sm:$0x1] }
 0x11d   : > { %6066 = vmatmul.mubr.msk.bf16.gmra.mrb[4].mxu1 %vm669_vm3, %v6575_v29  ;;  %6221 = vmatprep.mubr.msk.bf16.mxu0 %vm669_vm3, %v5557_v46  ;;  %v3976_v46 = vrot.slane %v3974_v50, 5  ;;  %v5559_v29 = vcombine.low %v3943_v4, %v3953_v25  ;;  %v5621_v8 = vcombine.low %v8145_v31, %v8150_v57  ;;  %v4425_v63 = vrot.slane %v7868_v48, 5  ;;  %v6628_v50 = vld [vmem:[%s6708_s25 + $0x28] sm:$0xf]  ;;  %v5579_v25 = vld [vmem:[%s6708_s25 + $0x30] sm:$0xe] }
 0x11e   : > { %6069 = vmatprep.mubr.msk.bf16.mxu1 %vm669_vm3, %v6576_v19  ;;  %v3962_v12 = vrot.slane %v3961_v24, 4  ;;  %v4341_v19 = vrot.slane %v6627_v11, 5  ;;  %v4345_v61 = vrot.slane %v6628_v50, 5  ;;  %v8173_v48 = vsel %vm6960_vm7, %v5605_v41, %v4422_v6  ;;  %v6580_v11 = vld [vmem:[%s6708_s25 + $0x6c] sm:$0xff]   ;;  %v8493_v41 = vld [vmem:[#allocation6_spill] sm:$0xff] }
 0x11f   : > { %v3977_v34 = vsel %vm6734_vm4, %v3972_v17, %v3976_v46  ;;  %v4424_v24 = vrot.slane %v4422_v6, 4  ;;  %v4339_v43 = vsel %vm6960_vm7, %v5593_v18, %v4338_v56  ;;  %v5594_v51 = vrot.slane %v5578_v2, 9  ;;  %v5591_v50 = vld [vmem:[%s6708_s25 + $0xc0] sm:$0xe]  ;;  %v6644_v31 = vld [vmem:[%s6708_s25 + $0xc8] sm:$0x1] }
 0x120   : > { %v3967_v4 = vsel %vm6734_vm4, %v3962_v12, %v8113_v5  ;;  %v4342_v23 = vsel %vm6960_vm7, %v4340_v9, %v4341_v19  ;;  %v6629_v5 = vld [vmem:[%s6708_s25 + $0x34] sm:$0xf]  ;;  %v6579_v12 = vld [vmem:[%s6708_s25 + $0x60] sm:$0xff]   ;;  %v5595_v18 = vrot.slane %v5579_v25, 9  ;;  %v4432_v9 = vrot.slane %v7982_v35, 5 }
 0x121   : > { %v4352_v16 = vrot.slane %v6629_v5, 5  ;;  %v8184_v62 = vsel %vm6960_vm7, %v4424_v24, %v4425_v63  ;;  %v5560_v46 = vcombine.low %v3967_v4, %v3977_v34  ;;  %v5610_v17 = vcombine.low %v4339_v43, %v4342_v23  ;;  %v5580_v24 = vld [vmem:[%s6708_s25 + $0x3c] sm:$0xe] }
 0x122   : > { %v5622_v56 = vcombine.low %v8173_v48, %v8184_v62  ;;  %v4355_v6 = vrot.slane %v8493_v41, 5  ;;  %v4346_v35 = vsel %vm6960_vm7, %v5594_v51, %v4345_v61  ;;  %v5607_v5 = vrot.slane %v5591_v50, 9 }
 0x123   : > { %v4354_v19 = vrot.slane %v4352_v16, 4  ;;  %v4353_v23 = vsel %vm6960_vm7, %v5595_v18, %v4352_v16  ;;  %v4439_v51 = vrot.slane %v8075_v52, 5  ;;  %v2419_v57 = vshll.u32 %v6644_v31, 16 }
 0x124   : > { %6222 = vmatmul.mubr.msk.bf16.gmra.mrb[24].mxu0 %vm669_vm3, %v5558_v7  ;;  %v5606_v7 = vrot.slane %v5590_v49, 9 }
 0x125   : > { %6070 = vmatmul.mubr.msk.bf16.gmra.mrb[8].mxu1 %vm669_vm3, %v6577_v47  ;;  %6225 = vmatprep.mubr.msk.bf16.mxu0 %vm669_vm3, %v5559_v29  ;;  %v4348_v47 = vrot.slane %v6630_v28, 5  ;;  %v4429_v29 = vrot.slane %v7933_v39, 5  ;;  %v8494_v39 = vld [vmem:[#allocation7_spill] sm:$0xff]  ;;  %v4356_v25 = vsel %vm6960_vm7, %v4354_v19, %v4355_v6  ;;  %v5596_v28 = vrot.slane %v5580_v24, 9 }
 0x126   : > { %6073 = vmatprep.mubr.msk.bf16.mxu1 %vm669_vm3, %v6578_v30  ;;  %v4347_v30 = vrot.slane %v4345_v61, 4  ;;  %v4359_v49 = vrot.slane %v8494_v39, 5  ;;  %v4436_v61 = vrot.slane %v7985_v58, 5  ;;  %v6631_v39 = vld [vmem:[%s6708_s25 + $0x70] sm:$0xf]  ;;  %v4443_v24 = vrot.slane %v8061_v55, 5 }
 0x127   : > { %v8196_v63 = vsel %vm6960_vm7, %v5606_v7, %v4429_v29  ;;  %v4431_v2 = vrot.slane %v4429_v29, 4  ;;  %v5309_v7 = vld [vmem:[%s6708_s25 + $0x6c] sm:$0xf]  ;;  %v8495_v29 = vld [vmem:[#allocation8_spill] sm:$0xff] }
 0x128   : > { %v4349_v34 = vsel %vm6960_vm7, %v4347_v30, %v4348_v47  ;;  %v4361_v47 = vrot.slane %v4359_v49, 4  ;;  %v6581_v30 = vld [vmem:[%s6708_s25 + $0x78] sm:$0xff]   ;;  %v8227_v16 = vsel %vm6960_vm7, %v5607_v5, %v4436_v61  ;;  %v4438_v18 = vrot.slane %v4436_v61, 4 }
 0x129   : > { %v8203_v4 = vsel %vm6960_vm7, %v4431_v2, %v4432_v9  ;;  %v5612_v9 = vcombine.low %v4353_v23, %v4356_v25  ;;  %v2232_v19 = vshrl.u32 %v5309_v7, 16  ;;  %v2235_v41 = vshll.u32 %v5309_v7, 16 }
 0x12a   : > { %v5623_v43 = vcombine.low %v8196_v63, %v8203_v4  ;;  %v8232_v58 = vsel %vm6960_vm7, %v4438_v18, %v4439_v51  ;;  %v4360_v6 = vsel %vm6960_vm7, %v5596_v28, %v4359_v49  ;;  %v4446_v49 = vrot.slane %v8106_v21, 5  ;;  %v6583_v51 = vld [vmem:[%s6708_s25 + $0x90] sm:$0xff]   ;;  %v6584_v21 = vld [vmem:[%s6708_s25 + $0x9c] sm:$0xff]  }
 0x12b   : > { %v5624_v50 = vcombine.low %v8227_v16, %v8232_v58  ;;  %v2234_v23 = vrot.slane %v2232_v19, 4  ;;  %v2237_v25 = vrot.slane %v2235_v41, 5  ;;  %v4445_v7 = vrot.slane %v4443_v24, 4 }
 0x12c   : > { %6226 = vmatmul.mubr.msk.bf16.gmra.mrb[28].mxu0 %vm669_vm3, %v5560_v46  ;;  %v5611_v46 = vcombine.low %v4346_v35, %v4349_v34  ;;  %v2241_v35 = vshll.u32 %v6631_v39, 16  ;;  %v2245_v34 = vshrl.u32 %v6631_v39, 16 }
 0x12d   : > { %6074 = vmatmul.mubr.msk.bf16.gmra.mrb[12].mxu1 %vm669_vm3, %v6579_v12  ;;  %6231 = vmatprep.mubr.msk.bf16.mxu0 %vm669_vm3, %v5610_v17  ;;  %v4362_v12 = vrot.slane %v8495_v29, 5  ;;  %v5592_v17 = vld [vmem:[%s6708_s25 + $0xcc] sm:$0xe]  ;;  %v8254_v55 = vsel %vm6960_vm7, %v4445_v7, %v4446_v49 }
 0x12e   : > { %6077 = vmatprep.mubr.msk.bf16.mxu1 %vm669_vm3, %v6580_v11  ;;  %v6582_v11 = vld [vmem:[%s6708_s25 + $0x84] sm:$0xff]   ;;  %v5608_v52 = vrot.slane %v5592_v17, 9  ;;  %v2247_v28 = vrot.slane %v2245_v34, 4  ;;  %v6632_v17 = vld [vmem:[%s6708_s25 + $0x74] sm:$0x1] }
 0x12f   : > { %v4363_v2 = vsel %vm6960_vm7, %v4361_v47, %v4362_v12  ;;  %v5315_v47 = vld [vmem:[%s6708_s25 + $0x84] sm:$0xf]  ;;  %v2238_v12 = vor.u32 %v2237_v25, %v2234_v23  ;;  %v6586_v34 = vld [vmem:[%s6708_s25 + $0xb4] sm:$0xff]  }
 0x130   : > { %v8249_v5 = vsel %vm6960_vm7, %v5608_v52, %v4443_v24  ;;  %v5613_v61 = vcombine.low %v4360_v6, %v4363_v2  ;;  %v2283_v18 = vshll.u32 %v5315_v47, 16  ;;  %v5318_v6 = vld [vmem:[%s6708_s25 + $0x90] sm:$0xf]  ;;  %v6585_v2 = vld [vmem:[%s6708_s25 + $0xa8] sm:$0xff]  }
 0x131   : > { %v5625_v29 = vcombine.low %v8249_v5, %v8254_v55  ;;  %v2239_v52 = vrot.slane %v2238_v12, 4  ;;  %v2304_v23 = vshrl.u32 %v5318_v6, 16  ;;  %v2307_v25 = vshll.u32 %v5318_v6, 16 }
 0x132   : > { %v2337_v12 = vshll.u32 %v6635_v60, 16 }
 0x133   : > { %v2309_v14 = vrot.slane %v2307_v25, 5  ;;  %v6638_v25 = vld [vmem:[%s6708_s25 + $0xa4] sm:$0x1] }
 0x134   : > { %6232 = vmatmul.mubr.msk.bf16.vlgmr.msra.gmra.mrb[0].mxu0 %vm669_vm3, %v5611_v46  ;;  %v2243_v46 = vrot.slane %v2241_v35, 5  ;;  %v5321_v35 = vld [vmem:[%s6708_s25 + $0x9c] sm:$0xf]  ;;  %v8296_v6 = vrot.slane %v2337_v12, 5 }
 0x135   : > { %6078 = vmatmul.mubr.msk.bf16.gmra.mrb[16].mxu1 %vm669_vm3, %v6581_v30  ;;  %6235 = vmatprep.mubr.msk.bf16.mxu0 %vm669_vm3, %v5612_v9  ;;  %v2251_v30 = vshll.u32 %v6632_v17, 16  ;;  %v2280_v9 = vshrl.u32 %v5315_v47, 16  ;;  %v2331_v47 = vshll.u32 %v5321_v35, 16  ;;  %v6636_v17 = vld [vmem:[%s6708_s25 + $0x8c] sm:$0x1] }
 0x136   : > { %6081 = vmatprep.mubr.msk.bf16.mxu1 %vm669_vm3, %v6582_v11  ;;  %v2248_v13 = vor.u32 %v2247_v28, %v2243_v46  ;;  %v6633_v11 = vld [vmem:[%s6708_s25 + $0x88] sm:$0xf]  ;;  %v2244_v7 = vsel %vm6734_vm4, %v2239_v52, %v2243_v46 }
 0x137   : > { %v2289_v19 = vshll.u32 %v6633_v11, 16  ;;  %v2293_v41 = vshrl.u32 %v6633_v11, 16  ;;  %v2253_v0 = vrot.slane %v2251_v30, 5  ;;  %v2282_v36 = vrot.slane %v2280_v9, 4 }
 0x138   : > { %v2249_v39 = vrot.slane %v2248_v13, 4  ;;  %v2299_v30 = vshll.u32 %v6636_v17, 16  ;;  %v2306_v9 = vrot.slane %v2304_v23, 4  ;;  %v2333_v11 = vrot.slane %v2331_v47, 5 }
 0x139   : > { %v8273_v24 = vrot.slane %v2289_v19, 5  ;;  %v2295_v49 = vrot.slane %v2293_v41, 4  ;;  %v6587_v19 = vld [vmem:[%s6708_s25 + $0xc0] sm:$0xff]  }
 0x13a   : > { %v2254_v46 = vsel %vm6734_vm4, %v2249_v39, %v2253_v0  ;;  %v5324_v39 = vld [vmem:[%s6708_s25 + $0xa8] sm:$0xf] }
 0x13b   : > { %v2296_v13 = vor.u32 %v2295_v49, %v8273_v24  ;;  %v5342_v41 = vcombine.low %v2244_v7, %v2254_v46  ;;  %v2347_v7 = vshll.u32 %v6638_v25, 16  ;;  %v2355_v45 = vshll.u32 %v5324_v39, 16 }
 0x13c   : > { %6236 = vmatmul.mubr.msk.bf16.gmra.mrb[4].mxu0 %vm669_vm3, %v5613_v61  ;;  %v6634_v61 = vld [vmem:[%s6708_s25 + $0x94] sm:$0xf] }
 0x13d   : > { %6082 = vmatmul.mubr.msk.bf16.gmra.mrb[20].mxu1 %vm669_vm3, %v6583_v51  ;;  %6239 = vmatprep.mubr.msk.bf16.mxu0 %vm669_vm3, %v5614_v10  ;;  %v2285_v10 = vrot.slane %v2283_v18, 5  ;;  %v2313_v51 = vshll.u32 %v6634_v61, 16  ;;  %v2317_v28 = vshrl.u32 %v6634_v61, 16  ;;  %v2297_v0 = vrot.slane %v2296_v13, 4 }
 0x13e   : > { %6085 = vmatprep.mubr.msk.bf16.mxu1 %vm669_vm3, %v6584_v21  ;;  %v2328_v21 = vshrl.u32 %v5321_v35, 16  ;;  %v6637_v35 = vld [vmem:[%s6708_s25 + $0x98] sm:$0x1]  ;;  %v2352_v61 = vshrl.u32 %v5324_v39, 16  ;;  %v5330_v39 = vld [vmem:[%s6708_s25 + $0xc0] sm:$0xf] }
 0x13f   : > { %v2286_v15 = vor.u32 %v2285_v10, %v2282_v36  ;;  %v8293_v26 = vrot.slane %v2313_v51, 5  ;;  %v2301_v36 = vrot.slane %v2299_v30, 5  ;;  %v2310_v10 = vor.u32 %v2309_v14, %v2306_v9  ;;  %v5327_v51 = vld [vmem:[%s6708_s25 + $0xb4] sm:$0xf] }
 0x140   : > { %v2330_v18 = vrot.slane %v2328_v21, 4  ;;  %v2365_v21 = vshrl.u32 %v6639_v27, 16  ;;  %v2376_v20 = vshrl.u32 %v5327_v51, 16  ;;  %v2379_v42 = vshll.u32 %v5327_v51, 16 }
 0x141   : > { %v2287_v52 = vrot.slane %v2286_v15, 4  ;;  %v2302_v46 = vsel %vm6734_vm4, %v2297_v0, %v2301_v36  ;;  %v2311_v15 = vrot.slane %v2310_v10, 4  ;;  %v2349_v30 = vrot.slane %v2347_v7, 5 }
 0x142   : > { %v2334_v23 = vor.u32 %v2333_v11, %v2330_v18  ;;  %v2354_v9 = vrot.slane %v2352_v61, 4  ;;  %v2367_v11 = vrot.slane %v2365_v21, 4  ;;  %v6643_v61 = vld [vmem:[%s6708_s25 + $0xbc] sm:$0x1] }
 0x143   : > { %v2292_v47 = vsel %vm6734_vm4, %v2287_v52, %v8273_v24  ;;  %v2316_v0 = vsel %vm6734_vm4, %v2311_v15, %v8293_v26  ;;  %v2395_v22 = vshll.u32 %v6643_v61, 16 }
 0x144   : > { %6240 = vmatmul.mubr.msk.bf16.gmra.mrb[8].mxu0 %vm669_vm3, %v5615_v40  ;;  %v2341_v40 = vshrl.u32 %v6635_v60, 16  ;;  %v2335_v17 = vrot.slane %v2334_v23, 4  ;;  %v5344_v24 = vcombine.low %v2292_v47, %v2302_v46 }
 0x145   : > { %6086 = vmatmul.mubr.msk.bf16.gmra.mrb[24].mxu1 %vm669_vm3, %v6585_v2  ;;  %6243 = vmatprep.mubr.msk.bf16.mxu0 %vm669_vm3, %v5616_v54  ;;  %v2319_v54 = vrot.slane %v2317_v28, 4 }
 0x146   : > { %6089 = vmatprep.mubr.msk.bf16.mxu1 %vm669_vm3, %v6586_v34  ;;  %v2343_v2 = vrot.slane %v2341_v40, 4  ;;  %v2323_v34 = vshll.u32 %v6637_v35, 16  ;;  %v2340_v10 = vsel %vm6734_vm4, %v2335_v17, %v8296_v6  ;;  %v2421_v17 = vrot.slane %v2419_v57, 5 }
 0x147   : > { %v2320_v49 = vor.u32 %v2319_v54, %v8293_v26  ;;  %v2357_v54 = vrot.slane %v2355_v45, 5  ;;  %v6641_v26 = vld [vmem:[%s6708_s25 + $0xb0] sm:$0x1] }
 0x148   : > { %v2344_v28 = vor.u32 %v2343_v2, %v8296_v6  ;;  %v2325_v60 = vrot.slane %v2323_v34, 5  ;;  %v2371_v35 = vshll.u32 %v6641_v26, 16  ;;  %v2400_v34 = vshrl.u32 %v5330_v39, 16 }
 0x149   : > { %v2321_v13 = vrot.slane %v2320_v49, 4  ;;  %v2358_v38 = vor.u32 %v2357_v54, %v2354_v9  ;;  %v2403_v6 = vshll.u32 %v5330_v39, 16  ;;  %v6642_v49 = vld [vmem:[%s6708_s25 + $0xc4] sm:$0xf] }
 0x14a   : > { %v2345_v14 = vrot.slane %v2344_v28, 4  ;;  %v2409_v23 = vshll.u32 %v6642_v49, 16  ;;  %v2413_v25 = vshrl.u32 %v6642_v49, 16  ;;  %v2373_v45 = vrot.slane %v2371_v35, 5 }
 0x14b   : > { %v2326_v36 = vsel %vm6734_vm4, %v2321_v13, %v2325_v60  ;;  %v2359_v51 = vrot.slane %v2358_v38, 4  ;;  %v2397_v60 = vrot.slane %v2395_v22, 5 }
 0x14c   : > { %6244 = vmatmul.mubr.msk.bf16.gmra.mrb[12].mxu0 %vm669_vm3, %v5617_v53  ;;  %v2361_v53 = vshll.u32 %v6639_v27, 16  ;;  %v2350_v59 = vsel %vm6734_vm4, %v2345_v14, %v2349_v30  ;;  %v5345_v44 = vcombine.low %v2316_v0, %v2326_v36  ;;  %v2402_v27 = vrot.slane %v2400_v34, 4 }
 0x14d   : > { %6090 = vmatmul.mubr.msk.bf16.gmra.mrb[28].mxu1 %vm669_vm3, %v6587_v19  ;;  %6247 = vmatprep.mubr.msk.bf16.mxu0 %vm669_vm3, %v5618_v33  ;;  %v6640_v33 = vld [vmem:[%s6708_s25 + $0xb8] sm:$0xf]  ;;  %v2378_v19 = vrot.slane %v2376_v20, 4  ;;  %v2411_v21 = vrot.slane %v2409_v23, 5  ;;  %v2415_v47 = vrot.slane %v2413_v25, 4 }
 0x14e   : > { %6111 = vmatprep.mubr.msk.bf16.mxu1 %vm669_vm3, %v5342_v41  ;;  %v2385_v12 = vshll.u32 %v6640_v33, 16  ;;  %v2389_v40 = vshrl.u32 %v6640_v33, 16  ;;  %v2363_v18 = vrot.slane %v2361_v53, 5  ;;  %v2381_v41 = vrot.slane %v2379_v42, 5 }
 0x14f   : > { %v2405_v53 = vrot.slane %v2403_v6, 5 }
 0x150   : > { %v2387_v52 = vrot.slane %v2385_v12, 5  ;;  %v2391_v2 = vrot.slane %v2389_v40, 4  ;;  %v2364_v20 = vsel %vm6734_vm4, %v2359_v51, %v2363_v18  ;;  %v2416_v12 = vor.u32 %v2415_v47, %v2411_v21 }
 0x151   : > { %v2406_v33 = vor.u32 %v2405_v53, %v2402_v27 }
 0x152   : > { %v2392_v7 = vor.u32 %v2391_v2, %v2387_v52  ;;  %v2417_v13 = vrot.slane %v2416_v12, 4 }
 0x153   : > { %v2407_v40 = vrot.slane %v2406_v33, 4 }
 0x154   : > { %6248 = vmatmul.mubr.msk.bf16.gmra.mrb[16].mxu0 %vm669_vm3, %v5619_v37  ;;  %v2368_v37 = vor.u32 %v2367_v11, %v2363_v18  ;;  %v2393_v15 = vrot.slane %v2392_v7, 4  ;;  %v2422_v9 = vsel %vm6734_vm4, %v2417_v13, %v2421_v17 }
 0x155   : > { %6112 = vmatmul.mubr.msk.bf16.vlgmr.msra.gmra.mrb[16].mxu1 %vm669_vm3, %v8102_v1  ;;  %6251 = vmatprep.mubr.msk.bf16.mxu0 %vm669_vm3, %v5620_v3  ;;  %v2382_v1 = vor.u32 %v2381_v41, %v2378_v19  ;;  %v5346_v3 = vcombine.low %v2340_v10, %v2350_v59  ;;  %v2412_v30 = vsel %vm6734_vm4, %v2407_v40, %v2411_v21 }
 0x156   : > { %6115 = vmatprep.mubr.msk.bf16.mxu1 %vm669_vm3, %v5344_v24  ;;  %v2369_v28 = vrot.slane %v2368_v37, 4  ;;  %v2398_v48 = vsel %vm6734_vm4, %v2393_v15, %v2397_v60  ;;  %v5349_v14 = vcombine.low %v2412_v30, %v2422_v9 }
 0x157   : > { %v2383_v46 = vrot.slane %v2382_v1, 4 }
 0x158   : > { %v2374_v42 = vsel %vm6734_vm4, %v2369_v28, %v2373_v45 }
 0x159   : > { %v5347_v62 = vcombine.low %v2364_v20, %v2374_v42 }
 0x15c   : > { %6252 = vmatmul.mubr.msk.bf16.gmra.mrb[20].mxu0 %vm669_vm3, %v5621_v8  ;;  %v2388_v8 = vsel %vm6734_vm4, %v2383_v46, %v2387_v52 }
 0x15d   : > { %6116 = vmatmul.mubr.msk.bf16.gmra.mrb[20].mxu1 %vm669_vm3, %v5345_v44  ;;  %6255 = vmatprep.mubr.msk.bf16.mxu0 %vm669_vm3, %v5622_v56  ;;  %v5348_v56 = vcombine.low %v2388_v8, %v2398_v48 }
 0x15e   : > { %6119 = vmatprep.mubr.msk.bf16.mxu1 %vm669_vm3, %v5346_v3 }
 0x164   : > { %6256 = vmatmul.mubr.msk.bf16.gmra.mrb[24].mxu0 %vm669_vm3, %v5623_v43 }
 0x165   : > { %6120 = vmatmul.mubr.msk.bf16.gmra.mrb[24].mxu1 %vm669_vm3, %v5347_v62  ;;  %6259 = vmatprep.mubr.msk.bf16.mxu0 %vm669_vm3, %v5624_v50 }
 0x166   : > { %6123 = vmatprep.mubr.msk.bf16.mxu1 %vm669_vm3, %v5348_v56 }
 0x16c   : > { %6260 = vmatmul.mubr.msk.bf16.gmra.mrb[28].mxu0 %vm669_vm3, %v5625_v29 }
 0x16d   : > { %6124 = vmatmul.mubr.msk.bf16.gmra.mrb[28].mxu1 %vm669_vm3, %v5349_v14 }
 0x1e8   : > { %v6063_v63 = vpop.f32.mrb[0].mxu1 }
 0x1e9   : > { %v1832_v4 = vpop.f32.mrb[1].mxu1 }
 0x1ea   : > { %v6064_v43 = vpop.f32.mrb[2].mxu1 }
 0x1eb   : > { %v1835_v16 = vpop.f32.mrb[3].mxu1 }
 0x1f0   : > { %v6067_v58 = vpop.f32.mrb[4].mxu1 }
 0x1f1   : > { %v1848_v50 = vpop.f32.mrb[5].mxu1 }
 0x1f2   : > { %v6068_v54 = vpop.f32.mrb[6].mxu1 }
 0x1f3   : > { %v1851_v18 = vpop.f32.mrb[7].mxu1 }
 0x1f8   : > { %v6071_v11 = vpop.f32.mrb[8].mxu1 }
 0x1f9   : > { %v1864_v32 = vpop.f32.mrb[9].mxu1 }
 0x1fa   : > { %v6072_v24 = vpop.f32.mrb[10].mxu1 }
 0x1fb   : > { %v1867_v19 = vpop.f32.mrb[11].mxu1 }
 0x200   : > { %v8384_v41 = vpop.f32.mrb[12].mxu1 }
 0x201   : > { %v8386_v5 = vpop.f32.mrb[13].mxu1 }
 0x202   : > { %v8388_v55 = vpop.f32.mrb[14].mxu1 }
 0x203   : > { %v8390_v29 = vpop.f32.mrb[15].mxu1 }
 0x207   : > { %v6233_v52 = vpop.f32.mrb[0].mxu0 }
 0x208   : > { %v6265_v2 = vadd.f32 %v6233_v52, %v6063_v63  ;;  %v4583_v39 = vpop.f32.mrb[1].mxu0 }
 0x209   : > { %v6266_v0 = vadd.f32 %v4583_v39, %v1832_v4  ;;  %v6234_v36 = vpop.f32.mrb[2].mxu0 }
 0x20a   : > { %v6267_v10 = vadd.f32 %v6234_v36, %v6064_v43  ;;  %v4586_v59 = vpop.f32.mrb[3].mxu0  ;;  %v4781_v49 = vmul.f32 %v6265_v2, %v6265_v2 }
 0x20b   : > { %v6268_v38 = vadd.f32 %v4586_v59, %v1835_v16  ;;  %v4779_v26 = vmul.f32 %v6266_v0, %v6266_v0 }
 0x20c   : > { %v5717_v37 = vpack.c.bf16 %v6267_v10, %v6265_v2  ;;  %v4782_v22 = vmul.f32 %v6267_v10, %v6267_v10 }
 0x20d   : > { %v4742_v35 = vadd.f32 %v6268_v38, %v6266_v0  ;;  %v4780_v34 = vmul.f32 %v6268_v38, %v6268_v38  ;;  %v5712_v6 = vpack.c.bf16 %v6268_v38, %v6266_v0 }
 0x20e   : > { %5789 = vst [vmem:[%s8396_s18 + $0x8] sm:$0xff] %v5717_v37  }
 0x20f   : > { %v4743_v23 = vadd.f32 %v6265_v2, %v4742_v35  ;;  %v4811_v25 = vadd.f32 %v4780_v34, %v4779_v26  ;;  %5713 = vst [vmem:[%s8396_s18] sm:$0xff] %v5712_v6   ;;  %v6237_v1 = vpop.f32.mrb[4].mxu0 }
 0x210   : > { %v6269_v7 = vadd.f32 %v6237_v1, %v6067_v58  ;;  %v4599_v61 = vpop.f32.mrb[5].mxu0 }
 0x211   : > { %v4812_v44 = vadd.f32 %v4811_v25, %v4781_v49  ;;  %v6270_v3 = vadd.f32 %v4599_v61, %v1848_v50  ;;  %v4744_v51 = vadd.f32 %v6267_v10, %v4743_v23  ;;  %v6238_v28 = vpop.f32.mrb[6].mxu0 }
 0x212   : > { %v6271_v45 = vadd.f32 %v6238_v28, %v6068_v54  ;;  %v4602_v27 = vpop.f32.mrb[7].mxu0  ;;  %v4785_v12 = vmul.f32 %v6269_v7, %v6269_v7 }
 0x213   : > { %v4745_v53 = vadd.f32 %v6270_v3, %v4744_v51  ;;  %v4783_v21 = vmul.f32 %v6270_v3, %v6270_v3  ;;  %v4813_v47 = vadd.f32 %v4812_v44, %v4782_v22  ;;  %v6272_v46 = vadd.f32 %v4602_v27, %v1851_v18 }
 0x214   : > { %v5727_v15 = vpack.c.bf16 %v6271_v45, %v6269_v7  ;;  %v4786_v56 = vmul.f32 %v6271_v45, %v6271_v45 }
 0x215   : > { %v4814_v60 = vadd.f32 %v4813_v47, %v4783_v21  ;;  %v4746_v20 = vadd.f32 %v6272_v46, %v4745_v53  ;;  %v4784_v42 = vmul.f32 %v6272_v46, %v6272_v46  ;;  %v5722_v33 = vpack.c.bf16 %v6272_v46, %v6270_v3 }
 0x216   : > { %5791 = vst [vmem:[%s8396_s18 + $0x18] sm:$0xff] %v5727_v15  }
 0x217   : > { %v4747_v31 = vadd.f32 %v6269_v7, %v4746_v20  ;;  %v4815_v57 = vadd.f32 %v4814_v60, %v4784_v42  ;;  %5790 = vst [vmem:[%s8396_s18 + $0x10] sm:$0xff] %v5722_v33   ;;  %v6241_v8 = vpop.f32.mrb[8].mxu0 }
 0x218   : > { %v6273_v48 = vadd.f32 %v6241_v8, %v6071_v11  ;;  %v4615_v62 = vpop.f32.mrb[9].mxu0 }
 0x219   : > { %v4816_v40 = vadd.f32 %v4815_v57, %v4785_v12  ;;  %v6274_v13 = vadd.f32 %v4615_v62, %v1864_v32  ;;  %v4748_v17 = vadd.f32 %v6271_v45, %v4747_v31  ;;  %v6242_v30 = vpop.f32.mrb[10].mxu0 }
 0x21a   : > { %v6275_v9 = vadd.f32 %v6242_v30, %v6072_v24  ;;  %v4618_v14 = vpop.f32.mrb[11].mxu0  ;;  %v4789_v11 = vmul.f32 %v6273_v48, %v6273_v48 }
 0x21b   : > { %v4749_v63 = vadd.f32 %v6274_v13, %v4748_v17  ;;  %v4787_v4 = vmul.f32 %v6274_v13, %v6274_v13  ;;  %v4817_v43 = vadd.f32 %v4816_v40, %v4786_v56  ;;  %v6276_v16 = vadd.f32 %v4618_v14, %v1867_v19 }
 0x21c   : > { %v5737_v58 = vpack.c.bf16 %v6275_v9, %v6273_v48  ;;  %v4790_v24 = vmul.f32 %v6275_v9, %v6275_v9 }
 0x21d   : > { %v4818_v50 = vadd.f32 %v4817_v43, %v4787_v4  ;;  %v4750_v54 = vadd.f32 %v6276_v16, %v4749_v63  ;;  %v4788_v18 = vmul.f32 %v6276_v16, %v6276_v16  ;;  %v5732_v52 = vpack.c.bf16 %v6276_v16, %v6274_v13 }
 0x21e   : > { %5793 = vst [vmem:[%s8396_s18 + $0x28] sm:$0xff] %v5737_v58  }
 0x21f   : > { %v4751_v2 = vadd.f32 %v6273_v48, %v4750_v54  ;;  %v4819_v39 = vadd.f32 %v4818_v50, %v4788_v18  ;;  %5792 = vst [vmem:[%s8396_s18 + $0x20] sm:$0xff] %v5732_v52   ;;  %v6245_v32 = vpop.f32.mrb[12].mxu0 }
 0x220   : > { %v6277_v0 = vadd.f32 %v6245_v32, %v8384_v41  ;;  %v4631_v36 = vpop.f32.mrb[13].mxu0 }
 0x221   : > { %v4820_v10 = vadd.f32 %v4819_v39, %v4789_v11  ;;  %v6278_v59 = vadd.f32 %v4631_v36, %v8386_v5  ;;  %v4752_v19 = vadd.f32 %v6275_v9, %v4751_v2  ;;  %v6246_v38 = vpop.f32.mrb[14].mxu0 }
 0x222   : > { %v6279_v37 = vadd.f32 %v6246_v38, %v8388_v55  ;;  %v4634_v26 = vpop.f32.mrb[15].mxu0  ;;  %v4793_v61 = vmul.f32 %v6277_v0, %v6277_v0 }
 0x223   : > { %v4753_v35 = vadd.f32 %v6278_v59, %v4752_v19  ;;  %v4791_v34 = vmul.f32 %v6278_v59, %v6278_v59  ;;  %v4821_v6 = vadd.f32 %v4820_v10, %v4790_v24  ;;  %v6280_v49 = vadd.f32 %v4634_v26, %v8390_v29 }
 0x224   : > { %v5747_v23 = vpack.c.bf16 %v6279_v37, %v6277_v0  ;;  %v4794_v55 = vmul.f32 %v6279_v37, %v6279_v37 }
 0x225   : > { %v4822_v25 = vadd.f32 %v4821_v6, %v4791_v34  ;;  %v4754_v41 = vadd.f32 %v6280_v49, %v4753_v35  ;;  %v4792_v1 = vmul.f32 %v6280_v49, %v6280_v49  ;;  %v5742_v7 = vpack.c.bf16 %v6280_v49, %v6278_v59 }
 0x226   : > { %5795 = vst [vmem:[%s8396_s18 + $0x38] sm:$0xff] %v5747_v23  }
 0x227   : > { %v4755_v22 = vadd.f32 %v6277_v0, %v4754_v41  ;;  %v4823_v5 = vadd.f32 %v4822_v25, %v4792_v1  ;;  %5794 = vst [vmem:[%s8396_s18 + $0x30] sm:$0xff] %v5742_v7   ;;  %v6249_v44 = vpop.f32.mrb[16].mxu0 }
 0x228   : > { %v6113_v3 = vpop.f32.mrb[16].mxu1  ;;  %v4647_v51 = vpop.f32.mrb[17].mxu0 }
 0x229   : > { %v4824_v28 = vadd.f32 %v4823_v5, %v4793_v61  ;;  %v6281_v45 = vadd.f32 %v6249_v44, %v6113_v3  ;;  %v2622_v27 = vpop.f32.mrb[17].mxu1  ;;  %v4756_v53 = vadd.f32 %v6279_v37, %v4755_v22  ;;  %v6250_v29 = vpop.f32.mrb[18].mxu0 }
 0x22a   : > { %v6282_v21 = vadd.f32 %v4647_v51, %v2622_v27  ;;  %v6114_v47 = vpop.f32.mrb[18].mxu1  ;;  %v4650_v46 = vpop.f32.mrb[19].mxu0 }
 0x22b   : > { %v4825_v15 = vadd.f32 %v4824_v28, %v4794_v55  ;;  %v6283_v60 = vadd.f32 %v6250_v29, %v6114_v47  ;;  %v2625_v20 = vpop.f32.mrb[19].mxu1  ;;  %v4797_v40 = vmul.f32 %v6281_v45, %v6281_v45 }
 0x22c   : > { %v4757_v42 = vadd.f32 %v6282_v21, %v4756_v53  ;;  %v4795_v33 = vmul.f32 %v6282_v21, %v6282_v21  ;;  %v6284_v12 = vadd.f32 %v4650_v46, %v2625_v20 }
 0x22d   : > { %v5757_v31 = vpack.c.bf16 %v6283_v60, %v6281_v45  ;;  %v4798_v43 = vmul.f32 %v6283_v60, %v6283_v60 }
 0x22e   : > { %v4826_v57 = vadd.f32 %v4825_v15, %v4795_v33  ;;  %v4758_v8 = vadd.f32 %v6284_v12, %v4757_v42  ;;  %v4796_v48 = vmul.f32 %v6284_v12, %v6284_v12  ;;  %v5752_v62 = vpack.c.bf16 %v6284_v12, %v6282_v21 }
 0x22f   : > { %5797 = vst [vmem:[%s8396_s18 + $0x48] sm:$0xff] %v5757_v31   ;;  %v6253_v56 = vpop.f32.mrb[20].mxu0 }
 0x230   : > { %v4759_v13 = vadd.f32 %v6281_v45, %v4758_v8  ;;  %v4827_v17 = vadd.f32 %v4826_v57, %v4796_v48  ;;  %5796 = vst [vmem:[%s8396_s18 + $0x40] sm:$0xff] %v5752_v62   ;;  %v6117_v30 = vpop.f32.mrb[20].mxu1  ;;  %v4663_v9 = vpop.f32.mrb[21].mxu0 }
 0x231   : > { %v6285_v14 = vadd.f32 %v6253_v56, %v6117_v30  ;;  %v2638_v63 = vpop.f32.mrb[21].mxu1  ;;  %v6254_v4 = vpop.f32.mrb[22].mxu0 }
 0x232   : > { %v4828_v16 = vadd.f32 %v4827_v17, %v4797_v40  ;;  %v6286_v58 = vadd.f32 %v4663_v9, %v2638_v63  ;;  %v4760_v50 = vadd.f32 %v6283_v60, %v4759_v13  ;;  %v6118_v54 = vpop.f32.mrb[22].mxu1  ;;  %v4666_v18 = vpop.f32.mrb[23].mxu0 }
 0x233   : > { %v6287_v52 = vadd.f32 %v6254_v4, %v6118_v54  ;;  %v2641_v11 = vpop.f32.mrb[23].mxu1  ;;  %v4801_v37 = vmul.f32 %v6285_v14, %v6285_v14 }
 0x234   : > { %v4761_v2 = vadd.f32 %v6286_v58, %v4760_v50  ;;  %v4799_v39 = vmul.f32 %v6286_v58, %v6286_v58  ;;  %v4829_v32 = vadd.f32 %v4828_v16, %v4798_v43  ;;  %v6288_v0 = vadd.f32 %v4666_v18, %v2641_v11 }
 0x235   : > { %v5767_v36 = vpack.c.bf16 %v6287_v52, %v6285_v14  ;;  %v4802_v41 = vmul.f32 %v6287_v52, %v6287_v52 }
 0x236   : > { %v4830_v24 = vadd.f32 %v4829_v32, %v4799_v39  ;;  %v4762_v10 = vadd.f32 %v6288_v0, %v4761_v2  ;;  %v4800_v59 = vmul.f32 %v6288_v0, %v6288_v0  ;;  %v5762_v19 = vpack.c.bf16 %v6288_v0, %v6286_v58 }
 0x237   : > { %5799 = vst [vmem:[%s8396_s18 + $0x58] sm:$0xff] %v5767_v36   ;;  %v6257_v38 = vpop.f32.mrb[24].mxu0 }
 0x238   : > { %v4763_v26 = vadd.f32 %v6285_v14, %v4762_v10  ;;  %v4831_v35 = vadd.f32 %v4830_v24, %v4800_v59  ;;  %5798 = vst [vmem:[%s8396_s18 + $0x50] sm:$0xff] %v5762_v19   ;;  %v6121_v34 = vpop.f32.mrb[24].mxu1  ;;  %v4679_v6 = vpop.f32.mrb[25].mxu0 }
 0x239   : > { %v6289_v49 = vadd.f32 %v6257_v38, %v6121_v34  ;;  %v2654_v23 = vpop.f32.mrb[25].mxu1  ;;  %v6258_v25 = vpop.f32.mrb[26].mxu0 }
 0x23a   : > { %v4832_v1 = vadd.f32 %v4831_v35, %v4801_v37  ;;  %v6290_v7 = vadd.f32 %v4679_v6, %v2654_v23  ;;  %v4764_v61 = vadd.f32 %v6287_v52, %v4763_v26  ;;  %v6122_v22 = vpop.f32.mrb[26].mxu1  ;;  %v4682_v5 = vpop.f32.mrb[27].mxu0 }
 0x23b   : > { %v6291_v44 = vadd.f32 %v6258_v25, %v6122_v22  ;;  %v2657_v3 = vpop.f32.mrb[27].mxu1  ;;  %v4805_v15 = vmul.f32 %v6289_v49, %v6289_v49 }
 0x23c   : > { %v4765_v51 = vadd.f32 %v6290_v7, %v4764_v61  ;;  %v4803_v55 = vmul.f32 %v6290_v7, %v6290_v7  ;;  %v4833_v28 = vadd.f32 %v4832_v1, %v4802_v41  ;;  %v6292_v45 = vadd.f32 %v4682_v5, %v2657_v3 }
 0x23d   : > { %v5777_v27 = vpack.c.bf16 %v6291_v44, %v6289_v49  ;;  %v4806_v8 = vmul.f32 %v6291_v44, %v6291_v44 }
 0x23e   : > { %v4834_v53 = vadd.f32 %v4833_v28, %v4803_v55  ;;  %v4766_v29 = vadd.f32 %v6292_v45, %v4765_v51  ;;  %v4804_v21 = vmul.f32 %v6292_v45, %v6292_v45  ;;  %v5772_v47 = vpack.c.bf16 %v6292_v45, %v6290_v7 }
 0x23f   : > { %5801 = vst [vmem:[%s8396_s18 + $0x68] sm:$0xff] %v5777_v27   ;;  %v6261_v46 = vpop.f32.mrb[28].mxu0 }
 0x240   : > { %v4767_v60 = vadd.f32 %v6289_v49, %v4766_v29  ;;  %v4835_v20 = vadd.f32 %v4834_v53, %v4804_v21  ;;  %5800 = vst [vmem:[%s8396_s18 + $0x60] sm:$0xff] %v5772_v47   ;;  %v6125_v42 = vpop.f32.mrb[28].mxu1  ;;  %v4695_v33 = vpop.f32.mrb[29].mxu0 }
 0x241   : > { %v6293_v12 = vadd.f32 %v6261_v46, %v6125_v42  ;;  %v2670_v31 = vpop.f32.mrb[29].mxu1  ;;  %v6262_v57 = vpop.f32.mrb[30].mxu0 }
 0x242   : > { %v4836_v48 = vadd.f32 %v4835_v20, %v4805_v15  ;;  %v6294_v62 = vadd.f32 %v4695_v33, %v2670_v31  ;;  %v4768_v56 = vadd.f32 %v6291_v44, %v4767_v60  ;;  %v6126_v40 = vpop.f32.mrb[30].mxu1  ;;  %v4698_v13 = vpop.f32.mrb[31].mxu0 }
 0x243   : > { %v6295_v17 = vadd.f32 %v6262_v57, %v6126_v40  ;;  %v2673_v30 = vpop.f32.mrb[31].mxu1  ;;  %v4809_v18 = vmul.f32 %v6293_v12, %v6293_v12 }
 0x244   : > { %v4769_v9 = vadd.f32 %v6294_v62, %v4768_v56  ;;  %v4807_v14 = vmul.f32 %v6294_v62, %v6294_v62  ;;  %v4837_v63 = vadd.f32 %v4836_v48, %v4806_v8  ;;  %v6296_v4 = vadd.f32 %v4698_v13, %v2673_v30 }
 0x245   : > { %v5787_v43 = vpack.c.bf16 %v6295_v17, %v6293_v12  ;;  %v4810_v2 = vmul.f32 %v6295_v17, %v6295_v17 }
 0x246   : > { %v4838_v16 = vadd.f32 %v4837_v63, %v4807_v14  ;;  %v4770_v58 = vadd.f32 %v6296_v4, %v4769_v9  ;;  %v4808_v50 = vmul.f32 %v6296_v4, %v6296_v4  ;;  %v5782_v54 = vpack.c.bf16 %v6296_v4, %v6294_v62 }
 0x247   : > { %5803 = vst [vmem:[%s8396_s18 + $0x78] sm:$0xff] %v5787_v43  }
 0x248   : > { %v4771_v52 = vadd.f32 %v6293_v12, %v4770_v58  ;;  %v4839_v11 = vadd.f32 %v4838_v16, %v4808_v50  ;;  %5802 = vst [vmem:[%s8396_s18 + $0x70] sm:$0xff] %v5782_v54  }
 0x24a   : > { %v4772_v39 = vadd.f32 %v6295_v17, %v4771_v52  ;;  %v4840_v32 = vadd.f32 %v4839_v11, %v4809_v18 }
 0x24c   : > { %v4773_v0 = vrot.slane %v4772_v39, 4  ;;  %v4841_v36 = vadd.f32 %v4840_v32, %v4810_v2 }
 0x24e   : > { %v4774_v24 = vadd.f32 %v4773_v0, %v4772_v39  ;;  %v4842_v10 = vrot.slane %v4841_v36, 4 }
 0x250   : > { %v4775_v59 = vrot.slane %v4774_v24, 2  ;;  %v4843_v19 = vadd.f32 %v4842_v10, %v4841_v36 }
 0x252   : > { %v4776_v38 = vadd.f32 %v4775_v59, %v4774_v24  ;;  %v4844_v37 = vrot.slane %v4843_v19, 2 }
 0x254   : > { %v4777_v26 = vrot.slane %v4776_v38, 1  ;;  %v4845_v35 = vadd.f32 %v4844_v37, %v4843_v19 }
 0x256   : > { %v4846_v34 = vrot.slane %v4845_v35, 1  ;;  %v4778_v6 = vadd.f32 %v4777_v26, %v4776_v38 }
 0x258   : > { %v4847_v49 = vadd.f32 %v4846_v34, %v4845_v35 }
 0x25a   : > { %v4849_v23 = vsel %vm4848_vm8, %v4778_v6, %v4847_v49 }
 0x25b   : > { %4850 = vst [vmem:[%s181_s22] sm:$0x3] %v4849_v23 }
 0x25c PF: > { %s14_s12 = sadd.s32 1, %s6651_s12  }
 0x25d   : > { %p11_p4 = scmp.ge.s32.totalorder %s14_s12, 4  }
 0x25f   :  { %13 = sbr.rel (!%p11_p4) target bundleno = 1 (0x1), region = 80 }

</bundles_post_ra>
